<compile_context>
chip_gen: v5e
topology: v5e:2x2
jax: 0.10.0
libtpu: 0.0.40
codegen_flags: <defaults>
</compile_context>

<pallas_src>
import math
from functools import partial

import jax
import jax.numpy as jnp
from jax.experimental import pallas as pl
from jax.experimental.pallas import tpu as pltpu


# ----------------------------- in-kernel helpers -------------------------------

def _layernorm(x, g, b):
    # PyTorch nn.LayerNorm default eps=1e-5.
    mu = jnp.mean(x, axis=-1, keepdims=True)
    xc = x - mu
    var = jnp.mean(xc * xc, axis=-1, keepdims=True)
    return xc * jax.lax.rsqrt(var + 1e-5) * g + b


# ----------------------------- fused Pallas kernel ------------------------------

def _san_lpe_fused_kernel(L, H, Dh,
                          pos_ref, bias_ref, valid_ref, h_ref,
                          lin_a_ref,
                          wqkv_ref, wo_ref, w1_ref, w2_ref, bf1_ref, lvec_ref,
                          embw_ref, w0t_ref, w0b_ref, w1r_ref, w2r_ref, rb_ref,
                          o_ref):
    """Whole SAN_NodeLPE LPE path + readout for one node block, entirely in VMEM."""
    tb, S, _ = pos_ref.shape
    D = H * Dh
    M = tb * S

    # ---- linear_A positional embedding: K=2 contraction on the VPU (broadcast-MAC) ----
    pos = pos_ref[...]                                  # [tb, S, 2] (NaNs already zeroed)
    la = lin_a_ref[...]                                 # [3, D]  (w_row0, w_row1, bias)
    pe = (pos[:, :, 0:1] * la[0:1, :][None]
          + pos[:, :, 1:2] * la[1:2, :][None]
          + la[2:3, :][None])                           # [tb, S, D]

    kbias = bias_ref[...]                               # [tb, 1, S] additive key-pad bias
    x = pe.reshape(M, D)                                # token rows

    # ---- LPE transformer encoder: static loop over layers (weights stacked on L) ----
    for li in range(L):
        vec = lvec_ref[li]                              # [9, D] packed small vectors
        # fused QKV projection: one MXU push instead of 6 per-head ones
        qkv = jnp.dot(x, wqkv_ref[li], preferred_element_type=jnp.float32)   # [M, 3D]

        heads = []
        for h in range(H):
            o0, o1 = h * Dh, (h + 1) * Dh
            q = (qkv[:, o0:o1] + vec[0:1, o0:o1]).reshape(tb, S, Dh)          # pre-scaled
            k = (qkv[:, D + o0:D + o1] + vec[1:2, o0:o1]).reshape(tb, S, Dh)
            v = (qkv[:, 2 * D + o0:2 * D + o1] + vec[2:3, o0:o1]).reshape(tb, S, Dh)
            s = jnp.einsum('bqd,bkd->bqk', q, k,
                           preferred_element_type=jnp.float32) + kbias        # [tb,S,S]
            m = jnp.max(s, axis=-1, keepdims=True)
            p = jnp.exp(s - m)
            inv = pl.reciprocal(jnp.sum(p, axis=-1, keepdims=True), approx=True)
            o_h = jnp.einsum('bqk,bkd->bqd', p * inv, v,
                             preferred_element_type=jnp.float32)              # [tb,S,Dh]
            heads.append(o_h.reshape(M, Dh))

        attn = jnp.concatenate(heads, axis=-1) if H > 1 else heads[0]         # [M, D]
        # single out-projection matmul (replaces per-head accumulate chain)
        attn = jnp.dot(attn, wo_ref[li], preferred_element_type=jnp.float32) + vec[3:4, :]

        # residual + LN1
        x = _layernorm(x + attn, vec[4:5, :], vec[5:6, :])

        # feed-forward (hidden [M, dim_ff] never leaves VMEM) + residual + LN2
        hid = jnp.maximum(
            jnp.dot(x, w1_ref[li], preferred_element_type=jnp.float32) + bf1_ref[li], 0.0)
        ff = jnp.dot(hid, w2_ref[li], preferred_element_type=jnp.float32) + vec[6:7, :]
        x = _layernorm(x + ff, vec[7:8, :], vec[8:9, :])

    # ---- masked nansum over the eigen dim + embedding_h + concat + MLPReadout --------
    pe_sum = jnp.sum(x.reshape(tb, S, D) * valid_ref[...], axis=1)            # [tb, D]

    rb = rb_ref[...]                                                          # [4, W] packed
    d_emb = embw_ref.shape[1]
    d0 = w0t_ref.shape[1]
    d1 = w1r_ref.shape[1]
    d2 = w2r_ref.shape[1]

    he = jnp.dot(h_ref[...], embw_ref[...],
                 preferred_element_type=jnp.float32) + rb[0:1, :d_emb]        # [tb, GH-LPE]
    # concat((he, pe_sum)) @ fc0  ==  he @ fc0_top + pe_sum @ fc0_bottom
    y = (jnp.dot(he, w0t_ref[...], preferred_element_type=jnp.float32)
         + jnp.dot(pe_sum, w0b_ref[...], preferred_element_type=jnp.float32)
         + rb[1:2, :d0])
    y = jnp.maximum(y, 0.0)
    y = jnp.maximum(jnp.dot(y, w1r_ref[...], preferred_element_type=jnp.float32)
                    + rb[2:3, :d1], 0.0)
    o_ref[...] = jnp.dot(y, w2r_ref[...], preferred_element_type=jnp.float32) + rb[3:4, :d2]


# ----------------------------- parameter setup ---------------------------------

def _init_linear(key, fan_in, fan_out):
    # PyTorch nn.Linear default init (uniform +/- 1/sqrt(fan_in)); stored as [fan_in, fan_out].
    k1, k2 = jax.random.split(key)
    bound = 1.0 / math.sqrt(fan_in)
    w = jax.random.uniform(k1, (fan_in, fan_out), jnp.float32, -bound, bound)
    b = jax.random.uniform(k2, (fan_out,), jnp.float32, -bound, bound)
    return w, b


def _init_pe_layer(key, D, H, F):
    """One nn.TransformerEncoderLayer; returns (wqkv, wo, w1, w2, bf1, packed_vecs)."""
    Dh = D // H
    scale = 1.0 / math.sqrt(Dh)
    ks = jax.random.split(key, 4)
    in_w, in_b = _init_linear(ks[0], D, 3 * D)       # [D, 3D]
    out_w, out_b = _init_linear(ks[1], D, D)
    ff1_w, ff1_b = _init_linear(ks[2], D, F)
    ff2_w, ff2_b = _init_linear(ks[3], F, D)

    # fold 1/sqrt(Dh) into the Q projection (weights AND bias) -> no in-kernel scale mul
    in_w = in_w.at[:, :D].multiply(scale)
    bq = in_b[:D] * scale
    bk = in_b[D:2 * D]
    bv = in_b[2 * D:]

    ones = jnp.ones((D,), jnp.float32)
    zeros = jnp.zeros((D,), jnp.float32)
    # rows: bq, bk, bv, bo, g1, be1, bf2, g2, be2
    vecs = jnp.stack([bq, bk, bv, out_b, ones, zeros, ff2_b, ones, zeros], axis=0)  # [9, D]
    return in_w, out_w, ff1_w, ff2_w, ff1_b.reshape(1, F), vecs


def init_params(key, net_params):
    in_dim = net_params['in_dim']
    D = net_params['LPE_dim']
    H = net_params['LPE_n_heads']
    GTh = net_params['GT_hidden_dim']
    GTo = net_params['GT_out_dim']
    n_classes = net_params['n_classes']
    L = net_params['LPE_layers']
    F = 2048  # nn.TransformerEncoderLayer default dim_feedforward

    keys = jax.random.split(key, 6)
    emb_w, emb_b = _init_linear(keys[0], in_dim, GTh - D)
    la_w, la_b = _init_linear(keys[1], 2, D)
    lin_a = jnp.concatenate([la_w, la_b.reshape(1, D)], axis=0)          # [3, D]

    layer_keys = jax.random.split(keys[2], L)
    parts = [_init_pe_layer(lk, D, H, F) for lk in layer_keys]
    wqkv = jnp.stack([p[0] for p in parts])                              # [L, D, 3D]
    wo = jnp.stack([p[1] for p in parts])                                # [L, D, D]
    w1 = jnp.stack([p[2] for p in parts])                                # [L, D, F]
    w2 = jnp.stack([p[3] for p in parts])                                # [L, F, D]
    bf1 = jnp.stack([p[4] for p in parts])                               # [L, 1, F]
    lvec = jnp.stack([p[5] for p in parts])                              # [L, 9, D]

    # MLPReadout(GT_out, n_classes), L=2: GT_out -> GT_out/2 -> GT_out/4 -> n_classes
    fc0_w, fc0_b = _init_linear(keys[3], GTo, GTo // 2)
    fc1_w, fc1_b = _init_linear(keys[4], GTo // 2, GTo // 4)
    fc2_w, fc2_b = _init_linear(keys[5], GTo // 4, n_classes)

    split = GTh - D                          # h-embedding part of the concat comes first
    widths = [GTh - D, GTo // 2, GTo // 4, n_classes]
    W = max(widths)
    rb = jnp.zeros((4, W), jnp.float32)
    rb = rb.at[0, :widths[0]].set(emb_b)
    rb = rb.at[1, :widths[1]].set(fc0_b)
    rb = rb.at[2, :widths[2]].set(fc1_b)
    rb = rb.at[3, :widths[3]].set(fc2_b)

    return dict(lin_a=lin_a,
                wqkv=wqkv, wo=wo, w1=w1, w2=w2, bf1=bf1, lvec=lvec,
                emb_w=emb_w, w0t=fc0_w[:split], w0b=fc0_w[split:],
                w1r=fc1_w, w2r=fc2_w, rbias=rb)


# ----------------------------- forward (wrapper) --------------------------------

def _node_block(N, K):
    """~1024 flattened token rows per grid step (f32 [rows, 2048] FFN hidden ~8 MiB),
    but capped so larger graphs get >= 2 grid steps (keeps both v7x TCs busy)."""
    target_rows = 1024
    tb = max(8, ((target_rows // max(K, 1)) // 8) * 8)
    if N > 8:
        half = (((N + 1) // 2 + 7) // 8) * 8          # ceil(N/2) rounded up to 8
        tb = min(tb, half)
    tb = min(tb, ((N + 7) // 8) * 8)                  # never exceed padded N
    return tb


def san_node_lpe_forward(params, net_params, h, eigvecs, eigvals):
    """h: [N, in_dim]; eigvecs: [N, K] (NaN-padded); eigvals: [N, K, 1] (NaN-padded)."""
    D = net_params['LPE_dim']
    H = net_params['LPE_n_heads']
    Dh = D // H
    L = net_params['LPE_layers']
    n_classes = net_params['n_classes']

    N, in_dim = h.shape
    K = eigvecs.shape[1]

    ev = eigvecs.astype(jnp.float32)
    el = eigvals.reshape(N, K).astype(jnp.float32)

    # Tiny one-time NaN bookkeeping on the raw inputs (plain XLA elementwise).
    pad = jnp.isnan(ev)                                                  # key-padding mask
    posenc = jnp.concatenate(
        [jnp.where(pad, 0.0, ev)[..., None],
         jnp.where(jnp.isnan(el), 0.0, el)[..., None]], axis=2)          # [N, K, 2]
    attn_bias = jnp.where(pad, jnp.float32(-1e30), 0.0)[:, None, :]      # [N, 1, K]
    valid = jnp.where(pad, 0.0, 1.0)[:, :, None]                         # [N, K, 1]
    hf = h.astype(jnp.float32)

    tb = _node_block(N, K)
    n_blocks = pl.cdiv(N, tb)
    N_pad = n_blocks * tb
    if N_pad != N:
        # zero-pad so the last grid step never sees uninitialized data (no transient NaN/inf)
        p = N_pad - N
        posenc = jnp.pad(posenc, ((0, p), (0, 0), (0, 0)))
        attn_bias = jnp.pad(attn_bias, ((0, p), (0, 0), (0, 0)))
        valid = jnp.pad(valid, ((0, p), (0, 0), (0, 0)))
        hf = jnp.pad(hf, ((0, p), (0, 0)))

    def full_spec(a):
        return pl.BlockSpec(a.shape, lambda i, _nd=a.ndim: (0,) * _nd)

    weights = (params['lin_a'], params['wqkv'], params['wo'], params['w1'],
               params['w2'], params['bf1'], params['lvec'],
               params['emb_w'], params['w0t'], params['w0b'],
               params['w1r'], params['w2r'], params['rbias'])

    # TODO(synk): GraphTransformerLayer stack (KAN-based DGL graph conv) is not defined in
    # the reference snippet and depends on the graph `g`; treated as identity here
    # (requires GT_out_dim == GT_hidden_dim). embedding_e is likewise unused.
    out = pl.pallas_call(
        partial(_san_lpe_fused_kernel, L, H, Dh),
        out_shape=jax.ShapeDtypeStruct((N_pad, n_classes), jnp.float32),
        grid=(n_blocks,),
        in_specs=[pl.BlockSpec((tb, K, 2), lambda i: (i, 0, 0)),
                  pl.BlockSpec((tb, 1, K), lambda i: (i, 0, 0)),
                  pl.BlockSpec((tb, K, 1), lambda i: (i, 0, 0)),
                  pl.BlockSpec((tb, in_dim), lambda i: (i, 0))]
                 + [full_spec(w) for w in weights],
        out_specs=pl.BlockSpec((tb, n_classes), lambda i: (i, 0)),
        compiler_params=pltpu.CompilerParams(
            dimension_semantics=("parallel",),
            vmem_limit_bytes=48 * 1024 * 1024),
    )(posenc, attn_bias, valid, hf, *weights)

    return out[:N]


# ----------------------------------- main ---------------------------------------

if __name__ == "__main__":
    net_params = dict(
        in_dim=16, n_classes=4, full_graph=True, gamma=1e-5,
        LPE_layers=1, LPE_dim=16, LPE_n_heads=2,
        GT_layers=2, GT_hidden_dim=32, GT_out_dim=32, GT_n_heads=4,
        residual=True, in_feat_dropout=0.0, dropout=0.0, kind='kan',
        layer_norm=False, batch_norm=True,
        spline_order=3, grid_size=5, hidden_layers=1, device='tpu',
    )

    N_nodes, K_eig = 8, 8
    key = jax.random.PRNGKey(0)
    k_param, k_h, k_vec, k_val = jax.random.split(key, 4)

    params = init_params(k_param, net_params)

    h = jax.random.normal(k_h, (N_nodes, net_params['in_dim']), jnp.float32)
    eigvecs = jax.random.normal(k_vec, (N_nodes, K_eig), jnp.float32)
    eigvals = jax.random.normal(k_val, (N_nodes, K_eig, 1), jnp.float32)

    # NaN padding (each node keeps >=1 valid eigen-pair), like ragged eigendecompositions.
    valid_counts = K_eig - (jnp.arange(N_nodes) % 3)                  # 8,7,6,8,...
    pad_mask = jnp.arange(K_eig)[None, :] >= valid_counts[:, None]    # [N, K] bool
    eigvecs = jnp.where(pad_mask, jnp.nan, eigvecs)
    eigvals = jnp.where(pad_mask[:, :, None], jnp.nan, eigvals)

    fwd = jax.jit(lambda p, hh, evec, evl: san_node_lpe_forward(p, net_params, hh, evec, evl))
    out = jax.block_until_ready(fwd(params, h, eigvecs, eigvals))

    assert out.shape == (N_nodes, net_params['n_classes'])
    assert bool(jnp.all(jnp.isfinite(out)))
    print("KERNEL_OK")
</pallas_src>

<mosaic_0001>
module attributes {stable_mosaic.version = 11 : i64} {
  func.func @_san_lpe_fused_kernel(%arg0: i32, %arg1: memref<8x8x2xf32, #tpu.memory_space<vmem>>, %arg2: memref<8x1x8xf32, #tpu.memory_space<vmem>>, %arg3: memref<8x8x1xf32, #tpu.memory_space<vmem>>, %arg4: memref<8x16xf32, #tpu.memory_space<vmem>>, %arg5: memref<3x16xf32, #tpu.memory_space<vmem>>, %arg6: memref<1x16x48xf32, #tpu.memory_space<vmem>>, %arg7: memref<1x16x16xf32, #tpu.memory_space<vmem>>, %arg8: memref<1x16x2048xf32, #tpu.memory_space<vmem>>, %arg9: memref<1x2048x16xf32, #tpu.memory_space<vmem>>, %arg10: memref<1x1x2048xf32, #tpu.memory_space<vmem>>, %arg11: memref<1x9x16xf32, #tpu.memory_space<vmem>>, %arg12: memref<16x16xf32, #tpu.memory_space<vmem>>, %arg13: memref<16x16xf32, #tpu.memory_space<vmem>>, %arg14: memref<16x16xf32, #tpu.memory_space<vmem>>, %arg15: memref<16x8xf32, #tpu.memory_space<vmem>>, %arg16: memref<8x4xf32, #tpu.memory_space<vmem>>, %arg17: memref<4x16xf32, #tpu.memory_space<vmem>>, %arg18: memref<8x4xf32, #tpu.memory_space<vmem>>) attributes {dimension_semantics = [#tpu.dimension_semantics<parallel>], iteration_bounds = array<i64: 1>, scalar_prefetch = 0 : i64, scratch_operands = 0 : i64, tpu.core_type = #tpu.core_type<tc>, window_params = [{transform_indices = @transform_0, window_bounds = array<i64: 8, 8, 2>}, {transform_indices = @transform_1, window_bounds = array<i64: 8, 1, 8>}, {transform_indices = @transform_2, window_bounds = array<i64: 8, 8, 1>}, {transform_indices = @transform_3, window_bounds = array<i64: 8, 16>}, {pipeline_mode = #tpu.pipeline_mode<synchronous>, transform_indices = @transform_4, window_bounds = array<i64: 3, 16>}, {pipeline_mode = #tpu.pipeline_mode<synchronous>, transform_indices = @transform_5, window_bounds = array<i64: 1, 16, 48>}, {pipeline_mode = #tpu.pipeline_mode<synchronous>, transform_indices = @transform_6, window_bounds = array<i64: 1, 16, 16>}, {pipeline_mode = #tpu.pipeline_mode<synchronous>, transform_indices = @transform_7, window_bounds = array<i64: 1, 16, 2048>}, {pipeline_mode = #tpu.pipeline_mode<synchronous>, transform_indices = @transform_8, window_bounds = array<i64: 1, 2048, 16>}, {pipeline_mode = #tpu.pipeline_mode<synchronous>, transform_indices = @transform_9, window_bounds = array<i64: 1, 1, 2048>}, {pipeline_mode = #tpu.pipeline_mode<synchronous>, transform_indices = @transform_10, window_bounds = array<i64: 1, 9, 16>}, {pipeline_mode = #tpu.pipeline_mode<synchronous>, transform_indices = @transform_11, window_bounds = array<i64: 16, 16>}, {pipeline_mode = #tpu.pipeline_mode<synchronous>, transform_indices = @transform_12, window_bounds = array<i64: 16, 16>}, {pipeline_mode = #tpu.pipeline_mode<synchronous>, transform_indices = @transform_13, window_bounds = array<i64: 16, 16>}, {pipeline_mode = #tpu.pipeline_mode<synchronous>, transform_indices = @transform_14, window_bounds = array<i64: 16, 8>}, {pipeline_mode = #tpu.pipeline_mode<synchronous>, transform_indices = @transform_15, window_bounds = array<i64: 8, 4>}, {pipeline_mode = #tpu.pipeline_mode<synchronous>, transform_indices = @transform_16, window_bounds = array<i64: 4, 16>}, {transform_indices = @transform_17, window_bounds = array<i64: 8, 4>}]} {
    %c0 = arith.constant 0 : index
    %c0_0 = arith.constant 0 : index
    %c0_1 = arith.constant 0 : index
    %0 = vector.load %arg1[%c0, %c0_0, %c0_1] : memref<8x8x2xf32, #tpu.memory_space<vmem>>, vector<8x8x2xf32>
    %c0_2 = arith.constant 0 : index
    %c0_3 = arith.constant 0 : index
    %1 = vector.load %arg5[%c0_2, %c0_3] : memref<3x16xf32, #tpu.memory_space<vmem>>, vector<3x16xf32>
    %2 = vector.extract_strided_slice %0 {offsets = [0, 0, 0], sizes = [8, 8, 1], strides = [1, 1, 1]} : vector<8x8x2xf32> to vector<8x8x1xf32>
    %3 = vector.extract_strided_slice %1 {offsets = [0, 0], sizes = [1, 16], strides = [1, 1]} : vector<3x16xf32> to vector<1x16xf32>
    %4 = vector.shape_cast %3 : vector<1x16xf32> to vector<1x1x16xf32>
    %5 = vector.broadcast %2 : vector<8x8x1xf32> to vector<8x8x16xf32>
    %6 = vector.broadcast %4 : vector<1x1x16xf32> to vector<8x8x16xf32>
    %7 = arith.mulf %5, %6 : vector<8x8x16xf32>
    %8 = vector.extract_strided_slice %0 {offsets = [0, 0, 1], sizes = [8, 8, 1], strides = [1, 1, 1]} : vector<8x8x2xf32> to vector<8x8x1xf32>
    %9 = vector.extract_strided_slice %1 {offsets = [1, 0], sizes = [1, 16], strides = [1, 1]} : vector<3x16xf32> to vector<1x16xf32>
    %10 = vector.shape_cast %9 : vector<1x16xf32> to vector<1x1x16xf32>
    %11 = vector.broadcast %8 : vector<8x8x1xf32> to vector<8x8x16xf32>
    %12 = vector.broadcast %10 : vector<1x1x16xf32> to vector<8x8x16xf32>
    %13 = arith.mulf %11, %12 : vector<8x8x16xf32>
    %14 = arith.addf %7, %13 : vector<8x8x16xf32>
    %15 = vector.extract_strided_slice %1 {offsets = [2, 0], sizes = [1, 16], strides = [1, 1]} : vector<3x16xf32> to vector<1x16xf32>
    %16 = vector.shape_cast %15 : vector<1x16xf32> to vector<1x1x16xf32>
    %17 = vector.broadcast %16 : vector<1x1x16xf32> to vector<8x8x16xf32>
    %18 = arith.addf %14, %17 : vector<8x8x16xf32>
    %c0_4 = arith.constant 0 : index
    %c0_5 = arith.constant 0 : index
    %c0_6 = arith.constant 0 : index
    %19 = vector.load %arg2[%c0_4, %c0_5, %c0_6] : memref<8x1x8xf32, #tpu.memory_space<vmem>>, vector<8x1x8xf32>
    %20 = vector.shape_cast %18 : vector<8x8x16xf32> to vector<64x16xf32>
    %c0_7 = arith.constant 0 : index
    %c0_8 = arith.constant 0 : index
    %c0_9 = arith.constant 0 : index
    %21 = vector.load %arg11[%c0_7, %c0_8, %c0_9] : memref<1x9x16xf32, #tpu.memory_space<vmem>>, vector<1x9x16xf32>
    %22 = vector.shape_cast %21 : vector<1x9x16xf32> to vector<9x16xf32>
    %c0_10 = arith.constant 0 : index
    %c0_11 = arith.constant 0 : index
    %c0_12 = arith.constant 0 : index
    %23 = vector.load %arg6[%c0_10, %c0_11, %c0_12] : memref<1x16x48xf32, #tpu.memory_space<vmem>>, vector<1x16x48xf32>
    %24 = vector.shape_cast %23 : vector<1x16x48xf32> to vector<16x48xf32>
    %cst = arith.constant dense<0.000000e+00> : vector<64x48xf32>
    %25 = tpu.matmul %20, %24, %cst {dimension_numbers = #tpu.dot_dimension_numbers<[1], [0], [0], [1], [0, 0, 1, 1], [], []>} : vector<64x16xf32>, vector<16x48xf32>, vector<64x48xf32> -> vector<64x48xf32>
    %26 = vector.extract_strided_slice %25 {offsets = [0, 0], sizes = [64, 8], strides = [1, 1]} : vector<64x48xf32> to vector<64x8xf32>
    %27 = vector.extract_strided_slice %22 {offsets = [0, 0], sizes = [1, 8], strides = [1, 1]} : vector<9x16xf32> to vector<1x8xf32>
    %28 = vector.broadcast %27 : vector<1x8xf32> to vector<64x8xf32>
    %29 = arith.addf %26, %28 : vector<64x8xf32>
    %30 = vector.shape_cast %29 : vector<64x8xf32> to vector<8x8x8xf32>
    %31 = vector.extract_strided_slice %25 {offsets = [0, 16], sizes = [64, 8], strides = [1, 1]} : vector<64x48xf32> to vector<64x8xf32>
    %32 = vector.extract_strided_slice %22 {offsets = [1, 0], sizes = [1, 8], strides = [1, 1]} : vector<9x16xf32> to vector<1x8xf32>
    %33 = vector.broadcast %32 : vector<1x8xf32> to vector<64x8xf32>
    %34 = arith.addf %31, %33 : vector<64x8xf32>
    %35 = vector.shape_cast %34 : vector<64x8xf32> to vector<8x8x8xf32>
    %36 = vector.extract_strided_slice %25 {offsets = [0, 32], sizes = [64, 8], strides = [1, 1]} : vector<64x48xf32> to vector<64x8xf32>
    %37 = vector.extract_strided_slice %22 {offsets = [2, 0], sizes = [1, 8], strides = [1, 1]} : vector<9x16xf32> to vector<1x8xf32>
    %38 = vector.broadcast %37 : vector<1x8xf32> to vector<64x8xf32>
    %39 = arith.addf %36, %38 : vector<64x8xf32>
    %40 = vector.shape_cast %39 : vector<64x8xf32> to vector<8x8x8xf32>
    "tpu.trace_start"() <{level = 10 : i32, message = "bqd,bkd->bqk"}> : () -> ()
    %cst_13 = arith.constant dense<0.000000e+00> : vector<8x8x8xf32>
    %41 = tpu.matmul %30, %35, %cst_13 {dimension_numbers = #tpu.dot_dimension_numbers<[2], [2], [1], [1], [0, 0, 0, 1, 1, 1], [0], [0]>} : vector<8x8x8xf32>, vector<8x8x8xf32>, vector<8x8x8xf32> -> vector<8x8x8xf32>
    "tpu.trace_stop"() : () -> ()
    %42 = vector.broadcast %19 : vector<8x1x8xf32> to vector<8x8x8xf32>
    %43 = arith.addf %41, %42 : vector<8x8x8xf32>
    %cst_14 = arith.constant dense<0xFF800000> : vector<8x8xf32>
    %44 = vector.multi_reduction <maximumf>, %43, %cst_14 [2] : vector<8x8x8xf32> to vector<8x8xf32>
    %45 = vector.shape_cast %44 : vector<8x8xf32> to vector<8x8x1xf32>
    %46 = vector.broadcast %45 : vector<8x8x1xf32> to vector<8x8x8xf32>
    %47 = arith.subf %43, %46 : vector<8x8x8xf32>
    %48 = math.exp %47 : vector<8x8x8xf32>
    %cst_15 = arith.constant dense<0.000000e+00> : vector<8x8xf32>
    %49 = vector.multi_reduction <add>, %48, %cst_15 [2] : vector<8x8x8xf32> to vector<8x8xf32>
    %50 = vector.shape_cast %49 : vector<8x8xf32> to vector<8x8x1xf32>
    %51 = tpu.reciprocal %50 {approx = true} : vector<8x8x1xf32> -> vector<8x8x1xf32>
    %52 = vector.broadcast %51 : vector<8x8x1xf32> to vector<8x8x8xf32>
    %53 = arith.mulf %48, %52 : vector<8x8x8xf32>
    "tpu.trace_start"() <{level = 10 : i32, message = "bqk,bkd->bqd"}> : () -> ()
    %cst_16 = arith.constant dense<0.000000e+00> : vector<8x8x8xf32>
    %54 = tpu.matmul %53, %40, %cst_16 {dimension_numbers = #tpu.dot_dimension_numbers<[2], [1], [1], [2], [0, 0, 0, 1, 1, 2], [0], [0]>} : vector<8x8x8xf32>, vector<8x8x8xf32>, vector<8x8x8xf32> -> vector<8x8x8xf32>
    "tpu.trace_stop"() : () -> ()
    %55 = vector.shape_cast %54 : vector<8x8x8xf32> to vector<64x8xf32>
    %56 = vector.extract_strided_slice %25 {offsets = [0, 8], sizes = [64, 8], strides = [1, 1]} : vector<64x48xf32> to vector<64x8xf32>
    %57 = vector.extract_strided_slice %22 {offsets = [0, 8], sizes = [1, 8], strides = [1, 1]} : vector<9x16xf32> to vector<1x8xf32>
    %58 = vector.broadcast %57 : vector<1x8xf32> to vector<64x8xf32>
    %59 = arith.addf %56, %58 : vector<64x8xf32>
    %60 = vector.shape_cast %59 : vector<64x8xf32> to vector<8x8x8xf32>
    %61 = vector.extract_strided_slice %25 {offsets = [0, 24], sizes = [64, 8], strides = [1, 1]} : vector<64x48xf32> to vector<64x8xf32>
    %62 = vector.extract_strided_slice %22 {offsets = [1, 8], sizes = [1, 8], strides = [1, 1]} : vector<9x16xf32> to vector<1x8xf32>
    %63 = vector.broadcast %62 : vector<1x8xf32> to vector<64x8xf32>
    %64 = arith.addf %61, %63 : vector<64x8xf32>
    %65 = vector.shape_cast %64 : vector<64x8xf32> to vector<8x8x8xf32>
    %66 = vector.extract_strided_slice %25 {offsets = [0, 40], sizes = [64, 8], strides = [1, 1]} : vector<64x48xf32> to vector<64x8xf32>
    %67 = vector.extract_strided_slice %22 {offsets = [2, 8], sizes = [1, 8], strides = [1, 1]} : vector<9x16xf32> to vector<1x8xf32>
    %68 = vector.broadcast %67 : vector<1x8xf32> to vector<64x8xf32>
    %69 = arith.addf %66, %68 : vector<64x8xf32>
    %70 = vector.shape_cast %69 : vector<64x8xf32> to vector<8x8x8xf32>
    "tpu.trace_start"() <{level = 10 : i32, message = "bqd,bkd->bqk"}> : () -> ()
    %cst_17 = arith.constant dense<0.000000e+00> : vector<8x8x8xf32>
    %71 = tpu.matmul %60, %65, %cst_17 {dimension_numbers = #tpu.dot_dimension_numbers<[2], [2], [1], [1], [0, 0, 0, 1, 1, 1], [0], [0]>} : vector<8x8x8xf32>, vector<8x8x8xf32>, vector<8x8x8xf32> -> vector<8x8x8xf32>
    "tpu.trace_stop"() : () -> ()
    %72 = vector.broadcast %19 : vector<8x1x8xf32> to vector<8x8x8xf32>
    %73 = arith.addf %71, %72 : vector<8x8x8xf32>
    %cst_18 = arith.constant dense<0xFF800000> : vector<8x8xf32>
    %74 = vector.multi_reduction <maximumf>, %73, %cst_18 [2] : vector<8x8x8xf32> to vector<8x8xf32>
    %75 = vector.shape_cast %74 : vector<8x8xf32> to vector<8x8x1xf32>
    %76 = vector.broadcast %75 : vector<8x8x1xf32> to vector<8x8x8xf32>
    %77 = arith.subf %73, %76 : vector<8x8x8xf32>
    %78 = math.exp %77 : vector<8x8x8xf32>
    %cst_19 = arith.constant dense<0.000000e+00> : vector<8x8xf32>
    %79 = vector.multi_reduction <add>, %78, %cst_19 [2] : vector<8x8x8xf32> to vector<8x8xf32>
    %80 = vector.shape_cast %79 : vector<8x8xf32> to vector<8x8x1xf32>
    %81 = tpu.reciprocal %80 {approx = true} : vector<8x8x1xf32> -> vector<8x8x1xf32>
    %82 = vector.broadcast %81 : vector<8x8x1xf32> to vector<8x8x8xf32>
    %83 = arith.mulf %78, %82 : vector<8x8x8xf32>
    "tpu.trace_start"() <{level = 10 : i32, message = "bqk,bkd->bqd"}> : () -> ()
    %cst_20 = arith.constant dense<0.000000e+00> : vector<8x8x8xf32>
    %84 = tpu.matmul %83, %70, %cst_20 {dimension_numbers = #tpu.dot_dimension_numbers<[2], [1], [1], [2], [0, 0, 0, 1, 1, 2], [0], [0]>} : vector<8x8x8xf32>, vector<8x8x8xf32>, vector<8x8x8xf32> -> vector<8x8x8xf32>
    "tpu.trace_stop"() : () -> ()
    %85 = vector.shape_cast %84 : vector<8x8x8xf32> to vector<64x8xf32>
    %86 = tpu.concatenate %55, %85 in 1 : vector<64x8xf32>, vector<64x8xf32> -> vector<64x16xf32>
    %c0_21 = arith.constant 0 : index
    %c0_22 = arith.constant 0 : index
    %c0_23 = arith.constant 0 : index
    %87 = vector.load %arg7[%c0_21, %c0_22, %c0_23] : memref<1x16x16xf32, #tpu.memory_space<vmem>>, vector<1x16x16xf32>
    %88 = vector.shape_cast %87 : vector<1x16x16xf32> to vector<16x16xf32>
    %cst_24 = arith.constant dense<0.000000e+00> : vector<64x16xf32>
    %89 = tpu.matmul %86, %88, %cst_24 {dimension_numbers = #tpu.dot_dimension_numbers<[1], [0], [0], [1], [0, 0, 1, 1], [], []>} : vector<64x16xf32>, vector<16x16xf32>, vector<64x16xf32> -> vector<64x16xf32>
    %90 = vector.extract_strided_slice %22 {offsets = [3, 0], sizes = [1, 16], strides = [1, 1]} : vector<9x16xf32> to vector<1x16xf32>
    %91 = vector.broadcast %90 : vector<1x16xf32> to vector<64x16xf32>
    %92 = arith.addf %89, %91 : vector<64x16xf32>
    %93 = arith.addf %20, %92 : vector<64x16xf32>
    %94 = vector.extract_strided_slice %22 {offsets = [4, 0], sizes = [1, 16], strides = [1, 1]} : vector<9x16xf32> to vector<1x16xf32>
    %95 = vector.extract_strided_slice %22 {offsets = [5, 0], sizes = [1, 16], strides = [1, 1]} : vector<9x16xf32> to vector<1x16xf32>
    %cst_25 = arith.constant dense<0.000000e+00> : vector<64xf32>
    %96 = vector.multi_reduction <add>, %93, %cst_25 [1] : vector<64x16xf32> to vector<64xf32>
    %97 = vector.shape_cast %96 : vector<64xf32> to vector<64x1xf32>
    %cst_26 = arith.constant 1.600000e+01 : f32
    %98 = vector.broadcast %cst_26 : f32 to vector<64x1xf32>
    %99 = arith.divf %97, %98 : vector<64x1xf32>
    %100 = vector.broadcast %99 : vector<64x1xf32> to vector<64x16xf32>
    %101 = arith.subf %93, %100 : vector<64x16xf32>
    %102 = arith.mulf %101, %101 : vector<64x16xf32>
    %cst_27 = arith.constant dense<0.000000e+00> : vector<64xf32>
    %103 = vector.multi_reduction <add>, %102, %cst_27 [1] : vector<64x16xf32> to vector<64xf32>
    %104 = vector.shape_cast %103 : vector<64xf32> to vector<64x1xf32>
    %cst_28 = arith.constant 1.600000e+01 : f32
    %105 = vector.broadcast %cst_28 : f32 to vector<64x1xf32>
    %106 = arith.divf %104, %105 : vector<64x1xf32>
    %cst_29 = arith.constant 9.99999974E-6 : f32
    %107 = vector.broadcast %cst_29 : f32 to vector<64x1xf32>
    %108 = arith.addf %106, %107 : vector<64x1xf32>
    %109 = math.rsqrt %108 : vector<64x1xf32>
    %110 = vector.broadcast %109 : vector<64x1xf32> to vector<64x16xf32>
    %111 = arith.mulf %101, %110 : vector<64x16xf32>
    %112 = vector.broadcast %94 : vector<1x16xf32> to vector<64x16xf32>
    %113 = arith.mulf %111, %112 : vector<64x16xf32>
    %114 = vector.broadcast %95 : vector<1x16xf32> to vector<64x16xf32>
    %115 = arith.addf %113, %114 : vector<64x16xf32>
    %c0_30 = arith.constant 0 : index
    %c0_31 = arith.constant 0 : index
    %c0_32 = arith.constant 0 : index
    %116 = vector.load %arg8[%c0_30, %c0_31, %c0_32] : memref<1x16x2048xf32, #tpu.memory_space<vmem>>, vector<1x16x2048xf32>
    %117 = vector.shape_cast %116 : vector<1x16x2048xf32> to vector<16x2048xf32>
    %cst_33 = arith.constant dense<0.000000e+00> : vector<64x2048xf32>
    %118 = tpu.matmul %115, %117, %cst_33 {dimension_numbers = #tpu.dot_dimension_numbers<[1], [0], [0], [1], [0, 0, 1, 1], [], []>} : vector<64x16xf32>, vector<16x2048xf32>, vector<64x2048xf32> -> vector<64x2048xf32>
    %c0_34 = arith.constant 0 : index
    %c0_35 = arith.constant 0 : index
    %c0_36 = arith.constant 0 : index
    %119 = vector.load %arg10[%c0_34, %c0_35, %c0_36] : memref<1x1x2048xf32, #tpu.memory_space<vmem>>, vector<1x1x2048xf32>
    %120 = vector.shape_cast %119 : vector<1x1x2048xf32> to vector<1x2048xf32>
    %121 = vector.broadcast %120 : vector<1x2048xf32> to vector<64x2048xf32>
    %122 = arith.addf %118, %121 : vector<64x2048xf32>
    %cst_37 = arith.constant 0.000000e+00 : f32
    %123 = vector.broadcast %cst_37 : f32 to vector<64x2048xf32>
    %124 = arith.maximumf %122, %123 : vector<64x2048xf32>
    %c0_38 = arith.constant 0 : index
    %c0_39 = arith.constant 0 : index
    %c0_40 = arith.constant 0 : index
    %125 = vector.load %arg9[%c0_38, %c0_39, %c0_40] : memref<1x2048x16xf32, #tpu.memory_space<vmem>>, vector<1x2048x16xf32>
    %126 = vector.shape_cast %125 : vector<1x2048x16xf32> to vector<2048x16xf32>
    %cst_41 = arith.constant dense<0.000000e+00> : vector<64x16xf32>
    %127 = tpu.matmul %124, %126, %cst_41 {dimension_numbers = #tpu.dot_dimension_numbers<[1], [0], [0], [1], [0, 0, 1, 1], [], []>} : vector<64x2048xf32>, vector<2048x16xf32>, vector<64x16xf32> -> vector<64x16xf32>
    %128 = vector.extract_strided_slice %22 {offsets = [6, 0], sizes = [1, 16], strides = [1, 1]} : vector<9x16xf32> to vector<1x16xf32>
    %129 = vector.broadcast %128 : vector<1x16xf32> to vector<64x16xf32>
    %130 = arith.addf %127, %129 : vector<64x16xf32>
    %131 = arith.addf %115, %130 : vector<64x16xf32>
    %132 = vector.extract_strided_slice %22 {offsets = [7, 0], sizes = [1, 16], strides = [1, 1]} : vector<9x16xf32> to vector<1x16xf32>
    %133 = vector.extract_strided_slice %22 {offsets = [8, 0], sizes = [1, 16], strides = [1, 1]} : vector<9x16xf32> to vector<1x16xf32>
    %cst_42 = arith.constant dense<0.000000e+00> : vector<64xf32>
    %134 = vector.multi_reduction <add>, %131, %cst_42 [1] : vector<64x16xf32> to vector<64xf32>
    %135 = vector.shape_cast %134 : vector<64xf32> to vector<64x1xf32>
    %cst_43 = arith.constant 1.600000e+01 : f32
    %136 = vector.broadcast %cst_43 : f32 to vector<64x1xf32>
    %137 = arith.divf %135, %136 : vector<64x1xf32>
    %138 = vector.broadcast %137 : vector<64x1xf32> to vector<64x16xf32>
    %139 = arith.subf %131, %138 : vector<64x16xf32>
    %140 = arith.mulf %139, %139 : vector<64x16xf32>
    %cst_44 = arith.constant dense<0.000000e+00> : vector<64xf32>
    %141 = vector.multi_reduction <add>, %140, %cst_44 [1] : vector<64x16xf32> to vector<64xf32>
    %142 = vector.shape_cast %141 : vector<64xf32> to vector<64x1xf32>
    %cst_45 = arith.constant 1.600000e+01 : f32
    %143 = vector.broadcast %cst_45 : f32 to vector<64x1xf32>
    %144 = arith.divf %142, %143 : vector<64x1xf32>
    %cst_46 = arith.constant 9.99999974E-6 : f32
    %145 = vector.broadcast %cst_46 : f32 to vector<64x1xf32>
    %146 = arith.addf %144, %145 : vector<64x1xf32>
    %147 = math.rsqrt %146 : vector<64x1xf32>
    %148 = vector.broadcast %147 : vector<64x1xf32> to vector<64x16xf32>
    %149 = arith.mulf %139, %148 : vector<64x16xf32>
    %150 = vector.broadcast %132 : vector<1x16xf32> to vector<64x16xf32>
    %151 = arith.mulf %149, %150 : vector<64x16xf32>
    %152 = vector.broadcast %133 : vector<1x16xf32> to vector<64x16xf32>
    %153 = arith.addf %151, %152 : vector<64x16xf32>
    %154 = vector.shape_cast %153 : vector<64x16xf32> to vector<8x8x16xf32>
    %c0_47 = arith.constant 0 : index
    %c0_48 = arith.constant 0 : index
    %c0_49 = arith.constant 0 : index
    %155 = vector.load %arg3[%c0_47, %c0_48, %c0_49] : memref<8x8x1xf32, #tpu.memory_space<vmem>>, vector<8x8x1xf32>
    %156 = vector.shape_cast %155 : vector<8x8x1xf32> to vector<8x8x1xf32>
    %157 = vector.broadcast %156 : vector<8x8x1xf32> to vector<8x8x16xf32>
    %158 = arith.mulf %154, %157 : vector<8x8x16xf32>
    %cst_50 = arith.constant dense<0.000000e+00> : vector<8x16xf32>
    %159 = vector.multi_reduction <add>, %158, %cst_50 [1] : vector<8x8x16xf32> to vector<8x16xf32>
    %c0_51 = arith.constant 0 : index
    %c0_52 = arith.constant 0 : index
    %160 = vector.load %arg17[%c0_51, %c0_52] : memref<4x16xf32, #tpu.memory_space<vmem>>, vector<4x16xf32>
    %c0_53 = arith.constant 0 : index
    %c0_54 = arith.constant 0 : index
    %161 = vector.load %arg4[%c0_53, %c0_54] : memref<8x16xf32, #tpu.memory_space<vmem>>, vector<8x16xf32>
    %c0_55 = arith.constant 0 : index
    %c0_56 = arith.constant 0 : index
    %162 = vector.load %arg12[%c0_55, %c0_56] : memref<16x16xf32, #tpu.memory_space<vmem>>, vector<16x16xf32>
    %cst_57 = arith.constant dense<0.000000e+00> : vector<8x16xf32>
    %163 = tpu.matmul %161, %162, %cst_57 {dimension_numbers = #tpu.dot_dimension_numbers<[1], [0], [0], [1], [0, 0, 1, 1], [], []>} : vector<8x16xf32>, vector<16x16xf32>, vector<8x16xf32> -> vector<8x16xf32>
    %164 = vector.extract_strided_slice %160 {offsets = [0, 0], sizes = [1, 16], strides = [1, 1]} : vector<4x16xf32> to vector<1x16xf32>
    %165 = vector.broadcast %164 : vector<1x16xf32> to vector<8x16xf32>
    %166 = arith.addf %163, %165 : vector<8x16xf32>
    %c0_58 = arith.constant 0 : index
    %c0_59 = arith.constant 0 : index
    %167 = vector.load %arg13[%c0_58, %c0_59] : memref<16x16xf32, #tpu.memory_space<vmem>>, vector<16x16xf32>
    %cst_60 = arith.constant dense<0.000000e+00> : vector<8x16xf32>
    %168 = tpu.matmul %166, %167, %cst_60 {dimension_numbers = #tpu.dot_dimension_numbers<[1], [0], [0], [1], [0, 0, 1, 1], [], []>} : vector<8x16xf32>, vector<16x16xf32>, vector<8x16xf32> -> vector<8x16xf32>
    %c0_61 = arith.constant 0 : index
    %c0_62 = arith.constant 0 : index
    %169 = vector.load %arg14[%c0_61, %c0_62] : memref<16x16xf32, #tpu.memory_space<vmem>>, vector<16x16xf32>
    %cst_63 = arith.constant dense<0.000000e+00> : vector<8x16xf32>
    %170 = tpu.matmul %159, %169, %cst_63 {dimension_numbers = #tpu.dot_dimension_numbers<[1], [0], [0], [1], [0, 0, 1, 1], [], []>} : vector<8x16xf32>, vector<16x16xf32>, vector<8x16xf32> -> vector<8x16xf32>
    %171 = arith.addf %168, %170 : vector<8x16xf32>
    %172 = vector.extract_strided_slice %160 {offsets = [1, 0], sizes = [1, 16], strides = [1, 1]} : vector<4x16xf32> to vector<1x16xf32>
    %173 = vector.broadcast %172 : vector<1x16xf32> to vector<8x16xf32>
    %174 = arith.addf %171, %173 : vector<8x16xf32>
    %cst_64 = arith.constant 0.000000e+00 : f32
    %175 = vector.broadcast %cst_64 : f32 to vector<8x16xf32>
    %176 = arith.maximumf %174, %175 : vector<8x16xf32>
    %c0_65 = arith.constant 0 : index
    %c0_66 = arith.constant 0 : index
    %177 = vector.load %arg15[%c0_65, %c0_66] : memref<16x8xf32, #tpu.memory_space<vmem>>, vector<16x8xf32>
    %cst_67 = arith.constant dense<0.000000e+00> : vector<8x8xf32>
    %178 = tpu.matmul %176, %177, %cst_67 {dimension_numbers = #tpu.dot_dimension_numbers<[1], [0], [0], [1], [0, 0, 1, 1], [], []>} : vector<8x16xf32>, vector<16x8xf32>, vector<8x8xf32> -> vector<8x8xf32>
    %179 = vector.extract_strided_slice %160 {offsets = [2, 0], sizes = [1, 8], strides = [1, 1]} : vector<4x16xf32> to vector<1x8xf32>
    %180 = vector.broadcast %179 : vector<1x8xf32> to vector<8x8xf32>
    %181 = arith.addf %178, %180 : vector<8x8xf32>
    %cst_68 = arith.constant 0.000000e+00 : f32
    %182 = vector.broadcast %cst_68 : f32 to vector<8x8xf32>
    %183 = arith.maximumf %181, %182 : vector<8x8xf32>
    %c0_69 = arith.constant 0 : index
    %c0_70 = arith.constant 0 : index
    %184 = vector.load %arg16[%c0_69, %c0_70] : memref<8x4xf32, #tpu.memory_space<vmem>>, vector<8x4xf32>
    %cst_71 = arith.constant dense<0.000000e+00> : vector<8x4xf32>
    %185 = tpu.matmul %183, %184, %cst_71 {dimension_numbers = #tpu.dot_dimension_numbers<[1], [0], [0], [1], [0, 0, 1, 1], [], []>} : vector<8x8xf32>, vector<8x4xf32>, vector<8x4xf32> -> vector<8x4xf32>
    %186 = vector.extract_strided_slice %160 {offsets = [3, 0], sizes = [1, 4], strides = [1, 1]} : vector<4x16xf32> to vector<1x4xf32>
    %187 = vector.broadcast %186 : vector<1x4xf32> to vector<8x4xf32>
    %188 = arith.addf %185, %187 : vector<8x4xf32>
    %c0_72 = arith.constant 0 : index
    %c0_73 = arith.constant 0 : index
    %189 = vector.load %arg18[%c0_72, %c0_73] : memref<8x4xf32, #tpu.memory_space<vmem>>, vector<8x4xf32>
    tpu.vector_store %arg18[%c0_72, %c0_73], %188 {strides = array<i32>} : memref<8x4xf32, #tpu.memory_space<vmem>>, vector<8x4xf32>,
    return
  }
  func.func @transform_0(%arg0: i32) -> (i32, i32, i32) {
    %c0_i32 = arith.constant 0 : i32
    %c0_i32_0 = arith.constant 0 : i32
    %c0_i32_1 = arith.constant 0 : i32
    return %arg0, %c0_i32, %c0_i32_0 : i32, i32, i32
  }
  func.func @transform_1(%arg0: i32) -> (i32, i32, i32) {
    %c0_i32 = arith.constant 0 : i32
    %c0_i32_0 = arith.constant 0 : i32
    %c0_i32_1 = arith.constant 0 : i32
    return %arg0, %c0_i32, %c0_i32_0 : i32, i32, i32
  }
  func.func @transform_2(%arg0: i32) -> (i32, i32, i32) {
    %c0_i32 = arith.constant 0 : i32
    %c0_i32_0 = arith.constant 0 : i32
    %c0_i32_1 = arith.constant 0 : i32
    return %arg0, %c0_i32, %c0_i32_0 : i32, i32, i32
  }
  func.func @transform_3(%arg0: i32) -> (i32, i32) {
    %c0_i32 = arith.constant 0 : i32
    %c0_i32_0 = arith.constant 0 : i32
    return %arg0, %c0_i32 : i32, i32
  }
  func.func @transform_4(%arg0: i32) -> (i32, i32) {
    %c0_i32 = arith.constant 0 : i32
    %c0_i32_0 = arith.constant 0 : i32
    %c0_i32_1 = arith.constant 0 : i32
    return %c0_i32, %c0_i32_0 : i32, i32
  }
  func.func @transform_5(%arg0: i32) -> (i32, i32, i32) {
    %c0_i32 = arith.constant 0 : i32
    %c0_i32_0 = arith.constant 0 : i32
    %c0_i32_1 = arith.constant 0 : i32
    %c0_i32_2 = arith.constant 0 : i32
    return %c0_i32, %c0_i32_0, %c0_i32_1 : i32, i32, i32
  }
  func.func @transform_6(%arg0: i32) -> (i32, i32, i32) {
    %c0_i32 = arith.constant 0 : i32
    %c0_i32_0 = arith.constant 0 : i32
    %c0_i32_1 = arith.constant 0 : i32
    %c0_i32_2 = arith.constant 0 : i32
    return %c0_i32, %c0_i32_0, %c0_i32_1 : i32, i32, i32
  }
  func.func @transform_7(%arg0: i32) -> (i32, i32, i32) {
    %c0_i32 = arith.constant 0 : i32
    %c0_i32_0 = arith.constant 0 : i32
    %c0_i32_1 = arith.constant 0 : i32
    %c0_i32_2 = arith.constant 0 : i32
    return %c0_i32, %c0_i32_0, %c0_i32_1 : i32, i32, i32
  }
  func.func @transform_8(%arg0: i32) -> (i32, i32, i32) {
    %c0_i32 = arith.constant 0 : i32
    %c0_i32_0 = arith.constant 0 : i32
    %c0_i32_1 = arith.constant 0 : i32
    %c0_i32_2 = arith.constant 0 : i32
    return %c0_i32, %c0_i32_0, %c0_i32_1 : i32, i32, i32
  }
  func.func @transform_9(%arg0: i32) -> (i32, i32, i32) {
    %c0_i32 = arith.constant 0 : i32
    %c0_i32_0 = arith.constant 0 : i32
    %c0_i32_1 = arith.constant 0 : i32
    %c0_i32_2 = arith.constant 0 : i32
    return %c0_i32, %c0_i32_0, %c0_i32_1 : i32, i32, i32
  }
  func.func @transform_10(%arg0: i32) -> (i32, i32, i32) {
    %c0_i32 = arith.constant 0 : i32
    %c0_i32_0 = arith.constant 0 : i32
    %c0_i32_1 = arith.constant 0 : i32
    %c0_i32_2 = arith.constant 0 : i32
    return %c0_i32, %c0_i32_0, %c0_i32_1 : i32, i32, i32
  }
  func.func @transform_11(%arg0: i32) -> (i32, i32) {
    %c0_i32 = arith.constant 0 : i32
    %c0_i32_0 = arith.constant 0 : i32
    %c0_i32_1 = arith.constant 0 : i32
    return %c0_i32, %c0_i32_0 : i32, i32
  }
  func.func @transform_12(%arg0: i32) -> (i32, i32) {
    %c0_i32 = arith.constant 0 : i32
    %c0_i32_0 = arith.constant 0 : i32
    %c0_i32_1 = arith.constant 0 : i32
    return %c0_i32, %c0_i32_0 : i32, i32
  }
  func.func @transform_13(%arg0: i32) -> (i32, i32) {
    %c0_i32 = arith.constant 0 : i32
    %c0_i32_0 = arith.constant 0 : i32
    %c0_i32_1 = arith.constant 0 : i32
    return %c0_i32, %c0_i32_0 : i32, i32
  }
  func.func @transform_14(%arg0: i32) -> (i32, i32) {
    %c0_i32 = arith.constant 0 : i32
    %c0_i32_0 = arith.constant 0 : i32
    %c0_i32_1 = arith.constant 0 : i32
    return %c0_i32, %c0_i32_0 : i32, i32
  }
  func.func @transform_15(%arg0: i32) -> (i32, i32) {
    %c0_i32 = arith.constant 0 : i32
    %c0_i32_0 = arith.constant 0 : i32
    %c0_i32_1 = arith.constant 0 : i32
    return %c0_i32, %c0_i32_0 : i32, i32
  }
  func.func @transform_16(%arg0: i32) -> (i32, i32) {
    %c0_i32 = arith.constant 0 : i32
    %c0_i32_0 = arith.constant 0 : i32
    %c0_i32_1 = arith.constant 0 : i32
    return %c0_i32, %c0_i32_0 : i32, i32
  }
  func.func @transform_17(%arg0: i32) -> (i32, i32) {
    %c0_i32 = arith.constant 0 : i32
    %c0_i32_0 = arith.constant 0 : i32
    return %arg0, %c0_i32 : i32, i32
  }
}

</mosaic_0001>

<bundles_post_ra>
// kernel: _lambda_.1
= control target key start
LH: loop header
LB: loop body
LE: loop exit
PB: predicated region body
PF: predicated region fallthrough
CT: control target
= control target key end

     0   :  { %v4305_v0 = vmov 0   ;;  %v4306_v4 = vmov 1   ;;  %s4307_s19 = smov 16   ;;  %vm184_vm0 = vcmask 130048   ;;  %s4309_s20 = smov 120   ;;  %vm312_vm1 = vcmask 64512   ;;  %s7049_s0 = inlined_call_operand.vmem [shape: f32[8,8,2], index: 0, kind: input, shape index: {}]   ;;  %s7050_s10 = inlined_call_operand.vmem [shape: f32[1,9,16], index: 10, kind: input, shape index: {}]   ;;  %s7051_s5 = inlined_call_operand.vmem [shape: f32[1,16,48], index: 5, kind: input, shape index: {}]   ;;  %s7052_s4 = inlined_call_operand.vmem [shape: f32[3,16], index: 4, kind: input, shape index: {}]   ;;  %s7053_s1 = inlined_call_operand.vmem [shape: f32[8,1,8], index: 1, kind: input, shape index: {}]   ;;  %s7054_s6 = inlined_call_operand.vmem [shape: f32[1,16,16], index: 6, kind: input, shape index: {}]   ;;  %s7055_s7 = inlined_call_operand.vmem [shape: f32[1,16,2048], index: 7, kind: input, shape index: {}]   ;;  %s7056_s8 = inlined_call_operand.vmem [shape: f32[1,2048,16], index: 8, kind: input, shape index: {}]   ;;  %s7057_s9 = inlined_call_operand.vmem [shape: f32[1,1,2048], index: 9, kind: input, shape index: {}]   ;;  %s7058_s2 = inlined_call_operand.vmem [shape: f32[8,8,1], index: 2, kind: input, shape index: {}]   ;;  %s7059_s11 = inlined_call_operand.vmem [shape: f32[16,16], index: 11, kind: input, shape index: {}]   ;;  %s7060_s3 = inlined_call_operand.vmem [shape: f32[8,16], index: 3, kind: input, shape index: {}]   ;;  %s7061_s13 = inlined_call_operand.vmem [shape: f32[16,16], index: 13, kind: input, shape index: {}]   ;;  %s7062_s12 = inlined_call_operand.vmem [shape: f32[16,16], index: 12, kind: input, shape index: {}]   ;;  %s7063_s16 = inlined_call_operand.vmem [shape: f32[4,16], index: 16, kind: input, shape index: {}]   ;;  %s7064_s14 = inlined_call_operand.vmem [shape: f32[16,8], index: 14, kind: input, shape index: {}]   ;;  %s7065_s15 = inlined_call_operand.vmem [shape: f32[8,4], index: 15, kind: input, shape index: {}]   ;;  %s7066_s17 = inlined_call_operand.vmem [shape: f32[8,4], index: 17, kind: output, shape index: {}]  }
   0x1   :  { %7079 = sst [smem:[#allocation31_spill]] %s7049_s0  ;;  %4152 = vset.pattern.permute.xlu1 %v4305_v0  ;;  %4150 = vset.pattern.permute.xlu0 %v4305_v0  ;;  %v183_v10 = vld [vmem:[%s7051_s5 + $0x8] sm:$0xff]  ;;  %v182_v11 = vld [vmem:[%s7051_s5] sm:$0xff]  ;;  %s4310_s21 = smov 104  }
   0x2   :  { %7080 = sst [smem:[#allocation32_spill]] %s7050_s10  ;;  %4154 = vset.pattern.permute.xlu2 %v4305_v0  ;;  %223 = vmatpush.msra.mxu0 %v183_v10  ;;  %v64_v18 = vld [vmem:[%s7052_s4] sm:$0x7]  ;;  %s4308_s4 = smov 112  }
   0x3   :  { %s7081_s26 = sld [smem:[#allocation31_spill]]  ;;  %4136 = vmatpush.msra.mxu3 %v183_v10  ;;  %4135 = vmatpush.msra.mxu1 %v183_v10  ;;  %v105_v20 = vperm.slane %v64_v18, 0  ;;  %v146_v21 = vperm.slane %v64_v18, 1  ;;  %v163_v27 = vperm.slane %v64_v18, 2  ;;  %s4311_s22 = smov 32  }
   0x4   :  { %224 = vmatpush.msra.mxu0 %v182_v11  ;;  %s7082_s18 = sld [smem:[#allocation32_spill]]  ;;  %s4312_s23 = smov 96  }
   0x5   :  { %4138 = vmatpush.msra.mxu3 %v182_v11  ;;  %4137 = vmatpush.msra.mxu1 %v182_v11 }
   0x9   :  { %v57_v1 = vld [vmem:[%s7081_s26 + $0x8] sm:$0xff]  ;;  %v56_v2 = vld [vmem:[%s7081_s26] sm:$0xff]  ;;  %v58_v3 = vld [vmem:[%s7081_s26 + $0x10] sm:$0xff] }
   0xa   :  { %72 = vperm.xlu1 %4152, %v57_v1   ;;  %67 = vperm.xlu0 %4150, %v56_v2   ;;  %v61_v5 = vld [vmem:[%s7081_s26 + $0x28] sm:$0xff]  ;;  %v62_v6 = vld [vmem:[%s7081_s26 + $0x30] sm:$0xff]  ;;  %v60_v7 = vld [vmem:[%s7081_s26 + $0x20] sm:$0xff] }
   0xb   :  { %77 = vperm.xlu2 %4154, %v58_v3   ;;  %v59_v8 = vld [vmem:[%s7081_s26 + $0x18] sm:$0xff]  ;;  %v4439_v13 = vld [vmem:[%s7082_s18] sm:$0xff] }
   0xc   :  { %v63_v9 = vld [vmem:[%s7081_s26 + $0x38] sm:$0xff]  ;;  %v259_v14 = vperm.slane %v4439_v13, 1 }
  0x12   :  { %4153 = vset.pattern.permute.xlu1 %v4306_v4  ;;  %4151 = vset.pattern.permute.xlu0 %v4306_v4 }
  0x13   :  { %119 = vperm.xlu1 %4153, %v57_v1   ;;  %115 = vperm.xlu0 %4151, %v56_v2  }
  0x14   :  { %4155 = vset.pattern.permute.xlu2 %v4306_v4 }
  0x15   :  { %123 = vperm.xlu2 %4155, %v58_v3  }
  0x1b   :  { %4156 = vset.pattern.permute.xlu1 %v4305_v0  ;;  %4157 = vset.pattern.permute.xlu0 %v4305_v0 }
  0x1c   :  { %92 = vperm.xlu1 %4156, %v61_v5   ;;  %97 = vperm.xlu0 %4157, %v62_v6  }
  0x1d   :  { %135 = vperm.xlu2 %4155, %v61_v5  }
  0x24   :  { %4158 = vset.pattern.permute.xlu1 %v4306_v4  ;;  %4160 = vset.pattern.permute.xlu0 %v4306_v4 }
  0x25   :  { %139 = vperm.xlu1 %4158, %v62_v6   ;;  %131 = vperm.xlu0 %4160, %v60_v7  }
  0x26   :  { %4159 = vset.pattern.permute.xlu2 %v4305_v0 }
  0x27   :  { %82 = vperm.xlu2 %4159, %v59_v8  }
  0x2d   :  { %127 = vperm.xlu1 %4158, %v59_v8   ;;  %4193 = vset.pattern.permute.xlu0 %v4305_v0 }
  0x2f   :  { %87 = vperm.xlu2 %4159, %v60_v7  }
  0x35   :  { %4161 = vset.pattern.permute.xlu1 %v4305_v0 }
  0x36   :  { %102 = vperm.xlu1 %4161, %v63_v9  }
  0x37   :  { %4162 = vset.pattern.permute.xlu2 %v4306_v4 }
  0x38   :  { %143 = vperm.xlu2 %4162, %v63_v9  }
  0x3e   :  { %261 = vrot.lane.b32.xlu1 %v259_v14, %s4307_s19 }
  0x40   :  { %4194 = vset.pattern.permute.xlu2 %v4305_v0 }
  0x65   :  { %v78_v12 = vpop.permute.xlu2 %77 }
  0x66   :  { %v108_v38 = vmul.f32 %v105_v20, %v78_v12  ;;  %v4491_v12 = vperm.slane %v4439_v13, 0 }
  0x6f   :  { %v124_v15 = vpop.permute.xlu2 %123 }
  0x70   :  { %v149_v39 = vmul.f32 %v146_v21, %v124_v15 }
  0x72   :  { %v157_v43 = vadd.f32 %v149_v39, %v108_v38 }
  0x74   :  { %v4457_v52 = vadd.f32 %v163_v27, %v157_v43 }
  0x77   :  { %v136_v19 = vpop.permute.xlu2 %135 }
  0x78   :  { %v152_v35 = vmul.f32 %v146_v21, %v136_v19 }
  0x7c   :  { %v73_v16 = vpop.permute.xlu1 %72  ;;  %v68_v17 = vpop.permute.xlu0 %67 }
  0x7d   :  { %v106_v24 = vmul.f32 %v105_v20, %v68_v17  ;;  %v107_v31 = vmul.f32 %v105_v20, %v73_v16 }
  0x81   :  { %v83_v30 = vpop.permute.xlu2 %82 }
  0x82   :  { %v109_v56 = vmul.f32 %v105_v20, %v83_v30 }
  0x85   :  { %v120_v22 = vpop.permute.xlu1 %119  ;;  %v116_v23 = vpop.permute.xlu0 %115 }
  0x86   :  { %v147_v25 = vmul.f32 %v146_v21, %v116_v23  ;;  %v148_v28 = vmul.f32 %v146_v21, %v120_v22 }
  0x88   :  { %v155_v26 = vadd.f32 %v147_v25, %v106_v24  ;;  %v156_v32 = vadd.f32 %v148_v28, %v107_v31 }
  0x89   :  { %v88_v42 = vpop.permute.xlu2 %87 }
  0x8a   :  { %v4445_v29 = vadd.f32 %v163_v27, %v155_v26  ;;  %v4449_v40 = vadd.f32 %v163_v27, %v156_v32  ;;  %v110_v47 = vmul.f32 %v105_v20, %v88_v42 }
  0x8c   :  { %3938 = vmatmul.msk.f32.vlgmr.msra.gmra.mxu0 %vm184_vm0, %v4445_v29 }
  0x8e   :  { %v93_v33 = vpop.permute.xlu1 %92  ;;  %v98_v34 = vpop.permute.xlu0 %97 }
  0x8f   :  { %v111_v36 = vmul.f32 %v105_v20, %v93_v33  ;;  %v112_v46 = vmul.f32 %v105_v20, %v98_v34 }
  0x91   :  { %v160_v37 = vadd.f32 %v152_v35, %v111_v36 }
  0x92   :  { %v144_v60 = vpop.permute.xlu2 %143 }
  0x93   :  { %v4451_v41 = vadd.f32 %v163_v27, %v160_v37  ;;  %v154_v61 = vmul.f32 %v146_v21, %v144_v60 }
  0x94   :  { %3939 = vmatmul.msk.f32.gmra.mxu0 %vm184_vm0, %v4449_v40 }
  0x95   :  { %3943 = vmatmul.msk.f32.vlgmr.msra.gmra.mxu3 %vm184_vm0, %v4451_v41 }
  0x97   :  { %v140_v44 = vpop.permute.xlu1 %139  ;;  %v132_v45 = vpop.permute.xlu0 %131 }
  0x98   :  { %v153_v48 = vmul.f32 %v146_v21, %v140_v44  ;;  %v151_v49 = vmul.f32 %v146_v21, %v132_v45 }
  0x9a   :  { %v161_v50 = vadd.f32 %v153_v48, %v112_v46  ;;  %v159_v51 = vadd.f32 %v151_v49, %v110_v47 }
  0x9c   :  { %3940 = vmatmul.msk.f32.gmra.mxu0 %vm184_vm0, %v4457_v52  ;;  %v4461_v53 = vadd.f32 %v163_v27, %v159_v51  ;;  %v4463_v54 = vadd.f32 %v163_v27, %v161_v50 }
  0x9e   :  { %3942 = vmatmul.msk.f32.vlgmr.msra.gmra.mxu1 %vm184_vm0, %v4461_v53  ;;  %3944 = vmatmul.msk.f32.gmra.mxu3 %vm184_vm0, %v4463_v54 }
  0x9f   :  { %v128_v55 = vpop.permute.xlu1 %127 }
  0xa0   :  { %v150_v57 = vmul.f32 %v146_v21, %v128_v55 }
  0xa2   :  { %v158_v58 = vadd.f32 %v150_v57, %v109_v56 }
  0xa4   :  { %v4469_v59 = vadd.f32 %v163_v27, %v158_v58 }
  0xa6   :  { %3941 = vmatmul.msk.f32.gmra.mxu0 %vm184_vm0, %v4469_v59 }
  0xa8   :  { %v103_v62 = vpop.permute.xlu1 %102 }
  0xa9   :  { %v113_v63 = vmul.f32 %v105_v20, %v103_v62  ;;  %v272_v20 = vperm.slane %v4439_v13, 2 }
  0xab   :  { %v162_v0 = vadd.f32 %v154_v61, %v113_v63 }
  0xad   :  { %v4473_v1 = vadd.f32 %v163_v27, %v162_v0  ;;  %v4590_v0 = vld [vmem:[%s7053_s1 + $0x2] ss:$0 sm:$0xff] }
  0xaf   :  { %3945 = vmatmul.msk.f32.gmra.mxu3 %vm184_vm0, %v4473_v1 }
  0xb0   :  { %v262_v2 = vpop.permute.xlu1 %261 }
 0x109   :  { %v226_v3 = vpop.f32.mrf.mxu0 }
 0x10a   :  { %v264_v4 = vadd.f32 %v262_v2, %v226_v3  ;;  %v251_v17 = vadd.f32 %v4491_v12, %v226_v3 }
 0x10c   :  { %310 = vrot.lane.b32.xlu1 %v264_v4, %s4308_s4 }
 0x111   :  { %v229_v5 = vpop.f32.mrf.mxu0 }
 0x112   :  { %v265_v14 = vadd.f32 %v262_v2, %v229_v5  ;;  %v252_v23 = vadd.f32 %v4491_v12, %v229_v5 }
 0x118   :  { %v241_v6 = vpop.f32.mrf.mxu3 }
 0x119   :  { %v232_v7 = vpop.f32.mrf.mxu0  ;;  %v4478_v8 = vadd.f32 %v262_v2, %v241_v6  ;;  %v4525_v31 = vadd.f32 %v4491_v12, %v241_v6 }
 0x11a   :  { %v4480_v9 = vadd.f32 %v262_v2, %v232_v7  ;;  %v4515_v13 = vadd.f32 %v4491_v12, %v232_v7 }
 0x11b   :  { %451 = vrot.lane.b32.xlu0 %v4478_v8, %s4308_s4  ;;  %v238_v10 = vpop.f32.mrf.mxu1 }
 0x11c   :  { %367 = vrot.lane.b32.xlu2 %v4480_v9, %s4308_s4  ;;  %v4486_v11 = vadd.f32 %v262_v2, %v238_v10  ;;  %v4547_v43 = vadd.f32 %v4491_v12, %v238_v10 }
 0x11e   :  { %423 = vrot.lane.b32.xlu1 %v4486_v11, %s4308_s4 }
 0x121   :  { %v244_v18 = vpop.f32.mrf.mxu3 }
 0x122   :  { %v4500_v19 = vadd.f32 %v262_v2, %v244_v18  ;;  %v4577_v51 = vadd.f32 %v4491_v12, %v244_v18 }
 0x123   :  { %v235_v15 = vpop.f32.mrf.mxu0 }
 0x124   :  { %339 = vrot.lane.b32.xlu2 %v265_v14, %s4308_s4  ;;  %v4494_v16 = vadd.f32 %v262_v2, %v235_v15  ;;  %v4568_v50 = vadd.f32 %v4491_v12, %v235_v15 }
 0x126   :  { %395 = vrot.lane.b32.xlu0 %v4494_v16, %s4308_s4  ;;  %838 = vrot.lane.b32.xlu1 %v251_v17, %s4309_s20 }
 0x12c   :  { %479 = vrot.lane.b32.xlu2 %v4500_v19, %s4308_s4 }
 0x12e   :  { %868 = vrot.lane.b32.xlu1 %v265_v14, %s4310_s21 }
 0x132   :  { %v247_v21 = vpop.f32.mrf.mxu3 }
 0x133   :  { %v4506_v22 = vadd.f32 %v262_v2, %v247_v21  ;;  %v4583_v56 = vadd.f32 %v4491_v12, %v247_v21  ;;  %v4595_v2 = vld [vmem:[%s7053_s1] ss:$0 sm:$0xff] }
 0x134   :  { %274 = vrot.lane.b32.xlu2 %v272_v20, %s4311_s22 }
 0x135   :  { %507 = vrot.lane.b32.xlu0 %v4506_v22, %s4308_s4 }
 0x136   :  { %866 = vrot.lane.b32.xlu1 %v252_v23, %s4309_s20 }
 0x13d   :  { %840 = vrot.lane.b32.xlu0 %v264_v4, %s4310_s21 }
 0x176   :  { %v368_v24 = vpop.permute.xlu2 %367 }
 0x177   :  { %3950 = vmatpush.xpose.msk.msrb.mxu3 %vm312_vm1, %v368_v24  ;;  %v4622_v24 = vld [vmem:[%s7053_s1 + $0x5] ss:$0 sm:$0xff] }
 0x17a   :  { %3951 = vmatmul.msk.f32.vlgmr.msrb.gmra.mxu3 %vm312_vm1, %v4515_v13 }
 0x17e   :  { %v311_v25 = vpop.permute.xlu1 %310  ;;  %v340_v26 = vpop.permute.xlu2 %339 }
 0x17f   :  { %3946 = vmatpush.xpose.msk.msrb.mxu1 %vm312_vm1, %v311_v25  ;;  %3948 = vmatpush.xpose.msk.msra.mxu2 %vm312_vm1, %v340_v26 }
 0x182   :  { %3947 = vmatmul.msk.f32.vlgmr.msrb.gmra.mxu1 %vm312_vm1, %v251_v17  ;;  %3949 = vmatmul.msk.f32.vlgmr.msra.gmra.mxu2 %vm312_vm1, %v252_v23  ;;  %v4611_v17 = vld [vmem:[%s7053_s1 + $0x4] ss:$0 sm:$0xff] }
 0x186   :  { %v480_v27 = vpop.permute.xlu2 %479 }
 0x18d   :  { %v452_v28 = vpop.permute.xlu0 %451 }
 0x18e   :  { %v275_v30 = vpop.permute.xlu2 %274  ;;  %3956 = vmatpush.xpose.msk.msra.mxu3 %vm312_vm1, %v452_v28 }
 0x18f   :  { %v4527_v32 = vadd.f32 %v275_v30, %v244_v18  ;;  %v4529_v33 = vadd.f32 %v275_v30, %v226_v3  ;;  %v4531_v34 = vadd.f32 %v275_v30, %v232_v7  ;;  %v4533_v36 = vadd.f32 %v275_v30, %v229_v5  ;;  %v4616_v18 = vld [vmem:[%s7053_s1 + $0x3] ss:$0 sm:$0xff] }
 0x190   :  { %v424_v35 = vpop.permute.xlu1 %423  ;;  %v4535_v37 = vadd.f32 %v275_v30, %v241_v6  ;;  %v4537_v38 = vadd.f32 %v275_v30, %v235_v15  ;;  %v4539_v39 = vadd.f32 %v275_v30, %v238_v10  ;;  %v4560_v47 = vadd.f32 %v275_v30, %v247_v21  ;;  %v4604_v10 = vld [vmem:[%s7053_s1 + $0x1] ss:$0 sm:$0xff] }
 0x191   :  { %785 = vrot.lane.b32.xlu0 %v4527_v32, %s4312_s23  ;;  %3954 = vmatpush.xpose.msk.msrb.mxu2 %vm312_vm1, %v424_v35  ;;  %v4163_v42 = vpack.i.bf16 %v4529_v33, %v4531_v34  ;;  %v4178_v44 = vpack.i.bf16 %v4533_v36, %v4529_v33  ;;  %v4631_v35 = vld [vmem:[%s7053_s1 + $0x6] ss:$0 sm:$0xff] }
 0x192   :  { %3957 = vmatmul.msk.f32.vlgmr.msra.gmra.mxu3 %vm312_vm1, %v4525_v31  ;;  %v4168_v49 = vpack.i.bf16 %v4533_v36, %v4535_v37 }
 0x193   :  { %4164 = vrot.lane.b32.xlu2 %v4163_v42, %s4312_s23 }
 0x194   :  { %3955 = vmatmul.msk.f32.vlgmr.msrb.gmra.mxu2 %vm312_vm1, %v4547_v43 }
 0x198   :  { %v396_v48 = vpop.permute.xlu0 %395 }
 0x199   :  { %812 = vrot.lane.b32.xlu0 %v4560_v47, %s4312_s23  ;;  %3952 = vmatpush.xpose.msk.msra.mxu1 %vm312_vm1, %v396_v48  ;;  %v4173_v48 = vpack.i.bf16 %v4539_v39, %v4537_v38 }
 0x19b   :  { %4169 = vrot.lane.b32.xlu2 %v4168_v49, %s4312_s23 }
 0x19c   :  { %3953 = vmatmul.msk.f32.vlgmr.msra.gmra.mxu1 %vm312_vm1, %v4568_v50 }
 0x19d   :  { %3958 = vmatpush.xpose.msk.msrb.mxu1 %vm312_vm1, %v480_v27 }
 0x1a1   :  { %896 = vrot.lane.b32.xlu0 %v4480_v9, %s4310_s21 }
 0x1a4   :  { %3959 = vmatmul.msk.f32.vlgmr.msrb.gmra.mxu1 %vm312_vm1, %v4577_v51 }
 0x1a7   :  { %v508_v55 = vpop.permute.xlu0 %507 }
 0x1a8   :  { %3960 = vmatpush.xpose.msk.msra.mxu2 %vm312_vm1, %v508_v55 }
 0x1ab   :  { %3961 = vmatmul.msk.f32.vlgmr.msra.gmra.mxu2 %vm312_vm1, %v4583_v56 }
 0x1ed   :  { %v4165_v57 = vpop.permute.xlu2 %4164 }
 0x1ee   :  { %v4167_v58 = vunpack.i.h.bf16 %v4165_v57  ;;  %v4166_v60 = vunpack.i.l.bf16 %v4165_v57 }
 0x1f0   :  { %644 = vmatpush.msrb.mxu3 %v4167_v58  ;;  %698 = vmatpush.msrb.mxu2 %v4166_v60  ;;  %v4645_v58 = vld [vmem:[%s7053_s1 + $0x7] ss:$0 sm:$0xff]  ;;  %s4313_s1 = smov 88  }
 0x1f5   :  { %v4170_v61 = vpop.permute.xlu2 %4169 }
 0x1f6   :  { %v4172_v62 = vunpack.i.h.bf16 %v4170_v61  ;;  %v4171_v63 = vunpack.i.l.bf16 %v4170_v61 }
 0x1f8   :  { %671 = vmatpush.msra.mxu1 %v4172_v62  ;;  %779 = vmatpush.msra.mxu2 %v4171_v63  ;;  %v4656_v63 = vpop.permute.xlu1 %838 }
 0x1fd   :  { %v391_v3 = vpop.f32.mrf.mxu3 }
 0x1fe   :  { %v392_v4 = vadd.f32 %v4590_v0, %v391_v3 }
 0x1ff   :  { %v335_v5 = vpop.f32.mrf.mxu1 }
 0x200   :  { %v336_v6 = vadd.f32 %v4595_v2, %v335_v5  ;;  %v540_v7 = vsel %vm312_vm1, %v392_v4, -inf  ;;  %v4658_v3 = vpop.permute.xlu1 %868  ;;  %v4660_v5 = vpop.permute.xlu0 %840 }
 0x201   :  { %541 = vmax.xlane.f32.xlu1 %v540_v7 }
 0x202   :  { %v534_v9 = vsel %vm312_vm1, %v336_v6, -inf }
 0x203   :  { %535 = vmax.xlane.f32.xlu2 %v534_v9 }
 0x205   :  { %v363_v12 = vpop.f32.mrf.mxu2 }
 0x206   :  { %v364_v14 = vadd.f32 %v4604_v10, %v363_v12 }
 0x208   :  { %v537_v15 = vsel %vm312_vm1, %v364_v14, -inf  ;;  %v4662_v7 = vpop.permute.xlu1 %866  ;;  %v4664_v9 = vpop.permute.xlu0 %785 }
 0x20b   :  { %538 = vmax.xlane.f32.xlu2 %v537_v15 }
 0x215   :  { %v475_v27 = vpop.f32.mrf.mxu3 }
 0x216   :  { %v476_v30 = vadd.f32 %v4622_v24, %v475_v27  ;;  %v4666_v27 = vpop.permute.xlu0 %812 }
 0x217   :  { %v447_v20 = vpop.f32.mrf.mxu2 }
 0x218   :  { %v448_v21 = vadd.f32 %v4611_v17, %v447_v20  ;;  %v549_v55 = vsel %vm312_vm1, %v476_v30, -inf }
 0x219   :  { %v419_v23 = vpop.f32.mrf.mxu1 }
 0x21a   :  { %v420_v25 = vadd.f32 %v4616_v18, %v419_v23  ;;  %v546_v26 = vsel %vm312_vm1, %v448_v21, -inf }
 0x21b   :  { %547 = vmax.xlane.f32.xlu0 %v546_v26 }
 0x21c   :  { %v543_v28 = vsel %vm312_vm1, %v420_v25, -inf }
 0x21d   :  { %544 = vmax.xlane.f32.xlu1 %v543_v28 }
 0x221   :  { %v503_v42 = vpop.f32.mrf.mxu1 }
 0x222   :  { %v4636_v49 = vadd.f32 %v4631_v35, %v503_v42 }
 0x223   :  { %4174 = vrot.lane.b32.xlu2 %v4173_v48, %s4312_s23  ;;  %550 = vmax.xlane.f32.xlu0 %v549_v55 }
 0x224   :  { %v552_v57 = vsel %vm312_vm1, %v4636_v49, -inf }
 0x225   :  { %553 = vmax.xlane.f32.xlu1 %v552_v57 }
 0x22e   :  { %v531_v60 = vpop.f32.mrf.mxu2 }
 0x22f   :  { %v4648_v61 = vadd.f32 %v4645_v58, %v531_v60 }
 0x231   :  { %v555_v62 = vsel %vm312_vm1, %v4648_v61, -inf }
 0x232   :  { %556 = vmax.xlane.f32.xlu0 %v555_v62 }
 0x23e   :  { %924 = vrot.lane.b32.xlu1 %v4494_v16, %s4310_s21 }
 0x246   :  { %894 = vrot.lane.b32.xlu0 %v4515_v13, %s4309_s20 }
 0x274   :  { %v542_v12 = vpop.xlane.xlu1 %541 }
 0x275   :  { %v560_v15 = vsub.f32 %v392_v4, %v542_v12 }
 0x276   :  { %v536_v20 = vpop.xlane.xlu2 %535 }
 0x277   :  { %v570_v23 = vmul.f32 1.442695, %v560_v15  ;;  %v558_v26 = vsub.f32 %v336_v6, %v536_v20  ;;  %v4676_v6 = vpop.permute.xlu0 %896 }
 0x279   :  { %4204 = vpow2.f32 %v570_v23  ;;  %v566_v16 = vmul.f32 1.442695, %v558_v26 }
 0x27b   :  { %4206 = vpow2.f32 %v566_v16 }
 0x27e   :  { %v539_v13 = vpop.xlane.xlu2 %538 }
 0x27f   :  { %v4668_v28 = vpop.eup %4204  ;;  %v559_v42 = vsub.f32 %v364_v14, %v539_v13 }
 0x280   :  { %v588_v48 = vsel %vm312_vm1, %v4668_v28, 0.0 }
 0x281   :  { %v4672_v55 = vpop.eup %4206  ;;  %v568_v57 = vmul.f32 1.442695, %v559_v42  ;;  %589 = vadd.xlane.f32.xlu1 %v588_v48 }
 0x282   :  { %v582_v4 = vsel %vm312_vm1, %v4672_v55, 0.0 }
 0x283   :  { %4208 = vpow2.f32 %v568_v57  ;;  %583 = vadd.xlane.f32.xlu0 %v582_v4 }
 0x286   :  { %v4175_v60 = vpop.permute.xlu2 %4174 }
 0x287   :  { %v4177_v62 = vunpack.i.h.bf16 %v4175_v60  ;;  %v4176_v12 = vunpack.i.l.bf16 %v4175_v60 }
 0x289   :  { %v4678_v15 = vpop.eup %4208  ;;  %725 = vmatpush.msra.mxu3 %v4176_v12  ;;  %752 = vmatpush.msrb.mxu1 %v4177_v62 }
 0x28a   :  { %v585_v14 = vsel %vm312_vm1, %v4678_v15, 0.0 }
 0x28b   :  { %586 = vadd.xlane.f32.xlu0 %v585_v14 }
 0x28e   :  { %v548_v20 = vpop.xlane.xlu0 %547 }
 0x28f   :  { %v562_v23 = vsub.f32 %v448_v21, %v548_v20 }
 0x290   :  { %v545_v26 = vpop.xlane.xlu1 %544 }
 0x291   :  { %v574_v16 = vmul.f32 1.442695, %v562_v23  ;;  %v561_v13 = vsub.f32 %v420_v25, %v545_v26 }
 0x293   :  { %4210 = vpow2.f32 %v574_v16  ;;  %v572_v42 = vmul.f32 1.442695, %v561_v13 }
 0x295   :  { %4212 = vpow2.f32 %v572_v42 }
 0x296   :  { %v551_v48 = vpop.xlane.xlu0 %550 }
 0x297   :  { %v563_v57 = vsub.f32 %v476_v30, %v551_v48 }
 0x298   :  { %v554_v4 = vpop.xlane.xlu1 %553 }
 0x299   :  { %v4211_v60 = vpop.eup %4210  ;;  %v576_v46 = vmul.f32 1.442695, %v563_v57  ;;  %v564_v45 = vsub.f32 %v4636_v49, %v554_v4 }
 0x29a   :  { %v594_v12 = vsel %vm312_vm1, %v4211_v60, 0.0 }
 0x29b   :  { %v4213_v62 = vpop.eup %4212  ;;  %4214 = vpow2.f32 %v576_v46  ;;  %595 = vadd.xlane.f32.xlu0 %v594_v12  ;;  %v578_v14 = vmul.f32 1.442695, %v564_v45 }
 0x29c   :  { %v591_v21 = vsel %vm312_vm1, %v4213_v62, 0.0 }
 0x29d   :  { %592 = vadd.xlane.f32.xlu1 %v591_v21  ;;  %4216 = vpow2.f32 %v578_v14 }
 0x2a1   :  { %v4215_v25 = vpop.eup %4214 }
 0x2a2   :  { %v597_v20 = vsel %vm312_vm1, %v4215_v25, 0.0 }
 0x2a3   :  { %v4217_v16 = vpop.eup %4216 }
 0x2a4   :  { %v600_v46 = vsel %vm312_vm1, %v4217_v16, 0.0 }
 0x2a5   :  { %598 = vadd.xlane.f32.xlu1 %v597_v20  ;;  %v557_v30 = vpop.xlane.xlu0 %556 }
 0x2a6   :  { %v565_v23 = vsub.f32 %v4648_v61, %v557_v30 }
 0x2a8   :  { %v580_v26 = vmul.f32 1.442695, %v565_v23 }
 0x2aa   :  { %4218 = vpow2.f32 %v580_v26 }
 0x2ad   :  { %601 = vadd.xlane.f32.xlu1 %v600_v46 }
 0x2af   :  { %950 = vrot.lane.b32.xlu0 %v4547_v43, %s4309_s20 }
 0x2b0   :  { %v4219_v49 = vpop.eup %4218  ;;  %v925_v43 = vpop.permute.xlu1 %924 }
 0x2b1   :  { %v603_v45 = vsel %vm312_vm1, %v4219_v49, 0.0 }
 0x2b2   :  { %604 = vadd.xlane.f32.xlu2 %v603_v45 }
 0x2b7   :  { %1006 = vrot.lane.b32.xlu0 %v4577_v51, %s4309_s20 }
 0x2bf   :  { %978 = vrot.lane.b32.xlu0 %v4525_v31, %s4309_s20  ;;  %v895_v31 = vpop.permute.xlu0 %894 }
 0x2c6   :  { %952 = vrot.lane.b32.xlu1 %v4486_v11, %s4310_s21 }
 0x2ca   :  { %922 = vrot.lane.b32.xlu2 %v4568_v50, %s4309_s20 }
 0x2ce   :  { %1008 = vrot.lane.b32.xlu1 %v4500_v19, %s4310_s21 }
 0x2d2   :  { %1036 = vrot.lane.b32.xlu2 %v4506_v22, %s4310_s21 }
 0x2d6   :  { %980 = vrot.lane.b32.xlu1 %v4478_v8, %s4310_s21 }
 0x2de   :  { %1034 = vrot.lane.b32.xlu1 %v4583_v56, %s4309_s20  ;;  %s4314_s20 = smov 8  }
 0x2f4   :  { %v590_v51 = vpop.xlane.xlu1 %589 }
 0x2f5   :  { %4220 = vrcp.f32 %v590_v51 }
 0x2f6   :  { %v584_v11 = vpop.xlane.xlu0 %583 }
 0x2f7   :  { %4222 = vrcp.f32 %v584_v11 }
 0x2fb   :  { %v4221_v61 = vpop.eup %4220 }
 0x2fc   :  { %v616_v50 = vmul.f32 %v4221_v61, %v4668_v28 }
 0x2fd   :  { %v4223_v13 = vpop.eup %4222 }
 0x2fe   :  { %v614_v19 = vmul.f32 %v4223_v13, %v4672_v55  ;;  %3964 = vmatmul.msk.f32.vlgmr.msrb.gmra.mxu2 %vm312_vm1, %v616_v50  ;;  %v587_v22 = vpop.xlane.xlu0 %586 }
 0x2ff   :  { %3970 = vmatpush.xpose.msk.msrb.mxu2 %vm312_vm1, %v4660_v5  ;;  %4224 = vrcp.f32 %v587_v22 }
 0x300   :  { %3962 = vmatmul.msk.f32.vlgmr.msrb.gmra.mxu3 %vm312_vm1, %v614_v19 }
 0x301   :  { %806 = vmatpush.msrb.mxu3 %v4664_v9 }
 0x305   :  { %v4225_v8 = vpop.eup %4224 }
 0x306   :  { %v615_v56 = vmul.f32 %v4225_v8, %v4678_v15 }
 0x308   :  { %3963 = vmatmul.msk.f32.vlgmr.msra.gmra.mxu1 %vm312_vm1, %v615_v56 }
 0x309   :  { %833 = vmatpush.msra.mxu1 %v4666_v27 }
 0x30e   :  { %v596_v28 = vpop.xlane.xlu0 %595 }
 0x30f   :  { %4226 = vrcp.f32 %v596_v28 }
 0x310   :  { %v593_v55 = vpop.xlane.xlu1 %592 }
 0x311   :  { %4228 = vrcp.f32 %v593_v55 }
 0x315   :  { %v4227_v42 = vpop.eup %4226 }
 0x316   :  { %v618_v48 = vmul.f32 %v4227_v42, %v4211_v60 }
 0x317   :  { %v4229_v57 = vpop.eup %4228 }
 0x318   :  { %v617_v5 = vmul.f32 %v4229_v57, %v4213_v62  ;;  %v599_v4 = vpop.xlane.xlu1 %598  ;;  %3966 = vmatmul.msk.f32.vlgmr.msrb.gmra.mxu1 %vm312_vm1, %v618_v48 }
 0x319   :  { %4230 = vrcp.f32 %v599_v4  ;;  %3974 = vmatpush.xpose.msk.msrb.mxu1 %vm312_vm1, %v4676_v6 }
 0x31a   :  { %3965 = vmatmul.msk.f32.vlgmr.msra.gmra.mxu3 %vm312_vm1, %v617_v5 }
 0x31b   :  { %3972 = vmatpush.xpose.msk.msra.mxu3 %vm312_vm1, %v4658_v3 }
 0x31f   :  { %v4231_v9 = vpop.eup %4230 }
 0x320   :  { %v619_v27 = vmul.f32 %v4231_v9, %v4215_v25  ;;  %v602_v15 = vpop.xlane.xlu1 %601 }
 0x321   :  { %4232 = vrcp.f32 %v602_v15  ;;  %v951_v14 = vpop.permute.xlu0 %950 }
 0x322   :  { %3967 = vmatmul.msk.f32.vlgmr.msra.gmra.mxu2 %vm312_vm1, %v619_v27 }
 0x323   :  { %3976 = vmatpush.xpose.msk.msra.mxu2 %vm312_vm1, %v925_v43 }
 0x325   :  { %v605_v60 = vpop.xlane.xlu2 %604 }
 0x326   :  { %4234 = vrcp.f32 %v605_v60 }
 0x327   :  { %v4233_v12 = vpop.eup %4232 }
 0x328   :  { %v620_v62 = vmul.f32 %v4233_v12, %v4217_v16 }
 0x329   :  { %v1007_v30 = vpop.permute.xlu0 %1006 }
 0x32a   :  { %3968 = vmatmul.msk.f32.vlgmr.msrb.gmra.mxu3 %vm312_vm1, %v620_v62  ;;  %3971 = vmatmul.msk.f32.vlgmr.msrb.gmra.mxu2 %vm312_vm1, %v4656_v63 }
 0x32c   :  { %v4235_v6 = vpop.eup %4234 }
 0x32d   :  { %v621_v21 = vmul.f32 %v4235_v6, %v4219_v49  ;;  %v923_v3 = vpop.permute.xlu2 %922 }
 0x32f   :  { %3969 = vmatmul.msk.f32.vlgmr.msra.gmra.mxu1 %vm312_vm1, %v621_v21 }
 0x331   :  { %v979_v23 = vpop.permute.xlu0 %978 }
 0x332   :  { %3973 = vmatmul.msk.f32.vlgmr.msra.gmra.mxu3 %vm312_vm1, %v4662_v7  ;;  %3977 = vmatmul.msk.f32.vlgmr.msra.gmra.mxu2 %vm312_vm1, %v923_v3 }
 0x335   :  { %v1037_v20 = vpop.permute.xlu2 %1036 }
 0x337   :  { %3975 = vmatmul.msk.f32.vlgmr.msrb.gmra.mxu1 %vm312_vm1, %v895_v31 }
 0x338   :  { %v953_v25 = vpop.permute.xlu1 %952 }
 0x339   :  { %3978 = vmatpush.xpose.msk.msrb.mxu3 %vm312_vm1, %v953_v25 }
 0x33c   :  { %3979 = vmatmul.msk.f32.vlgmr.msrb.gmra.mxu3 %vm312_vm1, %v951_v14 }
 0x33d   :  { %3984 = vmatpush.xpose.msk.msra.mxu3 %vm312_vm1, %v1037_v20 }
 0x340   :  { %v1009_v63 = vpop.permute.xlu1 %1008 }
 0x341   :  { %3982 = vmatpush.xpose.msk.msrb.mxu2 %vm312_vm1, %v1009_v63 }
 0x344   :  { %3983 = vmatmul.msk.f32.vlgmr.msrb.gmra.mxu2 %vm312_vm1, %v1007_v30 }
 0x348   :  { %v981_v7 = vpop.permute.xlu1 %980 }
 0x349   :  { %3980 = vmatpush.xpose.msk.msra.mxu1 %vm312_vm1, %v981_v7 }
 0x34c   :  { %3981 = vmatmul.msk.f32.vlgmr.msra.gmra.mxu1 %vm312_vm1, %v979_v23 }
 0x350   :  { %v1035_v26 = vpop.permute.xlu1 %1034 }
 0x351   :  { %3985 = vmatmul.msk.f32.vlgmr.msra.gmra.mxu3 %vm312_vm1, %v1035_v26 }
 0x381   :  { %v4743_v46 = vpop.f32.mrf.mxu2 }
 0x383   :  { %v4745_v49 = vpop.f32.mrf.mxu3 }
 0x385   :  { %v4741_v16 = vpop.f32.mrf.mxu1 }
 0x395   :  { %v4747_v45 = vpop.f32.mrf.mxu1 }
 0x39d   :  { %v4749_v43 = vpop.f32.mrf.mxu3 }
 0x3a5   :  { %v4751_v31 = vpop.f32.mrf.mxu2 }
 0x3ac   :  { %v4753_v51 = vpop.f32.mrf.mxu1 }
 0x3ad   :  { %v4755_v11 = vpop.f32.mrf.mxu3  ;;  %v863_v61 = vpop.f32.mrf.mxu2 }
 0x3ae   :  { %v864_v50 = vadd.f32 %v4595_v2, %v863_v61 }
 0x3b0   :  { %v1062_v13 = vsel %vm312_vm1, %v864_v50, -inf }
 0x3b1   :  { %1063 = vmax.xlane.f32.xlu0 %v1062_v13 }
 0x3b4   :  { %v919_v19 = vpop.f32.mrf.mxu1 }
 0x3b5   :  { %v920_v22 = vadd.f32 %v4590_v0, %v919_v19  ;;  %v891_v8 = vpop.f32.mrf.mxu3  ;;  %v947_v56 = vpop.f32.mrf.mxu2 }
 0x3b6   :  { %v892_v28 = vadd.f32 %v4604_v10, %v891_v8  ;;  %v948_v55 = vadd.f32 %v4616_v18, %v947_v56 }
 0x3b7   :  { %v1068_v42 = vsel %vm312_vm1, %v920_v22, -inf }
 0x3b8   :  { %1069 = vmax.xlane.f32.xlu1 %v1068_v42  ;;  %v1071_v48 = vsel %vm312_vm1, %v948_v55, -inf  ;;  %v1065_v57 = vsel %vm312_vm1, %v892_v28, -inf }
 0x3b9   :  { %1072 = vmax.xlane.f32.xlu0 %v1071_v48  ;;  %1066 = vmax.xlane.f32.xlu2 %v1065_v57 }
 0x3bf   :  { %v975_v2 = vpop.f32.mrf.mxu3 }
 0x3c0   :  { %v976_v5 = vadd.f32 %v4611_v17, %v975_v2 }
 0x3c2   :  { %v1074_v0 = vsel %vm312_vm1, %v976_v5, -inf }
 0x3c3   :  { %1075 = vmax.xlane.f32.xlu2 %v1074_v0 }
 0x3c7   :  { %v1031_v4 = vpop.f32.mrf.mxu2 }
 0x3c8   :  { %v1032_v10 = vadd.f32 %v4631_v35, %v1031_v4 }
 0x3c9   :  { %v1003_v9 = vpop.f32.mrf.mxu1 }
 0x3ca   :  { %v1004_v18 = vadd.f32 %v4622_v24, %v1003_v9  ;;  %v1080_v27 = vsel %vm312_vm1, %v1032_v10, -inf  ;;  %v7083_v24 = vpack.i.bf16 %v4537_v38, %v4531_v34 }
 0x3cb   :  { %1081 = vmax.xlane.f32.xlu0 %v1080_v27 }
 0x3cc   :  { %v1077_v15 = vsel %vm312_vm1, %v1004_v18, -inf }
 0x3cd   :  { %1078 = vmax.xlane.f32.xlu1 %v1077_v15  ;;  %v7084_v15 = vpack.i.bf16 %v4535_v37, %v4539_v39 }
 0x3d4   :  { %v1059_v60 = vpop.f32.mrf.mxu3 }
 0x3d5   :  { %v4772_v12 = vadd.f32 %v4645_v58, %v1059_v60 }
 0x3d7   :  { %v1083_v17 = vsel %vm312_vm1, %v4772_v12, -inf }
 0x3d8   :  { %1084 = vmax.xlane.f32.xlu1 %v1083_v17 }
 0x3df   :  { %4179 = vrot.lane.b32.xlu0 %v4178_v44, %s4313_s1 }
 0x3f1   :  { %4184 = vrot.lane.b32.xlu1 %v7083_v24, %s4313_s1 }
 0x424   :  { %v1064_v35 = vpop.xlane.xlu0 %1063 }
 0x425   :  { %v1086_v62 = vsub.f32 %v864_v50, %v1064_v35 }
 0x427   :  { %v1094_v6 = vmul.f32 1.442695, %v1086_v62 }
 0x429   :  { %4236 = vpow2.f32 %v1094_v6 }
 0x42b   :  { %v1070_v58 = vpop.xlane.xlu1 %1069 }
 0x42c   :  { %v1088_v21 = vsub.f32 %v920_v22, %v1070_v58  ;;  %v1067_v3 = vpop.xlane.xlu2 %1066  ;;  %v1073_v14 = vpop.xlane.xlu0 %1072 }
 0x42d   :  { %v1087_v25 = vsub.f32 %v892_v28, %v1067_v3  ;;  %v1089_v33 = vsub.f32 %v948_v55, %v1073_v14 }
 0x42e   :  { %v1098_v20 = vmul.f32 1.442695, %v1088_v21 }
 0x42f   :  { %v4784_v63 = vpop.eup %4236  ;;  %v1096_v30 = vmul.f32 1.442695, %v1087_v25  ;;  %v1100_v34 = vmul.f32 1.442695, %v1089_v33 }
 0x430   :  { %4238 = vpow2.f32 %v1098_v20  ;;  %v1110_v36 = vsel %vm312_vm1, %v4784_v63, 0.0 }
 0x431   :  { %4240 = vpow2.f32 %v1096_v30  ;;  %1111 = vadd.xlane.f32.xlu2 %v1110_v36 }
 0x432   :  { %4242 = vpow2.f32 %v1100_v34 }
 0x436   :  { %v4239_v38 = vpop.eup %4238  ;;  %v1076_v44 = vpop.xlane.xlu2 %1075 }
 0x437   :  { %v4241_v7 = vpop.eup %4240  ;;  %v1090_v23 = vsub.f32 %v976_v5, %v1076_v44  ;;  %v1116_v26 = vsel %vm312_vm1, %v4239_v38, 0.0 }
 0x438   :  { %1117 = vadd.xlane.f32.xlu1 %v1116_v26  ;;  %v1113_v61 = vsel %vm312_vm1, %v4241_v7, 0.0  ;;  %v4243_v13 = vpop.eup %4242 }
 0x439   :  { %1114 = vadd.xlane.f32.xlu2 %v1113_v61  ;;  %v1102_v50 = vmul.f32 1.442695, %v1090_v23  ;;  %v1119_v56 = vsel %vm312_vm1, %v4243_v13, 0.0 }
 0x43b   :  { %4244 = vpow2.f32 %v1102_v50 }
 0x43e   :  { %v1082_v19 = vpop.xlane.xlu0 %1081 }
 0x43f   :  { %v1092_v22 = vsub.f32 %v1032_v10, %v1082_v19 }
 0x440   :  { %v1079_v8 = vpop.xlane.xlu1 %1078 }
 0x441   :  { %v1106_v28 = vmul.f32 1.442695, %v1092_v22  ;;  %v1091_v55 = vsub.f32 %v1004_v18, %v1079_v8  ;;  %1120 = vadd.xlane.f32.xlu2 %v1119_v56  ;;  %v4245_v48 = vpop.eup %4244 }
 0x442   :  { %v1122_v57 = vsel %vm312_vm1, %v4245_v48, 0.0 }
 0x443   :  { %4246 = vpow2.f32 %v1106_v28  ;;  %v1104_v42 = vmul.f32 1.442695, %v1091_v55 }
 0x445   :  { %4248 = vpow2.f32 %v1104_v42 }
 0x449   :  { %v4792_v2 = vpop.eup %4246  ;;  %1123 = vadd.xlane.f32.xlu2 %v1122_v57 }
 0x44a   :  { %v1128_v5 = vsel %vm312_vm1, %v4792_v2, 0.0 }
 0x44b   :  { %v4249_v0 = vpop.eup %4248  ;;  %1129 = vadd.xlane.f32.xlu1 %v1128_v5  ;;  %v1085_v27 = vpop.xlane.xlu1 %1084 }
 0x44c   :  { %v1125_v4 = vsel %vm312_vm1, %v4249_v0, 0.0  ;;  %v1093_v35 = vsub.f32 %v4772_v12, %v1085_v27 }
 0x44d   :  { %1126 = vadd.xlane.f32.xlu0 %v1125_v4 }
 0x44e   :  { %v1108_v62 = vmul.f32 1.442695, %v1093_v35 }
 0x450   :  { %4250 = vpow2.f32 %v1108_v62 }
 0x451   :  { %v4180_v10 = vpop.permute.xlu0 %4179 }
 0x452   :  { %v4182_v9 = vunpack.i.h.bf16 %v4180_v10  ;;  %v4181_v18 = vunpack.i.l.bf16 %v4180_v10  ;;  %v1399_v10 = vld [vmem:[%s7054_s6 + $0x8] sm:$0xff] }
 0x454   :  { %1171 = vmatpush.msra.mxu2 %v4181_v18  ;;  %1197 = vmatpush.msrb.mxu1 %v4182_v9  ;;  %v1398_v9 = vld [vmem:[%s7054_s6] sm:$0xff] }
 0x456   :  { %v4251_v6 = vpop.eup %4250 }
 0x461   :  { %1306 = vrot.lane.b32.xlu0 %v4527_v32, %s4313_s1  ;;  %4189 = vrot.lane.b32.xlu2 %v7084_v15, %s4313_s1  ;;  %v1131_v32 = vsel %vm312_vm1, %v4251_v6, 0.0 }
 0x463   :  { %v4185_v60 = vpop.permute.xlu1 %4184 }
 0x464   :  { %v4187_v17 = vunpack.i.h.bf16 %v4185_v60  ;;  %v4186_v24 = vunpack.i.l.bf16 %v4185_v60  ;;  %1332 = vrot.lane.b32.xlu1 %v4560_v47, %s4313_s1 }
 0x466   :  { %1223 = vmatpush.msrb.mxu2 %v4186_v24  ;;  %1249 = vmatpush.msrb.mxu3 %v4187_v17 }
 0x48a   :  { %1132 = vadd.xlane.f32.xlu2 %v1131_v32 }
 0x4a4   :  { %v1112_v58 = vpop.xlane.xlu2 %1111 }
 0x4a5   :  { %4252 = vrcp.f32 %v1112_v58 }
 0x4ab   :  { %v4253_v37 = vpop.eup %4252  ;;  %v1118_v39 = vpop.xlane.xlu1 %1117 }
 0x4ac   :  { %v1142_v21 = vmul.f32 %v4253_v37, %v4784_v63  ;;  %4254 = vrcp.f32 %v1118_v39  ;;  %v1115_v3 = vpop.xlane.xlu2 %1114 }
 0x4ad   :  { %4256 = vrcp.f32 %v1115_v3 }
 0x4ae   :  { %3986 = vmatmul.msk.f32.vlgmr.msra.gmra.mxu2 %vm312_vm1, %v1142_v21 }
 0x4b2   :  { %v4255_v47 = vpop.eup %4254 }
 0x4b3   :  { %v4257_v14 = vpop.eup %4256  ;;  %v1144_v12 = vmul.f32 %v4255_v47, %v4239_v38 }
 0x4b4   :  { %v1143_v25 = vmul.f32 %v4257_v14, %v4241_v7  ;;  %v1121_v20 = vpop.xlane.xlu2 %1120 }
 0x4b5   :  { %4258 = vrcp.f32 %v1121_v20 }
 0x4b6   :  { %3987 = vmatmul.msk.f32.vlgmr.msrb.gmra.mxu1 %vm312_vm1, %v1143_v25  ;;  %3988 = vmatmul.msk.f32.vlgmr.msrb.gmra.mxu2 %vm312_vm1, %v1144_v12 }
 0x4bb   :  { %v4259_v30 = vpop.eup %4258 }
 0x4bc   :  { %v1145_v33 = vmul.f32 %v4259_v30, %v4243_v13  ;;  %v1124_v36 = vpop.xlane.xlu2 %1123 }
 0x4bd   :  { %4260 = vrcp.f32 %v1124_v36 }
 0x4be   :  { %3989 = vmatmul.msk.f32.vlgmr.msrb.gmra.mxu3 %vm312_vm1, %v1145_v33  ;;  %v1130_v61 = vpop.xlane.xlu1 %1129 }
 0x4c0   :  { %v1127_v63 = vpop.xlane.xlu0 %1126 }
 0x4c1   :  { %4262 = vrcp.f32 %v1127_v63 }
 0x4c2   :  { %4264 = vrcp.f32 %v1130_v61 }
 0x4c3   :  { %v4261_v34 = vpop.eup %4260 }
 0x4c4   :  { %v4190_v44 = vpop.permute.xlu2 %4189  ;;  %v1146_v38 = vmul.f32 %v4261_v34, %v4245_v48 }
 0x4c5   :  { %v4192_v23 = vunpack.i.h.bf16 %v4190_v44  ;;  %v4191_v26 = vunpack.i.l.bf16 %v4190_v44 }
 0x4c7   :  { %v4263_v7 = vpop.eup %4262  ;;  %1275 = vmatpush.msrb.mxu0 %v4191_v26  ;;  %1301 = vmatpush.msra.mxu1 %v4192_v23 }
 0x4c8   :  { %v1147_v50 = vmul.f32 %v4263_v7, %v4249_v0  ;;  %3990 = vmatmul.msk.f32.vlgmr.msrb.gmra.mxu0 %vm312_vm1, %v1146_v38  ;;  %v4265_v13 = vpop.eup %4264 }
 0x4c9   :  { %v1148_v19 = vmul.f32 %v4265_v13, %v4792_v2  ;;  %1439 = vmatpush.msra.mxu0 %v1399_v10 }
 0x4ca   :  { %3991 = vmatmul.msk.f32.vlgmr.msra.gmra.mxu1 %vm312_vm1, %v1147_v50 }
 0x4cb   :  { %1440 = vmatpush.msra.mxu0 %v1398_v9 }
 0x4d3   :  { %v1307_v22 = vpop.permute.xlu0 %1306 }
 0x4d4   :  { %1327 = vmatpush.msra.mxu2 %v1307_v22 }
 0x4d5   :  { %3992 = vmatmul.msk.f32.vlgmr.msra.gmra.mxu2 %vm312_vm1, %v1148_v19 }
 0x4d6   :  { %v1333_v8 = vpop.permute.xlu1 %1332 }
 0x4d7   :  { %1353 = vmatpush.msra.mxu3 %v1333_v8  ;;  %v4315_v8 = vmov 16.0  }
 0x4fd   :  { %v1133_v56 = vpop.xlane.xlu2 %1132 }
 0x4fe   :  { %4266 = vrcp.f32 %v1133_v56 }
 0x4ff   :  { %4268 = vrcp.f32 %v4315_v8 }
 0x504   :  { %v4267_v28 = vpop.eup %4266 }
 0x505   :  { %v1149_v55 = vmul.f32 %v4267_v28, %v4251_v6 }
 0x507   :  { %3993 = vmatmul.msk.f32.vlgmr.msra.gmra.mxu3 %vm312_vm1, %v1149_v55 }
 0x531   :  { %v1173_v42 = vpop.f32.mrf.mxu2 }
 0x532   :  { %1366 = vrot.lane.b32.xlu0 %v1173_v42, %s4314_s20 }
 0x533   :  { %v1199_v48 = vpop.f32.mrf.mxu1 }
 0x539   :  { %v1225_v57 = vpop.f32.mrf.mxu2 }
 0x53a   :  { %1368 = vrot.lane.b32.xlu0 %v1199_v48, %s4314_s20  ;;  %1370 = vrot.lane.b32.xlu2 %v1225_v57, %s4314_s20 }
 0x541   :  { %v1251_v2 = vpop.f32.mrf.mxu3 }
 0x542   :  { %1372 = vrot.lane.b32.xlu0 %v1251_v2, %s4314_s20 }
 0x545   :  { %v1277_v5 = vpop.f32.mrf.mxu0 }
 0x546   :  { %1374 = vrot.lane.b32.xlu1 %v1277_v5, %s4314_s20 }
 0x547   :  { %v1303_v0 = vpop.f32.mrf.mxu1 }
 0x54a   :  { %1376 = vrot.lane.b32.xlu0 %v1303_v0, %s4314_s20 }
 0x558   :  { %v1329_v4 = vpop.f32.mrf.mxu2 }
 0x559   :  { %1378 = vrot.lane.b32.xlu1 %v1329_v4, %s4314_s20 }
 0x58a   :  { %v1355_v18 = vpop.f32.mrf.mxu3 }
 0x58b   :  { %1380 = vrot.lane.b32.xlu0 %v1355_v18, %s4314_s20 }
 0x594   :  { %v1371_v24 = vpop.permute.xlu2 %1370 }
 0x595   :  { %v1392_v35 = vsel %vm312_vm1, %v4743_v46, %v1371_v24 }
 0x5a4   :  { %v1367_v27 = vpop.permute.xlu0 %1366 }
 0x5a5   :  { %v1390_v15 = vsel %vm312_vm1, %v4745_v49, %v1367_v27 }
 0x5a6   :  { %3994 = vmatmul.msk.f32.vlgmr.msra.gmra.mxu0 %vm184_vm0, %v1390_v15 }
 0x5ac   :  { %v1369_v60 = vpop.permute.xlu0 %1368 }
 0x5ad   :  { %v1391_v17 = vsel %vm312_vm1, %v4741_v16, %v1369_v60 }
 0x5ae   :  { %3995 = vmatmul.msk.f32.gmra.mxu0 %vm184_vm0, %v1391_v17 }
 0x5b4   :  { %v1373_v62 = vpop.permute.xlu0 %1372 }
 0x5b5   :  { %v1393_v6 = vsel %vm312_vm1, %v4749_v43, %v1373_v62 }
 0x5b6   :  { %3996 = vmatmul.msk.f32.gmra.mxu0 %vm184_vm0, %v1392_v35 }
 0x5b8   :  { %v1375_v49 = vpop.permute.xlu1 %1374 }
 0x5b9   :  { %v1394_v32 = vsel %vm312_vm1, %v4747_v45, %v1375_v49  ;;  %v4850_v45 = vld [vmem:[%s7082_s18] sm:$0xff] }
 0x5bc   :  { %v1377_v16 = vpop.permute.xlu0 %1376 }
 0x5bd   :  { %v1395_v58 = vsel %vm312_vm1, %v4751_v31, %v1377_v16  ;;  %v1400_v31 = vperm.slane %v4850_v45, 3 }
 0x5be   :  { %3997 = vmatmul.msk.f32.gmra.mxu0 %vm184_vm0, %v1393_v6 }
 0x5c6   :  { %3998 = vmatmul.msk.f32.gmra.mxu0 %vm184_vm0, %v1394_v32 }
 0x5cb   :  { %v1379_v46 = vpop.permute.xlu1 %1378 }
 0x5cc   :  { %v1396_v37 = vsel %vm312_vm1, %v4755_v11, %v1379_v46 }
 0x5ce   :  { %3999 = vmatmul.msk.f32.gmra.mxu0 %vm184_vm0, %v1395_v58 }
 0x5d6   :  { %4000 = vmatmul.msk.f32.gmra.mxu0 %vm184_vm0, %v1396_v37 }
 0x5fd   :  { %v1381_v43 = vpop.permute.xlu0 %1380 }
 0x5fe   :  { %v1397_v39 = vsel %vm312_vm1, %v4753_v51, %v1381_v43 }
 0x5ff   :  { %4001 = vmatmul.msk.f32.gmra.mxu0 %vm184_vm0, %v1397_v39 }
 0x623   :  { %v1442_v21 = vpop.f32.mrf.mxu0 }
 0x624   :  { %v1443_v3 = vadd.f32 %v1442_v21, %v1400_v31 }
 0x626   :  { %v1466_v47 = vadd.f32 %v1443_v3, %v4445_v29 }
 0x628   :  { %v1474_v11 = vsel %vm184_vm0, %v1466_v47, 0.0 }
 0x629   :  { %1475 = vadd.xlane.f32.xlu2 %v1474_v11 }
 0x62b   :  { %v1445_v14 = vpop.f32.mrf.mxu0 }
 0x62c   :  { %v1446_v12 = vadd.f32 %v1445_v14, %v1400_v31 }
 0x62e   :  { %v1467_v51 = vadd.f32 %v1446_v12, %v4449_v40 }
 0x630   :  { %v1477_v25 = vsel %vm184_vm0, %v1467_v51, 0.0 }
 0x631   :  { %1478 = vadd.xlane.f32.xlu1 %v1477_v25 }
 0x633   :  { %v1448_v20 = vpop.f32.mrf.mxu0 }
 0x634   :  { %v1449_v30 = vadd.f32 %v1448_v20, %v1400_v31 }
 0x636   :  { %v1468_v33 = vadd.f32 %v1449_v30, %v4457_v52 }
 0x638   :  { %v1480_v36 = vsel %vm184_vm0, %v1468_v33, 0.0 }
 0x639   :  { %1481 = vadd.xlane.f32.xlu0 %v1480_v36  ;;  %v1691_v36 = vld [vmem:[%s7055_s7 + $0x80] sm:$0xff] }
 0x63a   :  { %1781 = vmatpush.msrb.mxu1 %v1691_v36 }
 0x63b   :  { %v1451_v63 = vpop.f32.mrf.mxu0 }
 0x63c   :  { %v1452_v34 = vadd.f32 %v1451_v63, %v1400_v31  ;;  %v1692_v63 = vld [vmem:[%s7055_s7 + $0x88] sm:$0xff] }
 0x63d   :  { %1822 = vmatpush.msrb.mxu2 %v1692_v63 }
 0x63e   :  { %v1469_v29 = vadd.f32 %v1452_v34, %v4469_v59  ;;  %v1693_v34 = vld [vmem:[%s7055_s7 + $0x90] sm:$0xff] }
 0x63f   :  { %1863 = vmatpush.msrb.mxu3 %v1693_v34 }
 0x640   :  { %v1483_v44 = vsel %vm184_vm0, %v1469_v29, 0.0 }
 0x641   :  { %1484 = vadd.xlane.f32.xlu2 %v1483_v44  ;;  %v1675_v44 = vld [vmem:[%s7055_s7] sm:$0xff] }
 0x642   :  { %1782 = vmatpush.msrb.mxu1 %v1675_v44 }
 0x643   :  { %v1454_v23 = vpop.f32.mrf.mxu0 }
 0x644   :  { %v1455_v26 = vadd.f32 %v1454_v23, %v1400_v31  ;;  %v1676_v23 = vld [vmem:[%s7055_s7 + $0x8] sm:$0xff] }
 0x645   :  { %1823 = vmatpush.msrb.mxu2 %v1676_v23 }
 0x646   :  { %v1470_v40 = vadd.f32 %v1455_v26, %v4461_v53  ;;  %v4269_v53 = vpop.eup %4268  ;;  %v1677_v26 = vld [vmem:[%s7055_s7 + $0x10] sm:$0xff] }
 0x647   :  { %v1499_v56 = vmul.f32 16.0, %v4269_v53  ;;  %vm1503_vm2 = vweird.f32 %v4269_v53  ;;  %1864 = vmatpush.msrb.mxu3 %v1677_v26 }
 0x648   :  { %v1486_v38 = vsel %vm184_vm0, %v1470_v40, 0.0 }
 0x649   :  { %1487 = vadd.xlane.f32.xlu1 %v1486_v38  ;;  %v1500_v28 = vsub.f32 1.0, %v1499_v56 }
 0x64b   :  { %v1457_v7 = vpop.f32.mrf.mxu0  ;;  %v1501_v55 = vmul.f32 %v4269_v53, %v1500_v28 }
 0x64c   :  { %v1458_v61 = vadd.f32 %v1457_v7, %v1400_v31 }
 0x64d   :  { %v1502_v42 = vadd.f32 %v4269_v53, %v1501_v55 }
 0x64e   :  { %v1471_v52 = vadd.f32 %v1458_v61, %v4451_v41 }
 0x64f   :  { %v4867_v48 = vsel %vm1503_vm2, %v4269_v53, %v1502_v42 }
 0x650   :  { %v1489_v50 = vsel %vm184_vm0, %v1471_v52, 0.0  ;;  %7085 = vst [vmem:[#allocation2_spill] sm:$0xff] %v4867_v48 }
 0x651   :  { %1490 = vadd.xlane.f32.xlu0 %v1489_v50 }
 0x653   :  { %v1460_v13 = vpop.f32.mrf.mxu0 }
 0x654   :  { %v1461_v19 = vadd.f32 %v1460_v13, %v1400_v31 }
 0x656   :  { %v1472_v59 = vadd.f32 %v1461_v19, %v4463_v54 }
 0x658   :  { %v1492_v22 = vsel %vm184_vm0, %v1472_v59, 0.0 }
 0x659   :  { %1493 = vadd.xlane.f32.xlu1 %v1492_v22 }
 0x67c   :  { %v1463_v5 = vpop.f32.mrf.mxu0 }
 0x67d   :  { %v1464_v0 = vadd.f32 %v1463_v5, %v1400_v31 }
 0x67f   :  { %v1473_v27 = vadd.f32 %v1464_v0, %v4473_v1 }
 0x681   :  { %v1495_v60 = vsel %vm184_vm0, %v1473_v27, 0.0 }
 0x69c   :  { %v1476_v41 = vpop.xlane.xlu2 %1475 }
 0x69d   :  { %v1505_v57 = vmul.f32 %v4867_v48, %v1476_v41 }
 0x69f   :  { %v4870_v2 = vsub.f32 %v1466_v47, %v1505_v57 }
 0x6a1   :  { %v1521_v54 = vmul.f32 %v4870_v2, %v4870_v2 }
 0x6a3   :  { %v1529_v4 = vsel %vm184_vm0, %v1521_v54, 0.0 }
 0x6a4   :  { %1530 = vadd.xlane.f32.xlu2 %v1529_v4  ;;  %v1479_v10 = vpop.xlane.xlu1 %1478 }
 0x6a5   :  { %v1506_v9 = vmul.f32 %v4867_v48, %v1479_v10 }
 0x6a7   :  { %v4876_v18 = vsub.f32 %v1467_v51, %v1506_v9  ;;  %v4947_v9 = vperm.slane %v4850_v45, 4 }
 0x6a9   :  { %v1522_v15 = vmul.f32 %v4876_v18, %v4876_v18 }
 0x6ab   :  { %v1532_v17 = vsel %vm184_vm0, %v1522_v15, 0.0 }
 0x6ac   :  { %v1482_v24 = vpop.xlane.xlu0 %1481  ;;  %1496 = vadd.xlane.f32.xlu2 %v1495_v60  ;;  %1533 = vadd.xlane.f32.xlu0 %v1532_v17  ;;  %v4950_v60 = vperm.slane %v4850_v45, 5 }
 0x6ad   :  { %v1507_v35 = vmul.f32 %v4867_v48, %v1482_v24 }
 0x6af   :  { %v4884_v62 = vsub.f32 %v1468_v33, %v1507_v35 }
 0x6b1   :  { %v1523_v6 = vmul.f32 %v4884_v62, %v4884_v62 }
 0x6b3   :  { %v1535_v49 = vsel %vm184_vm0, %v1523_v6, 0.0 }
 0x6b4   :  { %v1485_v1 = vpop.xlane.xlu2 %1484  ;;  %1536 = vadd.xlane.f32.xlu1 %v1535_v49 }
 0x6b5   :  { %v1508_v32 = vmul.f32 %v4867_v48, %v1485_v1 }
 0x6b7   :  { %v4890_v16 = vsub.f32 %v1469_v29, %v1508_v32  ;;  %v1694_v29 = vld [vmem:[%s7055_s7 + $0x98] sm:$0xff] }
 0x6b8   :  { %1904 = vmatpush.msrb.mxu0 %v1694_v29 }
 0x6b9   :  { %v1524_v58 = vmul.f32 %v4890_v16, %v4890_v16 }
 0x6bb   :  { %v1538_v46 = vsel %vm184_vm0, %v1524_v58, 0.0 }
 0x6bc   :  { %1539 = vadd.xlane.f32.xlu0 %v1538_v46  ;;  %v1488_v37 = vpop.xlane.xlu1 %1487 }
 0x6bd   :  { %v1509_v43 = vmul.f32 %v4867_v48, %v1488_v37 }
 0x6bf   :  { %v4896_v39 = vsub.f32 %v1470_v40, %v1509_v43  ;;  %v1678_v40 = vld [vmem:[%s7055_s7 + $0x18] sm:$0xff] }
 0x6c0   :  { %1905 = vmatpush.msrb.mxu0 %v1678_v40 }
 0x6c1   :  { %v1525_v31 = vmul.f32 %v4896_v39, %v4896_v39 }
 0x6c3   :  { %v1541_v21 = vsel %vm184_vm0, %v1525_v31, 0.0 }
 0x6c4   :  { %v1491_v3 = vpop.xlane.xlu0 %1490  ;;  %1542 = vadd.xlane.f32.xlu2 %v1541_v21 }
 0x6c5   :  { %v1510_v47 = vmul.f32 %v4867_v48, %v1491_v3 }
 0x6c7   :  { %v4902_v11 = vsub.f32 %v1471_v52, %v1510_v47 }
 0x6c9   :  { %v1526_v14 = vmul.f32 %v4902_v11, %v4902_v11 }
 0x6cb   :  { %v1544_v12 = vsel %vm184_vm0, %v1526_v14, 0.0 }
 0x6cc   :  { %1545 = vadd.xlane.f32.xlu1 %v1544_v12  ;;  %v1494_v51 = vpop.xlane.xlu1 %1493 }
 0x6cd   :  { %v1511_v25 = vmul.f32 %v4867_v48, %v1494_v51 }
 0x6cf   :  { %v4908_v20 = vsub.f32 %v1472_v59, %v1511_v25 }
 0x6d1   :  { %v1527_v30 = vmul.f32 %v4908_v20, %v4908_v20 }
 0x6d3   :  { %v1547_v33 = vsel %vm184_vm0, %v1527_v30, 0.0 }
 0x6d4   :  { %1548 = vadd.xlane.f32.xlu0 %v1547_v33 }
 0x717   :  { %v1531_v38 = vpop.xlane.xlu2 %1530 }
 0x718   :  { %v1553_v7 = vmul.f32 %v1531_v38, %v4867_v48 }
 0x71a   :  { %v1561_v61 = vadd.f32 1e-05, %v1553_v7 }
 0x71c   :  { %4270 = vrsqrt.f32 %v1561_v61  ;;  %vm1575_vm4 = vweird.f32 %v1561_v61 }
 0x71f   :  { %v1497_v52 = vpop.xlane.xlu2 %1496  ;;  %v1534_v50 = vpop.xlane.xlu0 %1533 }
 0x720   :  { %v1512_v13 = vmul.f32 %v4867_v48, %v1497_v52  ;;  %v1554_v19 = vmul.f32 %v1534_v50, %v4867_v48 }
 0x722   :  { %v4271_v59 = vpop.eup %4270  ;;  %v4940_v22 = vsub.f32 %v1473_v27, %v1512_v13  ;;  %v1562_v8 = vadd.f32 1e-05, %v1554_v19  ;;  %v1696_v19 = vld [vmem:[%s7055_s7 + $0xa8] sm:$0xff] }
 0x723   :  { %v1570_v53 = vmul.f32 %v4271_v59, %v1561_v61  ;;  %vm1576_vm3 = vweird.f32 %v4271_v59  ;;  %1986 = vmatpush.msra.mxu2 %v1696_v19 }
 0x724   :  { %4272 = vrsqrt.f32 %v1562_v8  ;;  %v1528_v56 = vmul.f32 %v4940_v22, %v4940_v22  ;;  %vm1577_vm5 = vmor %vm1575_vm4, %vm1576_vm3  ;;  %vm1585_vm7 = vweird.f32 %v1562_v8 }
 0x725   :  { %v1571_v28 = vmul.f32 %v4271_v59, %v1570_v53 }
 0x726   :  { %v1550_v55 = vsel %vm184_vm0, %v1528_v56, 0.0  ;;  %v1698_v56 = vld [vmem:[%s7055_s7 + $0xb8] sm:$0xff] }
 0x727   :  { %v1572_v42 = vmul.f32 0.5, %v1571_v28  ;;  %1551 = vadd.xlane.f32.xlu2 %v1550_v55  ;;  %v1537_v41 = vpop.xlane.xlu1 %1536  ;;  %2068 = vmatpush.msra.mxu0 %v1698_v56  ;;  %v1703_v56 = vld [vmem:[%s7055_s7 + $0xe0] sm:$0xff] }
 0x728   :  { %v1555_v57 = vmul.f32 %v1537_v41, %v4867_v48 }
 0x729   :  { %v1573_v5 = vsub.f32 1.5, %v1572_v42 }
 0x72a   :  { %v4273_v54 = vpop.eup %4272  ;;  %v1563_v0 = vadd.f32 1e-05, %v1555_v57 }
 0x72b   :  { %v1574_v4 = vmul.f32 %v4271_v59, %v1573_v5  ;;  %v1580_v10 = vmul.f32 %v4273_v54, %v1562_v8  ;;  %vm1586_vm6 = vweird.f32 %v4273_v54  ;;  %v1695_v8 = vld [vmem:[%s7055_s7 + $0xa0] sm:$0xff] }
 0x72c   :  { %4274 = vrsqrt.f32 %v1563_v0  ;;  %vm1587_vm8 = vmor %vm1585_vm7, %vm1586_vm6  ;;  %vm1595_vm10 = vweird.f32 %v1563_v0  ;;  %1945 = vmatpush.msra.mxu1 %v1695_v8  ;;  %v1704_v8 = vld [vmem:[%s7055_s7 + $0xe8] sm:$0xff] }
 0x72d   :  { %v1578_v27 = vsel %vm1577_vm5, %v4271_v59, %v1574_v4  ;;  %v1581_v15 = vmul.f32 %v4273_v54, %v1580_v10  ;;  %v1697_v59 = vld [vmem:[%s7055_s7 + $0xb0] sm:$0xff] }
 0x72e   :  { %v1649_v17 = vmul.f32 %v1578_v27, %v4870_v2  ;;  %2027 = vmatpush.msra.mxu3 %v1697_v59  ;;  %v1686_v59 = vld [vmem:[%s7055_s7 + $0x58] sm:$0xff] }
 0x72f   :  { %v1582_v24 = vmul.f32 0.5, %v1581_v15  ;;  %v1540_v35 = vpop.xlane.xlu0 %1539 }
 0x730   :  { %v1658_v6 = vmul.f32 %v4947_v9, %v1649_v17  ;;  %v1556_v49 = vmul.f32 %v1540_v35, %v4867_v48 }
 0x731   :  { %v1583_v1 = vsub.f32 1.5, %v1582_v24 }
 0x732   :  { %v4275_v32 = vpop.eup %4274  ;;  %v4956_v58 = vadd.f32 %v4950_v60, %v1658_v6  ;;  %v1564_v46 = vadd.f32 1e-05, %v1556_v49 }
 0x733   :  { %v1584_v37 = vmul.f32 %v4273_v54, %v1583_v1  ;;  %v1590_v43 = vmul.f32 %v4275_v32, %v1563_v0  ;;  %vm1596_vm9 = vweird.f32 %v4275_v32 }
 0x734   :  { %7086 = vst [vmem:[#allocation3_spill] sm:$0xff] %v4956_v58  ;;  %4276 = vrsqrt.f32 %v1564_v46  ;;  %4002 = vmatmul.msk.f32.vlgmr.msrb.gmra.mxu1 %vm184_vm0, %v4956_v58  ;;  %4010 = vmatmul.msk.f32.vlgmr.msrb.gmra.mxu2 %vm184_vm0, %v4956_v58  ;;  %vm1597_vm11 = vmor %vm1595_vm10, %vm1596_vm9  ;;  %vm1605_vm13 = vweird.f32 %v1564_v46 }
 0x735   :  { %v1588_v45 = vsel %vm1587_vm8, %v4273_v54, %v1584_v37  ;;  %v1591_v2 = vmul.f32 %v4275_v32, %v1590_v43  ;;  %4018 = vmatmul.msk.f32.vlgmr.msrb.gmra.mxu3 %vm184_vm0, %v4956_v58  ;;  %4026 = vmatmul.msk.f32.vlgmr.msrb.gmra.mxu0 %vm184_vm0, %v4956_v58 }
 0x736   :  { %v1650_v31 = vmul.f32 %v1588_v45, %v4876_v18 }
 0x737   :  { %v1592_v21 = vmul.f32 0.5, %v1591_v2  ;;  %v1543_v3 = vpop.xlane.xlu2 %1542 }
 0x738   :  { %v1659_v47 = vmul.f32 %v4947_v9, %v1650_v31  ;;  %v1557_v14 = vmul.f32 %v1543_v3, %v4867_v48 }
 0x739   :  { %v1593_v12 = vsub.f32 1.5, %v1592_v21 }
 0x73a   :  { %v4277_v51 = vpop.eup %4276  ;;  %v4970_v25 = vadd.f32 %v4950_v60, %v1659_v47  ;;  %v1565_v30 = vadd.f32 1e-05, %v1557_v14 }
 0x73b   :  { %v1594_v33 = vmul.f32 %v4275_v32, %v1593_v12  ;;  %v1600_v36 = vmul.f32 %v4277_v51, %v1564_v46  ;;  %vm1606_vm12 = vweird.f32 %v4277_v51  ;;  %v1681_v12 = vld [vmem:[%s7055_s7 + $0x30] sm:$0xff] }
 0x73c   :  { %7087 = vst [vmem:[#allocation4_spill] sm:$0xff] %v4970_v25  ;;  %4278 = vrsqrt.f32 %v1565_v30  ;;  %4003 = vmatmul.msk.f32.gmra.mxu1 %vm184_vm0, %v4970_v25  ;;  %4011 = vmatmul.msk.f32.gmra.mxu2 %vm184_vm0, %v4970_v25  ;;  %vm1607_vm14 = vmor %vm1605_vm13, %vm1606_vm12  ;;  %vm1615_vm2 = vweird.f32 %v1565_v30 }
 0x73d   :  { %v1598_v18 = vsel %vm1597_vm11, %v4275_v32, %v1594_v33  ;;  %v1601_v63 = vmul.f32 %v4277_v51, %v1600_v36  ;;  %4019 = vmatmul.msk.f32.gmra.mxu3 %vm184_vm0, %v4970_v25  ;;  %4027 = vmatmul.msk.f32.gmra.mxu0 %vm184_vm0, %v4970_v25 }
 0x73e   :  { %v1651_v34 = vmul.f32 %v1598_v18, %v4884_v62  ;;  %2028 = vmatpush.msra.mxu3 %v1681_v12  ;;  %v2598_v12 = vld [vmem:[%s7056_s8 + $0x178] sm:$0xff] }
 0x73f   :  { %v1602_v29 = vmul.f32 0.5, %v1601_v63  ;;  %v1546_v44 = vpop.xlane.xlu1 %1545 }
 0x740   :  { %v1660_v23 = vmul.f32 %v4947_v9, %v1651_v34  ;;  %v1558_v26 = vmul.f32 %v1546_v44, %v4867_v48  ;;  %v1700_v34 = vld [vmem:[%s7055_s7 + $0xc8] sm:$0xff] }
 0x741   :  { %v1603_v40 = vsub.f32 1.5, %v1602_v29  ;;  %v1701_v29 = vld [vmem:[%s7055_s7 + $0xd0] sm:$0xff] }
 0x742   :  { %v4279_v38 = vpop.eup %4278  ;;  %v4984_v7 = vadd.f32 %v4950_v60, %v1660_v23  ;;  %v1566_v61 = vadd.f32 1e-05, %v1558_v26  ;;  %2191 = vmatpush.msrb.mxu3 %v1701_v29  ;;  %v2580_v29 = vld [vmem:[%s7056_s8 + $0xe8] sm:$0xff] }
 0x743   :  { %v1604_v52 = vmul.f32 %v4277_v51, %v1603_v40  ;;  %v1610_v50 = vmul.f32 %v4279_v38, %v1565_v30  ;;  %vm1616_vm15 = vweird.f32 %v4279_v38  ;;  %v1682_v30 = vld [vmem:[%s7055_s7 + $0x38] sm:$0xff]  ;;  %v1699_v40 = vld [vmem:[%s7055_s7 + $0xc0] sm:$0xff] }
 0x744   :  { %7088 = vst [vmem:[#allocation5_spill] sm:$0xff] %v4984_v7  ;;  %4280 = vrsqrt.f32 %v1566_v61  ;;  %4004 = vmatmul.msk.f32.gmra.mxu1 %vm184_vm0, %v4984_v7  ;;  %4012 = vmatmul.msk.f32.gmra.mxu2 %vm184_vm0, %v4984_v7  ;;  %vm1617_vm3 = vmor %vm1615_vm2, %vm1616_vm15  ;;  %vm1625_vm5 = vweird.f32 %v1566_v61 }
 0x745   :  { %v1608_v62 = vsel %vm1607_vm14, %v4277_v51, %v1604_v52  ;;  %v1611_v13 = vmul.f32 %v4279_v38, %v1610_v50  ;;  %4020 = vmatmul.msk.f32.gmra.mxu3 %vm184_vm0, %v4984_v7  ;;  %4028 = vmatmul.msk.f32.gmra.mxu0 %vm184_vm0, %v4984_v7  ;;  %v1679_v51 = vld [vmem:[%s7055_s7 + $0x20] sm:$0xff] }
 0x746   :  { %v1652_v53 = vmul.f32 %v1608_v62, %v4890_v16  ;;  %1946 = vmatpush.msra.mxu1 %v1679_v51  ;;  %2069 = vmatpush.msra.mxu0 %v1682_v30  ;;  %v2566_v51 = vld [vmem:[%s7056_s8 + $0x78] sm:$0xff] }
 0x747   :  { %v1612_v28 = vmul.f32 0.5, %v1611_v13  ;;  %v1549_v55 = vpop.xlane.xlu0 %1548 }
 0x748   :  { %v1661_v42 = vmul.f32 %v4947_v9, %v1652_v53  ;;  %v1559_v41 = vmul.f32 %v1549_v55, %v4867_v48  ;;  %2109 = vmatpush.msrb.mxu1 %v1699_v40  ;;  %v1705_v53 = vld [vmem:[%s7055_s7 + $0xf0] sm:$0xff]  ;;  %v2579_v40 = vld [vmem:[%s7056_s8 + $0xe0] sm:$0xff] }
 0x749   :  { %v1613_v57 = vsub.f32 1.5, %v1612_v28  ;;  %v1706_v28 = vld [vmem:[%s7055_s7 + $0xf8] sm:$0xff] }
 0x74a   :  { %v4281_v5 = vpop.eup %4280  ;;  %v5010_v54 = vadd.f32 %v4950_v60, %v1661_v42  ;;  %v1567_v16 = vadd.f32 1e-05, %v1559_v41 }
 0x74b   :  { %v1614_v0 = vmul.f32 %v4279_v38, %v1613_v57  ;;  %v1620_v4 = vmul.f32 %v4281_v5, %v1566_v61  ;;  %vm1626_vm4 = vweird.f32 %v4281_v5  ;;  %v1702_v61 = vld [vmem:[%s7055_s7 + $0xd8] sm:$0xff] }
 0x74c   :  { %7089 = vst [vmem:[#allocation6_spill] sm:$0xff] %v5010_v54  ;;  %4282 = vrsqrt.f32 %v1567_v16  ;;  %4005 = vmatmul.msk.f32.gmra.mxu1 %vm184_vm0, %v5010_v54  ;;  %4013 = vmatmul.msk.f32.gmra.mxu2 %vm184_vm0, %v5010_v54  ;;  %vm1627_vm6 = vmor %vm1625_vm5, %vm1626_vm4  ;;  %vm1635_vm8 = vweird.f32 %v1567_v16 }
 0x74d   :  { %v1618_v10 = vsel %vm1617_vm3, %v4279_v38, %v1614_v0  ;;  %v1621_v27 = vmul.f32 %v4281_v5, %v1620_v4  ;;  %4021 = vmatmul.msk.f32.gmra.mxu3 %vm184_vm0, %v5010_v54  ;;  %4029 = vmatmul.msk.f32.gmra.mxu0 %vm184_vm0, %v5010_v54  ;;  %v1688_v4 = vld [vmem:[%s7055_s7 + $0x68] sm:$0xff] }
 0x74e   :  { %v1653_v15 = vmul.f32 %v1618_v10, %v4896_v39  ;;  %2232 = vmatpush.msrb.mxu0 %v1702_v61  ;;  %v1689_v10 = vld [vmem:[%s7055_s7 + $0x70] sm:$0xff] }
 0x74f   :  { %v1622_v17 = vmul.f32 0.5, %v1621_v27 }
 0x750   :  { %v1662_v24 = vmul.f32 %v4947_v9, %v1653_v15  ;;  %2233 = vmatpush.msrb.mxu0 %v1686_v59  ;;  %v2612_v59 = vld [vmem:[%s7056_s8 + $0x1e8] sm:$0xff] }
 0x751   :  { %v1623_v35 = vsub.f32 1.5, %v1622_v17 }
 0x752   :  { %v4283_v6 = vpop.eup %4282  ;;  %v5023_v49 = vadd.f32 %v4950_v60, %v1662_v24  ;;  %v1687_v24 = vld [vmem:[%s7055_s7 + $0x60] sm:$0xff] }
 0x753   :  { %v1624_v1 = vmul.f32 %v4281_v5, %v1623_v35  ;;  %v1630_v32 = vmul.f32 %v4283_v6, %v1567_v16  ;;  %vm1636_vm7 = vweird.f32 %v4283_v6  ;;  %v1690_v35 = vld [vmem:[%s7055_s7 + $0x78] sm:$0xff] }
 0x754   :  { %7090 = vst [vmem:[#allocation7_spill] sm:$0xff] %v5023_v49  ;;  %4006 = vmatmul.msk.f32.gmra.mxu1 %vm184_vm0, %v5023_v49  ;;  %4014 = vmatmul.msk.f32.gmra.mxu2 %vm184_vm0, %v5023_v49  ;;  %vm1637_vm9 = vmor %vm1635_vm8, %vm1636_vm7 }
 0x755   :  { %v1628_v39 = vsel %vm1627_vm6, %v4281_v5, %v1624_v1  ;;  %v1631_v46 = vmul.f32 %v4283_v6, %v1630_v32  ;;  %4022 = vmatmul.msk.f32.gmra.mxu3 %vm184_vm0, %v5023_v49  ;;  %4030 = vmatmul.msk.f32.gmra.mxu0 %vm184_vm0, %v5023_v49 }
 0x756   :  { %v1654_v37 = vmul.f32 %v1628_v39, %v4902_v11 }
 0x757   :  { %v1632_v43 = vmul.f32 0.5, %v1631_v46 }
 0x758   :  { %v1663_v45 = vmul.f32 %v4947_v9, %v1654_v37 }
 0x759   :  { %v1633_v2 = vsub.f32 1.5, %v1632_v43 }
 0x75a   :  { %v5036_v31 = vadd.f32 %v4950_v60, %v1663_v45 }
 0x75b   :  { %v1634_v21 = vmul.f32 %v4283_v6, %v1633_v2 }
 0x75c   :  { %7091 = vst [vmem:[#allocation8_spill] sm:$0xff] %v5036_v31  ;;  %4007 = vmatmul.msk.f32.gmra.mxu1 %vm184_vm0, %v5036_v31  ;;  %4015 = vmatmul.msk.f32.gmra.mxu2 %vm184_vm0, %v5036_v31 }
 0x75d   :  { %v1638_v3 = vsel %vm1637_vm9, %v4283_v6, %v1634_v21  ;;  %4023 = vmatmul.msk.f32.gmra.mxu3 %vm184_vm0, %v5036_v31  ;;  %4031 = vmatmul.msk.f32.gmra.mxu0 %vm184_vm0, %v5036_v31 }
 0x75e   :  { %v1655_v11 = vmul.f32 %v1638_v3, %v4908_v20  ;;  %v1680_v20 = vld [vmem:[%s7055_s7 + $0x28] sm:$0xff] }
 0x75f   :  { %1987 = vmatpush.msra.mxu2 %v1680_v20  ;;  %v2582_v20 = vld [vmem:[%s7056_s8 + $0xf8] sm:$0xff] }
 0x760   :  { %v1664_v47 = vmul.f32 %v4947_v9, %v1655_v11 }
 0x761   :  { %2150 = vmatpush.msrb.mxu2 %v1700_v34  ;;  %v2565_v34 = vld [vmem:[%s7056_s8 + $0x70] sm:$0xff] }
 0x762   :  { %v5049_v14 = vadd.f32 %v4950_v60, %v1664_v47 }
 0x764   :  { %7092 = vst [vmem:[#allocation9_spill] sm:$0xff] %v5049_v14  ;;  %4008 = vmatmul.msk.f32.gmra.mxu1 %vm184_vm0, %v5049_v14  ;;  %4016 = vmatmul.msk.f32.gmra.mxu2 %vm184_vm0, %v5049_v14 }
 0x765   :  { %4024 = vmatmul.msk.f32.gmra.mxu3 %vm184_vm0, %v5049_v14  ;;  %4032 = vmatmul.msk.f32.gmra.mxu0 %vm184_vm0, %v5049_v14 }
 0x79a   :  { %v1552_v33 = vpop.xlane.xlu2 %1551 }
 0x79b   :  { %v1560_v36 = vmul.f32 %v1552_v33, %v4867_v48  ;;  %v2581_v33 = vld [vmem:[%s7056_s8 + $0xf0] sm:$0xff] }
 0x79d   :  { %v1568_v18 = vadd.f32 1e-05, %v1560_v36 }
 0x79f   :  { %4284 = vrsqrt.f32 %v1568_v18  ;;  %vm1645_vm11 = vweird.f32 %v1568_v18 }
 0x7a5   :  { %v4285_v63 = vpop.eup %4284 }
 0x7a6   :  { %v1640_v44 = vmul.f32 %v4285_v63, %v1568_v18  ;;  %vm1646_vm10 = vweird.f32 %v4285_v63 }
 0x7a7   :  { %vm1647_vm12 = vmor %vm1645_vm11, %vm1646_vm10 }
 0x7a8   :  { %v1641_v23 = vmul.f32 %v4285_v63, %v1640_v44  ;;  %v2596_v44 = vld [vmem:[%s7056_s8 + $0x168] sm:$0xff] }
 0x7aa   :  { %v1642_v26 = vmul.f32 0.5, %v1641_v23  ;;  %v2614_v23 = vld [vmem:[%s7056_s8 + $0x1f8] sm:$0xff] }
 0x7ac   :  { %v1643_v38 = vsub.f32 1.5, %v1642_v26  ;;  %v2564_v26 = vld [vmem:[%s7056_s8 + $0x68] sm:$0xff] }
 0x7ae   :  { %v1644_v52 = vmul.f32 %v4285_v63, %v1643_v38 }
 0x7b0   :  { %v1648_v50 = vsel %vm1647_vm12, %v4285_v63, %v1644_v52  ;;  %v2597_v63 = vld [vmem:[%s7056_s8 + $0x170] sm:$0xff] }
 0x7b1   :  { %v1656_v62 = vmul.f32 %v1648_v50, %v4940_v22  ;;  %v1684_v22 = vld [vmem:[%s7055_s7 + $0x48] sm:$0xff]  ;;  %v5173_v55 = vpop.f32.mrf.mxu1 }
 0x7b2   :  { %2151 = vmatpush.msrb.mxu2 %v1684_v22  ;;  %v5179_v42 = vpop.f32.mrf.mxu0  ;;  %v2563_v22 = vld [vmem:[%s7056_s8 + $0x60] sm:$0xff] }
 0x7b3   :  { %v1665_v13 = vmul.f32 %v4947_v9, %v1656_v62  ;;  %v1685_v9 = vld [vmem:[%s7055_s7 + $0x50] sm:$0xff]  ;;  %v2595_v62 = vld [vmem:[%s7056_s8 + $0x160] sm:$0xff] }
 0x7b4   :  { %2192 = vmatpush.msrb.mxu3 %v1685_v9  ;;  %v2578_v9 = vld [vmem:[%s7056_s8 + $0xd8] sm:$0xff] }
 0x7b5   :  { %v5087_v19 = vadd.f32 %v4950_v60, %v1665_v13  ;;  %v1683_v60 = vld [vmem:[%s7055_s7 + $0x40] sm:$0xff]  ;;  %v2613_v13 = vld [vmem:[%s7056_s8 + $0x1f0] sm:$0xff] }
 0x7b6   :  { %2110 = vmatpush.msrb.mxu1 %v1683_v60  ;;  %v2594_v60 = vld [vmem:[%s7056_s8 + $0x158] sm:$0xff] }
 0x7b7   :  { %7093 = vst [vmem:[#allocation10_spill] sm:$0xff] %v5087_v19  ;;  %4009 = vmatmul.msk.f32.gmra.mxu1 %vm184_vm0, %v5087_v19  ;;  %4017 = vmatmul.msk.f32.gmra.mxu2 %vm184_vm0, %v5087_v19  ;;  %v5181_v41 = vpop.f32.mrf.mxu2 }
 0x7b8   :  { %4025 = vmatmul.msk.f32.gmra.mxu3 %vm184_vm0, %v5087_v19  ;;  %4033 = vmatmul.msk.f32.gmra.mxu0 %vm184_vm0, %v5087_v19  ;;  %v5183_v57 = vpop.f32.mrf.mxu3 }
 0x7b9   :  { %v5193_v5 = vpop.f32.mrf.mxu1 }
 0x7ba   :  { %v5195_v16 = vpop.f32.mrf.mxu0 }
 0x7bf   :  { %4034 = vmatmul.msk.f32.vlgmr.msra.gmra.mxu1 %vm184_vm0, %v4956_v58  ;;  %4042 = vmatmul.msk.f32.vlgmr.msra.gmra.mxu2 %vm184_vm0, %v4956_v58  ;;  %v5201_v0 = vpop.f32.mrf.mxu2 }
 0x7c0   :  { %4050 = vmatmul.msk.f32.vlgmr.msra.gmra.mxu3 %vm184_vm0, %v4956_v58  ;;  %4058 = vmatmul.msk.f32.vlgmr.msra.gmra.mxu0 %vm184_vm0, %v4956_v58  ;;  %v5213_v27 = vpop.f32.mrf.mxu3 }
 0x7c1   :  { %2314 = vmatpush.msra.mxu2 %v1704_v8  ;;  %2355 = vmatpush.msra.mxu3 %v1705_v53  ;;  %v5215_v15 = vpop.f32.mrf.mxu1  ;;  %v2562_v8 = vld [vmem:[%s7056_s8 + $0x58] sm:$0xff]  ;;  %v2577_v53 = vld [vmem:[%s7056_s8 + $0xd0] sm:$0xff] }
 0x7c2   :  { %2273 = vmatpush.msra.mxu1 %v1703_v56  ;;  %2396 = vmatpush.msra.mxu0 %v1706_v28  ;;  %v5217_v17 = vpop.f32.mrf.mxu0 }
 0x7c3   :  { %2315 = vmatpush.msra.mxu2 %v1688_v4  ;;  %2356 = vmatpush.msra.mxu3 %v1689_v10 }
 0x7c4   :  { %2274 = vmatpush.msra.mxu1 %v1687_v24  ;;  %2397 = vmatpush.msra.mxu0 %v1690_v35  ;;  %v2593_v24 = vld [vmem:[%s7056_s8 + $0x150] sm:$0xff]  ;;  %v2611_v35 = vld [vmem:[%s7056_s8 + $0x1e0] sm:$0xff] }
 0x7c7   :  { %4035 = vmatmul.msk.f32.gmra.mxu1 %vm184_vm0, %v4970_v25  ;;  %4043 = vmatmul.msk.f32.gmra.mxu2 %vm184_vm0, %v4970_v25  ;;  %v5233_v6 = vpop.f32.mrf.mxu2 }
 0x7c8   :  { %4051 = vmatmul.msk.f32.gmra.mxu3 %vm184_vm0, %v4970_v25  ;;  %4059 = vmatmul.msk.f32.gmra.mxu0 %vm184_vm0, %v4970_v25  ;;  %v5235_v1 = vpop.f32.mrf.mxu3 }
 0x7c9   :  { %v5237_v32 = vpop.f32.mrf.mxu1 }
 0x7ca   :  { %v5239_v39 = vpop.f32.mrf.mxu0 }
 0x7cf   :  { %4036 = vmatmul.msk.f32.gmra.mxu1 %vm184_vm0, %v4984_v7  ;;  %4044 = vmatmul.msk.f32.gmra.mxu2 %vm184_vm0, %v4984_v7  ;;  %v5249_v46 = vpop.f32.mrf.mxu2 }
 0x7d0   :  { %4052 = vmatmul.msk.f32.gmra.mxu3 %vm184_vm0, %v4984_v7  ;;  %4060 = vmatmul.msk.f32.gmra.mxu0 %vm184_vm0, %v4984_v7  ;;  %v5251_v37 = vpop.f32.mrf.mxu3 }
 0x7d1   :  { %v5257_v43 = vpop.f32.mrf.mxu1 }
 0x7d2   :  { %v5263_v45 = vpop.f32.mrf.mxu0 }
 0x7d7   :  { %4037 = vmatmul.msk.f32.gmra.mxu1 %vm184_vm0, %v5010_v54  ;;  %4045 = vmatmul.msk.f32.gmra.mxu2 %vm184_vm0, %v5010_v54  ;;  %v5265_v2 = vpop.f32.mrf.mxu2 }
 0x7d8   :  { %4053 = vmatmul.msk.f32.gmra.mxu3 %vm184_vm0, %v5010_v54  ;;  %4061 = vmatmul.msk.f32.gmra.mxu0 %vm184_vm0, %v5010_v54  ;;  %v5267_v21 = vpop.f32.mrf.mxu3 }
 0x7d9   :  { %v5277_v3 = vpop.f32.mrf.mxu1 }
 0x7da   :  { %v5279_v11 = vpop.f32.mrf.mxu0 }
 0x7df   :  { %4038 = vmatmul.msk.f32.gmra.mxu1 %vm184_vm0, %v5023_v49  ;;  %4046 = vmatmul.msk.f32.gmra.mxu2 %vm184_vm0, %v5023_v49  ;;  %v5285_v47 = vpop.f32.mrf.mxu2 }
 0x7e0   :  { %4054 = vmatmul.msk.f32.gmra.mxu3 %vm184_vm0, %v5023_v49  ;;  %4062 = vmatmul.msk.f32.gmra.mxu0 %vm184_vm0, %v5023_v49  ;;  %v5300_v30 = vpop.f32.mrf.mxu3 }
 0x7e1   :  { %v5305_v36 = vpop.f32.mrf.mxu1 }
 0x7e2   :  { %v5307_v18 = vpop.f32.mrf.mxu0 }
 0x7e7   :  { %4039 = vmatmul.msk.f32.gmra.mxu1 %vm184_vm0, %v5036_v31  ;;  %4047 = vmatmul.msk.f32.gmra.mxu2 %vm184_vm0, %v5036_v31  ;;  %v5338_v38 = vpop.f32.mrf.mxu2 }
 0x7e8   :  { %4055 = vmatmul.msk.f32.gmra.mxu3 %vm184_vm0, %v5036_v31  ;;  %4063 = vmatmul.msk.f32.gmra.mxu0 %vm184_vm0, %v5036_v31  ;;  %v5340_v61 = vpop.f32.mrf.mxu3 }
 0x7ef   :  { %4040 = vmatmul.msk.f32.gmra.mxu1 %vm184_vm0, %v5049_v14  ;;  %4048 = vmatmul.msk.f32.gmra.mxu2 %vm184_vm0, %v5049_v14 }
 0x7f0   :  { %4056 = vmatmul.msk.f32.gmra.mxu3 %vm184_vm0, %v5049_v14  ;;  %4064 = vmatmul.msk.f32.gmra.mxu0 %vm184_vm0, %v5049_v14 }
 0x7f7   :  { %4041 = vmatmul.msk.f32.gmra.mxu1 %vm184_vm0, %v5087_v19  ;;  %4049 = vmatmul.msk.f32.gmra.mxu2 %vm184_vm0, %v5087_v19 }
 0x7f8   :  { %4057 = vmatmul.msk.f32.gmra.mxu3 %vm184_vm0, %v5087_v19  ;;  %4065 = vmatmul.msk.f32.gmra.mxu0 %vm184_vm0, %v5087_v19 }
 0x7ff   :  { %4066 = vmatmul.msk.f32.vlgmr.msrb.gmra.mxu1 %vm184_vm0, %v4956_v58  ;;  %4074 = vmatmul.msk.f32.vlgmr.msrb.gmra.mxu2 %vm184_vm0, %v4956_v58 }
 0x800   :  { %4082 = vmatmul.msk.f32.vlgmr.msrb.gmra.mxu3 %vm184_vm0, %v4956_v58  ;;  %4090 = vmatmul.msk.f32.vlgmr.msrb.gmra.mxu0 %vm184_vm0, %v4956_v58 }
 0x801   :  { %2849 = vmatpush.msrb.mxu2 %v2582_v20  ;;  %2890 = vmatpush.msrb.mxu3 %v2598_v12  ;;  %v2561_v20 = vld [vmem:[%s7056_s8 + $0x50] sm:$0xff]  ;;  %v2576_v12 = vld [vmem:[%s7056_s8 + $0xc8] sm:$0xff] }
 0x802   :  { %2808 = vmatpush.msrb.mxu1 %v2566_v51  ;;  %2931 = vmatpush.msrb.mxu0 %v2614_v23  ;;  %v2592_v51 = vld [vmem:[%s7056_s8 + $0x148] sm:$0xff] }
 0x803   :  { %2850 = vmatpush.msrb.mxu2 %v2581_v33  ;;  %2891 = vmatpush.msrb.mxu3 %v2597_v63  ;;  %v2610_v33 = vld [vmem:[%s7056_s8 + $0x1d8] sm:$0xff]  ;;  %v2560_v63 = vld [vmem:[%s7056_s8 + $0x48] sm:$0xff] }
 0x804   :  { %2809 = vmatpush.msrb.mxu1 %v2565_v34  ;;  %2932 = vmatpush.msrb.mxu0 %v2613_v13  ;;  %v2575_v34 = vld [vmem:[%s7056_s8 + $0xc0] sm:$0xff] }
 0x805   :  { %2851 = vmatpush.msrb.mxu2 %v2580_v29  ;;  %2892 = vmatpush.msrb.mxu3 %v2596_v44  ;;  %v2559_v13 = vld [vmem:[%s7056_s8 + $0x40] sm:$0xff] }
 0x806   :  { %2810 = vmatpush.msrb.mxu1 %v2564_v26  ;;  %2933 = vmatpush.msrb.mxu0 %v2612_v59  ;;  %v2558_v59 = vld [vmem:[%s7056_s8 + $0x38] sm:$0xff] }
 0x807   :  { %4067 = vmatmul.msk.f32.gmra.mxu1 %vm184_vm0, %v4970_v25  ;;  %4075 = vmatmul.msk.f32.gmra.mxu2 %vm184_vm0, %v4970_v25 }
 0x808   :  { %4083 = vmatmul.msk.f32.gmra.mxu3 %vm184_vm0, %v4970_v25  ;;  %4091 = vmatmul.msk.f32.gmra.mxu0 %vm184_vm0, %v4970_v25 }
 0x809   :  { %2852 = vmatpush.msrb.mxu2 %v2579_v40  ;;  %2893 = vmatpush.msrb.mxu3 %v2595_v62  ;;  %v2591_v40 = vld [vmem:[%s7056_s8 + $0x140] sm:$0xff]  ;;  %v2609_v62 = vld [vmem:[%s7056_s8 + $0x1d0] sm:$0xff] }
 0x80a   :  { %2811 = vmatpush.msrb.mxu1 %v2563_v22  ;;  %2934 = vmatpush.msrb.mxu0 %v2611_v35  ;;  %v2574_v22 = vld [vmem:[%s7056_s8 + $0xb8] sm:$0xff] }
 0x80b   :  { %2853 = vmatpush.msrb.mxu2 %v2578_v9  ;;  %2894 = vmatpush.msrb.mxu3 %v2594_v60  ;;  %v2590_v9 = vld [vmem:[%s7056_s8 + $0x138] sm:$0xff]  ;;  %v2608_v60 = vld [vmem:[%s7056_s8 + $0x1c8] sm:$0xff] }
 0x80c   :  { %2812 = vmatpush.msrb.mxu1 %v2562_v8  ;;  %2935 = vmatpush.msrb.mxu0 %v2610_v33  ;;  %v2573_v8 = vld [vmem:[%s7056_s8 + $0xb0] sm:$0xff] }
 0x80d   :  { %2854 = vmatpush.msrb.mxu2 %v2577_v53  ;;  %2895 = vmatpush.msrb.mxu3 %v2593_v24  ;;  %v2557_v33 = vld [vmem:[%s7056_s8 + $0x30] sm:$0xff] }
 0x80e   :  { %2813 = vmatpush.msrb.mxu1 %v2561_v20  ;;  %2936 = vmatpush.msrb.mxu0 %v2609_v62  ;;  %v2556_v62 = vld [vmem:[%s7056_s8 + $0x28] sm:$0xff] }
 0x80f   :  { %4068 = vmatmul.msk.f32.gmra.mxu1 %vm184_vm0, %v4984_v7  ;;  %4076 = vmatmul.msk.f32.gmra.mxu2 %vm184_vm0, %v4984_v7 }
 0x810   :  { %4084 = vmatmul.msk.f32.gmra.mxu3 %vm184_vm0, %v4984_v7  ;;  %4092 = vmatmul.msk.f32.gmra.mxu0 %vm184_vm0, %v4984_v7 }
 0x811   :  { %2855 = vmatpush.msrb.mxu2 %v2576_v12  ;;  %2896 = vmatpush.msrb.mxu3 %v2592_v51  ;;  %v2589_v12 = vld [vmem:[%s7056_s8 + $0x130] sm:$0xff]  ;;  %v2607_v51 = vld [vmem:[%s7056_s8 + $0x1c0] sm:$0xff] }
 0x812   :  { %2814 = vmatpush.msrb.mxu1 %v2560_v63  ;;  %2937 = vmatpush.msrb.mxu0 %v2608_v60  ;;  %v2572_v63 = vld [vmem:[%s7056_s8 + $0xa8] sm:$0xff]  ;;  %v2605_v60 = vld [vmem:[%s7056_s8 + $0x1b0] sm:$0xff] }
 0x813   :  { %2856 = vmatpush.msrb.mxu2 %v2575_v34  ;;  %2897 = vmatpush.msrb.mxu3 %v2591_v40  ;;  %v2588_v34 = vld [vmem:[%s7056_s8 + $0x128] sm:$0xff]  ;;  %v2606_v40 = vld [vmem:[%s7056_s8 + $0x1b8] sm:$0xff] }
 0x814   :  { %2815 = vmatpush.msrb.mxu1 %v2559_v13  ;;  %2938 = vmatpush.msrb.mxu0 %v2607_v51  ;;  %v2571_v13 = vld [vmem:[%s7056_s8 + $0xa0] sm:$0xff] }
 0x815   :  { %2857 = vmatpush.msrb.mxu2 %v2574_v22  ;;  %2898 = vmatpush.msrb.mxu3 %v2590_v9  ;;  %v2555_v51 = vld [vmem:[%s7056_s8 + $0x20] sm:$0xff] }
 0x816   :  { %2816 = vmatpush.msrb.mxu1 %v2558_v59  ;;  %2939 = vmatpush.msrb.mxu0 %v2606_v40  ;;  %v2554_v40 = vld [vmem:[%s7056_s8 + $0x18] sm:$0xff] }
 0x817   :  { %4069 = vmatmul.msk.f32.gmra.mxu1 %vm184_vm0, %v5010_v54  ;;  %4077 = vmatmul.msk.f32.gmra.mxu2 %vm184_vm0, %v5010_v54 }
 0x818   :  { %4085 = vmatmul.msk.f32.gmra.mxu3 %vm184_vm0, %v5010_v54  ;;  %4093 = vmatmul.msk.f32.gmra.mxu0 %vm184_vm0, %v5010_v54 }
 0x819   :  { %2858 = vmatpush.msrb.mxu2 %v2573_v8  ;;  %2899 = vmatpush.msrb.mxu3 %v2589_v12  ;;  %v2587_v12 = vld [vmem:[%s7056_s8 + $0x120] sm:$0xff] }
 0x81a   :  { %2817 = vmatpush.msrb.mxu1 %v2557_v33  ;;  %2940 = vmatpush.msrb.mxu0 %v2605_v60  ;;  %v2604_v33 = vld [vmem:[%s7056_s8 + $0x1a8] sm:$0xff] }
 0x81b   :  { %2859 = vmatpush.msrb.mxu2 %v2572_v63  ;;  %2900 = vmatpush.msrb.mxu3 %v2588_v34  ;;  %v2570_v63 = vld [vmem:[%s7056_s8 + $0x98] sm:$0xff] }
 0x81c   :  { %2818 = vmatpush.msrb.mxu1 %v2556_v62  ;;  %v2586_v34 = vld [vmem:[%s7056_s8 + $0x118] sm:$0xff]  ;;  %v2603_v62 = vld [vmem:[%s7056_s8 + $0x1a0] sm:$0xff]  ;;  %2941 = vmatpush.msrb.mxu0 %v2604_v33 }
 0x81d   :  { %2860 = vmatpush.msrb.mxu2 %v2571_v13  ;;  %2901 = vmatpush.msrb.mxu3 %v2587_v12  ;;  %v2569_v13 = vld [vmem:[%s7056_s8 + $0x90] sm:$0xff]  ;;  %v2602_v12 = vld [vmem:[%s7056_s8 + $0x198] sm:$0xff] }
 0x81e   :  { %2819 = vmatpush.msrb.mxu1 %v2555_v51  ;;  %v2553_v51 = vld [vmem:[%s7056_s8 + $0x10] sm:$0xff]  ;;  %2942 = vmatpush.msrb.mxu0 %v2603_v62  ;;  %v2567_v62 = vld [vmem:[%s7056_s8 + $0x80] sm:$0xff] }
 0x81f   :  { %4070 = vmatmul.msk.f32.gmra.mxu1 %vm184_vm0, %v5023_v49  ;;  %4078 = vmatmul.msk.f32.gmra.mxu2 %vm184_vm0, %v5023_v49 }
 0x820   :  { %4086 = vmatmul.msk.f32.gmra.mxu3 %vm184_vm0, %v5023_v49  ;;  %4094 = vmatmul.msk.f32.gmra.mxu0 %vm184_vm0, %v5023_v49 }
 0x821   :  { %2861 = vmatpush.msrb.mxu2 %v2570_v63  ;;  %2902 = vmatpush.msrb.mxu3 %v2586_v34  ;;  %v2568_v63 = vld [vmem:[%s7056_s8 + $0x88] sm:$0xff]  ;;  %v2601_v34 = vld [vmem:[%s7056_s8 + $0x190] sm:$0xff] }
 0x822   :  { %2820 = vmatpush.msrb.mxu1 %v2554_v40  ;;  %2943 = vmatpush.msrb.mxu0 %v2602_v12  ;;  %v2552_v40 = vld [vmem:[%s7056_s8 + $0x8] sm:$0xff]  ;;  %v2551_v12 = vld [vmem:[%s7056_s8] sm:$0xff] }
 0x823   :  { %2862 = vmatpush.msrb.mxu2 %v2569_v13  ;;  %v2600_v13 = vld [vmem:[%s7056_s8 + $0x188] sm:$0xff] }
 0x824   :  { %2821 = vmatpush.msrb.mxu1 %v2553_v51  ;;  %2944 = vmatpush.msrb.mxu0 %v2601_v34  ;;  %v2583_v51 = vld [vmem:[%s7056_s8 + $0x100] sm:$0xff] }
 0x825   :  { %2863 = vmatpush.msrb.mxu2 %v2568_v63 }
 0x826   :  { %2822 = vmatpush.msrb.mxu1 %v2552_v40  ;;  %2945 = vmatpush.msrb.mxu0 %v2600_v13  ;;  %v2646_v40 = vld [vmem:[%s7056_s8 + $0x2f8] sm:$0xff] }
 0x827   :  { %4071 = vmatmul.msk.f32.gmra.mxu1 %vm184_vm0, %v5036_v31  ;;  %4079 = vmatmul.msk.f32.gmra.mxu2 %vm184_vm0, %v5036_v31 }
 0x828   :  { %4087 = vmatmul.msk.f32.gmra.mxu3 %vm184_vm0, %v5036_v31  ;;  %4095 = vmatmul.msk.f32.gmra.mxu0 %vm184_vm0, %v5036_v31 }
 0x829   :  { %2864 = vmatpush.msrb.mxu2 %v2567_v62  ;;  %2823 = vmatpush.msrb.mxu1 %v2551_v12  ;;  %v2645_v62 = vld [vmem:[%s7056_s8 + $0x2f0] sm:$0xff] }
 0x82f   :  { %4072 = vmatmul.msk.f32.gmra.mxu1 %vm184_vm0, %v5049_v14  ;;  %4080 = vmatmul.msk.f32.gmra.mxu2 %vm184_vm0, %v5049_v14 }
 0x830   :  { %4088 = vmatmul.msk.f32.gmra.mxu3 %vm184_vm0, %v5049_v14  ;;  %4096 = vmatmul.msk.f32.gmra.mxu0 %vm184_vm0, %v5049_v14 }
 0x834   :  { %v5342_v52 = vpop.f32.mrf.mxu1 }
 0x835   :  { %v5344_v50 = vpop.f32.mrf.mxu0 }
 0x837   :  { %4073 = vmatmul.msk.f32.gmra.mxu1 %vm184_vm0, %v5087_v19  ;;  %4081 = vmatmul.msk.f32.gmra.mxu2 %vm184_vm0, %v5087_v19 }
 0x838   :  { %4089 = vmatmul.msk.f32.gmra.mxu3 %vm184_vm0, %v5087_v19  ;;  %4097 = vmatmul.msk.f32.gmra.mxu0 %vm184_vm0, %v5087_v19 }
 0x83a   :  { %v5378_v56 = vpop.f32.mrf.mxu2 }
 0x83b   :  { %v5380_v28 = vpop.f32.mrf.mxu3 }
 0x83c   :  { %v5382_v4 = vpop.f32.mrf.mxu1 }
 0x83d   :  { %v5384_v10 = vpop.f32.mrf.mxu0 }
 0x83f   :  { %4098 = vmatmul.msk.f32.vlgmr.msra.gmra.mxu1 %vm184_vm0, %v4956_v58  ;;  %4106 = vmatmul.msk.f32.vlgmr.msra.gmra.mxu2 %vm184_vm0, %v4956_v58 }
 0x840   :  { %4114 = vmatmul.msk.f32.vlgmr.msra.gmra.mxu3 %vm184_vm0, %v4956_v58  ;;  %4122 = vmatmul.msk.f32.vlgmr.msra.gmra.mxu0 %vm184_vm0, %v4956_v58 }
 0x841   :  { %3013 = vmatpush.msra.mxu2 %v2646_v40  ;;  %v2629_v40 = vld [vmem:[%s7056_s8 + $0x270] sm:$0xff] }
 0x842   :  { %v5418_v29 = vpop.f32.mrf.mxu2 }
 0x843   :  { %v5420_v44 = vpop.f32.mrf.mxu3  ;;  %3014 = vmatpush.msra.mxu2 %v2645_v62  ;;  %v2678_v62 = vld [vmem:[%s7056_s8 + $0x3f8] sm:$0xff] }
 0x844   :  { %v5422_v23 = vpop.f32.mrf.mxu1 }
 0x845   :  { %v5424_v26 = vpop.f32.mrf.mxu0 }
 0x847   :  { %4099 = vmatmul.msk.f32.gmra.mxu1 %vm184_vm0, %v4970_v25  ;;  %4107 = vmatmul.msk.f32.gmra.mxu2 %vm184_vm0, %v4970_v25 }
 0x848   :  { %4115 = vmatmul.msk.f32.gmra.mxu3 %vm184_vm0, %v4970_v25  ;;  %4123 = vmatmul.msk.f32.gmra.mxu0 %vm184_vm0, %v4970_v25 }
 0x84a   :  { %v5458_v53 = vpop.f32.mrf.mxu2 }
 0x84b   :  { %v5460_v24 = vpop.f32.mrf.mxu3 }
 0x84c   :  { %v5462_v35 = vpop.f32.mrf.mxu1 }
 0x84d   :  { %v5464_v20 = vpop.f32.mrf.mxu0 }
 0x84f   :  { %4100 = vmatmul.msk.f32.gmra.mxu1 %vm184_vm0, %v4984_v7  ;;  %4108 = vmatmul.msk.f32.gmra.mxu2 %vm184_vm0, %v4984_v7 }
 0x850   :  { %4116 = vmatmul.msk.f32.gmra.mxu3 %vm184_vm0, %v4984_v7  ;;  %4124 = vmatmul.msk.f32.gmra.mxu0 %vm184_vm0, %v4984_v7 }
 0x852   :  { %v5498_v22 = vpop.f32.mrf.mxu2 }
 0x853   :  { %v5500_v9 = vpop.f32.mrf.mxu3 }
 0x854   :  { %v5505_v59 = vpop.f32.mrf.mxu1 }
 0x855   :  { %7094 = vst [vmem:[#allocation11_spill] sm:$0xff] %v5505_v59  ;;  %v5507_v8 = vpop.f32.mrf.mxu0 }
 0x856   :  { %7095 = vst [vmem:[#allocation12_spill] sm:$0xff] %v5507_v8 }
 0x857   :  { %4101 = vmatmul.msk.f32.gmra.mxu1 %vm184_vm0, %v5010_v54  ;;  %4109 = vmatmul.msk.f32.gmra.mxu2 %vm184_vm0, %v5010_v54 }
 0x858   :  { %4117 = vmatmul.msk.f32.gmra.mxu3 %vm184_vm0, %v5010_v54  ;;  %4125 = vmatmul.msk.f32.gmra.mxu0 %vm184_vm0, %v5010_v54  ;;  %v2585_v54 = vld [vmem:[%s7056_s8 + $0x110] sm:$0xff] }
 0x859   :  { %2903 = vmatpush.msrb.mxu3 %v2585_v54  ;;  %v2584_v54 = vld [vmem:[%s7056_s8 + $0x108] sm:$0xff] }
 0x85a   :  { %v5541_v60 = vpop.f32.mrf.mxu2 }
 0x85b   :  { %7096 = vst [vmem:[#allocation13_spill] sm:$0xff] %v5541_v60  ;;  %v5543_v48 = vpop.f32.mrf.mxu3  ;;  %2904 = vmatpush.msrb.mxu3 %v2584_v54  ;;  %v2630_v54 = vld [vmem:[%s7056_s8 + $0x278] sm:$0xff] }
 0x85c   :  { %7097 = vst [vmem:[#allocation14_spill] sm:$0xff] %v5543_v48  ;;  %v5554_v7 = vpop.f32.mrf.mxu1  ;;  %2972 = vmatpush.msra.mxu1 %v2630_v54  ;;  %v2660_v54 = vld [vmem:[%s7056_s8 + $0x368] sm:$0xff] }
 0x85d   :  { %7098 = vst [vmem:[#allocation15_spill] sm:$0xff] %v5554_v7  ;;  %v5556_v33 = vpop.f32.mrf.mxu0  ;;  %2905 = vmatpush.msrb.mxu3 %v2583_v51 }
 0x85e   :  { %7099 = vst [vmem:[#allocation16_spill] sm:$0xff] %v5556_v33  ;;  %2973 = vmatpush.msra.mxu1 %v2629_v40 }
 0x85f   :  { %4102 = vmatmul.msk.f32.gmra.mxu1 %vm184_vm0, %v5023_v49  ;;  %4110 = vmatmul.msk.f32.gmra.mxu2 %vm184_vm0, %v5023_v49 }
 0x860   :  { %4118 = vmatmul.msk.f32.gmra.mxu3 %vm184_vm0, %v5023_v49  ;;  %4126 = vmatmul.msk.f32.gmra.mxu0 %vm184_vm0, %v5023_v49  ;;  %v2599_v49 = vld [vmem:[%s7056_s8 + $0x180] sm:$0xff] }
 0x861   :  { %2946 = vmatpush.msrb.mxu0 %v2599_v49  ;;  %v2662_v49 = vld [vmem:[%s7056_s8 + $0x378] sm:$0xff] }
 0x862   :  { %v5590_v63 = vpop.f32.mrf.mxu2  ;;  %3054 = vmatpush.msra.mxu3 %v2662_v49  ;;  %v2644_v49 = vld [vmem:[%s7056_s8 + $0x2e8] sm:$0xff] }
 0x863   :  { %7100 = vst [vmem:[#allocation17_spill] sm:$0xff] %v5590_v63  ;;  %v5595_v25 = vpop.f32.mrf.mxu3  ;;  %3015 = vmatpush.msra.mxu2 %v2644_v49  ;;  %3095 = vmatpush.msra.mxu0 %v2678_v62  ;;  %v2642_v62 = vld [vmem:[%s7056_s8 + $0x2d8] sm:$0xff]  ;;  %v2641_v63 = vld [vmem:[%s7056_s8 + $0x2d0] sm:$0xff] }
 0x864   :  { %7101 = vst [vmem:[#allocation18_spill] sm:$0xff] %v5595_v25  ;;  %v5597_v58 = vpop.f32.mrf.mxu1 }
 0x865   :  { %7102 = vst [vmem:[#allocation19_spill] sm:$0xff] %v5597_v58  ;;  %v5599_v34 = vpop.f32.mrf.mxu0 }
 0x866   :  { %7103 = vst [vmem:[#allocation20_spill] sm:$0xff] %v5599_v34  ;;  %v2661_v34 = vld [vmem:[%s7056_s8 + $0x370] sm:$0xff] }
 0x867   :  { %4103 = vmatmul.msk.f32.gmra.mxu1 %vm184_vm0, %v5036_v31  ;;  %4111 = vmatmul.msk.f32.gmra.mxu2 %vm184_vm0, %v5036_v31 }
 0x868   :  { %4119 = vmatmul.msk.f32.gmra.mxu3 %vm184_vm0, %v5036_v31  ;;  %4127 = vmatmul.msk.f32.gmra.mxu0 %vm184_vm0, %v5036_v31 }
 0x869   :  { %3055 = vmatpush.msra.mxu3 %v2661_v34 }
 0x86a   :  { %v5621_v13 = vpop.f32.mrf.mxu2 }
 0x86b   :  { %7104 = vst [vmem:[#allocation21_spill] sm:$0xff] %v5621_v13  ;;  %v5623_v12 = vpop.f32.mrf.mxu3  ;;  %3056 = vmatpush.msra.mxu3 %v2660_v54  ;;  %v2627_v54 = vld [vmem:[%s7056_s8 + $0x260] sm:$0xff] }
 0x86c   :  { %7105 = vst [vmem:[#allocation22_spill] sm:$0xff] %v5623_v12  ;;  %v5625_v51 = vpop.f32.mrf.mxu1 }
 0x86d   :  { %7106 = vst [vmem:[#allocation23_spill] sm:$0xff] %v5625_v51  ;;  %v5627_v31 = vpop.f32.mrf.mxu0  ;;  %v5661_v51 = vld [vmem:[%s7057_s9] sm:$0xff] }
 0x86e   :  { %7107 = vst [vmem:[#allocation24_spill] sm:$0xff] %v5627_v31  ;;  %v2643_v31 = vld [vmem:[%s7056_s8 + $0x2e0] sm:$0xff]  ;;  %v5670_v13 = vperm.slane %v5661_v51, 0  ;;  %v5673_v58 = vperm.slane %v5661_v51, 1  ;;  %v5678_v33 = vperm.slane %v5661_v51, 3  ;;  %v5681_v49 = vperm.slane %v5661_v51, 2 }
 0x86f   :  { %4104 = vmatmul.msk.f32.gmra.mxu1 %vm184_vm0, %v5049_v14  ;;  %4112 = vmatmul.msk.f32.gmra.mxu2 %vm184_vm0, %v5049_v14 }
 0x870   :  { %4120 = vmatmul.msk.f32.gmra.mxu3 %vm184_vm0, %v5049_v14  ;;  %4128 = vmatmul.msk.f32.gmra.mxu0 %vm184_vm0, %v5049_v14  ;;  %v2628_v14 = vld [vmem:[%s7056_s8 + $0x268] sm:$0xff] }
 0x871   :  { %2974 = vmatpush.msra.mxu1 %v2628_v14  ;;  %3016 = vmatpush.msra.mxu2 %v2643_v31  ;;  %v2659_v14 = vld [vmem:[%s7056_s8 + $0x360] sm:$0xff]  ;;  %v2677_v31 = vld [vmem:[%s7056_s8 + $0x3f0] sm:$0xff] }
 0x872   :  { %v5663_v12 = vpop.f32.mrf.mxu2  ;;  %3057 = vmatpush.msra.mxu3 %v2659_v14  ;;  %3096 = vmatpush.msra.mxu0 %v2677_v31 }
 0x873   :  { %7108 = vst [vmem:[#allocation25_spill] sm:$0xff] %v5663_v12  ;;  %v5665_v34 = vpop.f32.mrf.mxu3  ;;  %v2626_v12 = vld [vmem:[%s7056_s8 + $0x258] sm:$0xff]  ;;  %2975 = vmatpush.msra.mxu1 %v2627_v54  ;;  %3017 = vmatpush.msra.mxu2 %v2642_v62  ;;  %v2675_v54 = vld [vmem:[%s7056_s8 + $0x3e0] sm:$0xff] }
 0x874   :  { %7109 = vst [vmem:[#allocation26_spill] sm:$0xff] %v5665_v34  ;;  %v5667_v40 = vpop.f32.mrf.mxu1  ;;  %v1826_v34 = vadd.f32 %v5181_v41, %v5673_v58  ;;  %v1867_v41 = vadd.f32 %v5183_v57, %v5681_v49  ;;  %v2657_v57 = vld [vmem:[%s7056_s8 + $0x350] sm:$0xff] }
 0x875   :  { %7110 = vst [vmem:[#allocation27_spill] sm:$0xff] %v5667_v40  ;;  %v5675_v25 = vpop.f32.mrf.mxu0  ;;  %v1785_v40 = vadd.f32 %v5173_v55, %v5670_v13  ;;  %v1908_v55 = vadd.f32 %v5179_v42, %v5678_v33  ;;  %2976 = vmatpush.msra.mxu1 %v2626_v12  ;;  %3018 = vmatpush.msra.mxu2 %v2641_v63  ;;  %v2656_v63 = vld [vmem:[%s7056_s8 + $0x348] sm:$0xff] }
 0x876   :  { %7111 = vst [vmem:[#allocation28_spill] sm:$0xff] %v5675_v25  ;;  %v2658_v25 = vld [vmem:[%s7056_s8 + $0x358] sm:$0xff]  ;;  %v2424_v8 = vmax.f32 %v1826_v34, 0.0  ;;  %v2425_v59 = vmax.f32 %v1867_v41, 0.0  ;;  %v1788_v12 = vadd.f32 %v5193_v5, %v5670_v13  ;;  %v2639_v34 = vld [vmem:[%s7056_s8 + $0x2c0] sm:$0xff]  ;;  %v1911_v5 = vadd.f32 %v5195_v16, %v5678_v33 }
 0x877   :  { %4105 = vmatmul.msk.f32.gmra.mxu1 %vm184_vm0, %v5087_v19  ;;  %4113 = vmatmul.msk.f32.gmra.mxu2 %vm184_vm0, %v5087_v19  ;;  %v2423_v48 = vmax.f32 %v1785_v40, 0.0  ;;  %v2426_v42 = vmax.f32 %v1908_v55, 0.0 }
 0x878   :  { %4121 = vmatmul.msk.f32.gmra.mxu3 %vm184_vm0, %v5087_v19  ;;  %4129 = vmatmul.msk.f32.gmra.mxu0 %vm184_vm0, %v5087_v19  ;;  %v2676_v19 = vld [vmem:[%s7056_s8 + $0x3e8] sm:$0xff]  ;;  %v2439_v41 = vmax.f32 %v1788_v12, 0.0  ;;  %v2442_v16 = vmax.f32 %v1911_v5, 0.0  ;;  %v2654_v12 = vld [vmem:[%s7056_s8 + $0x338] sm:$0xff]  ;;  %v2637_v5 = vld [vmem:[%s7056_s8 + $0x2b0] sm:$0xff] }
 0x879   :  { %3058 = vmatpush.msra.mxu3 %v2658_v25  ;;  %3097 = vmatpush.msra.mxu0 %v2676_v19  ;;  %v2625_v25 = vld [vmem:[%s7056_s8 + $0x250] sm:$0xff]  ;;  %v2640_v19 = vld [vmem:[%s7056_s8 + $0x2c8] sm:$0xff] }
 0x87a   :  { %v5723_v14 = vpop.f32.mrf.mxu2  ;;  %2977 = vmatpush.msra.mxu1 %v2625_v25  ;;  %3019 = vmatpush.msra.mxu2 %v2640_v19  ;;  %v2673_v25 = vld [vmem:[%s7056_s8 + $0x3d0] sm:$0xff]  ;;  %v2623_v19 = vld [vmem:[%s7056_s8 + $0x240] sm:$0xff] }
 0x87b   :  { %v5725_v31 = vpop.f32.mrf.mxu3  ;;  %3059 = vmatpush.msra.mxu3 %v2657_v57  ;;  %3098 = vmatpush.msra.mxu0 %v2675_v54 }
 0x87c   :  { %v5727_v7 = vpop.f32.mrf.mxu1  ;;  %3020 = vmatpush.msra.mxu2 %v2639_v34  ;;  %v2622_v34 = vld [vmem:[%s7056_s8 + $0x238] sm:$0xff] }
 0x87d   :  { %v5729_v60 = vpop.f32.mrf.mxu0  ;;  %3060 = vmatpush.msra.mxu3 %v2656_v63  ;;  %v2638_v63 = vld [vmem:[%s7056_s8 + $0x2b8] sm:$0xff] }
 0x87e   :  { %3021 = vmatpush.msra.mxu2 %v2638_v63  ;;  %v2621_v63 = vld [vmem:[%s7056_s8 + $0x230] sm:$0xff] }
 0x87f   :  { %2824 = vmatmul.f32.vlgmr.msrb.gmra.mxu1 %v2423_v48  ;;  %2865 = vmatmul.f32.vlgmr.msrb.gmra.mxu2 %v2424_v8  ;;  %v1829_v48 = vadd.f32 %v5201_v0, %v5673_v58  ;;  %v2624_v8 = vld [vmem:[%s7056_s8 + $0x248] sm:$0xff]  ;;  %v1870_v0 = vadd.f32 %v5213_v27, %v5681_v49  ;;  %v2655_v27 = vld [vmem:[%s7056_s8 + $0x340] sm:$0xff] }
 0x880   :  { %2906 = vmatmul.f32.vlgmr.msrb.gmra.mxu3 %v2425_v59  ;;  %2947 = vmatmul.f32.vlgmr.msrb.gmra.mxu0 %v2426_v42  ;;  %v2674_v59 = vld [vmem:[%s7056_s8 + $0x3d8] sm:$0xff] }
 0x881   :  { %3099 = vmatpush.msra.mxu0 %v2674_v59  ;;  %2978 = vmatpush.msra.mxu1 %v2624_v8  ;;  %v2440_v42 = vmax.f32 %v1829_v48, 0.0  ;;  %v2441_v54 = vmax.f32 %v1870_v0, 0.0  ;;  %v1791_v48 = vadd.f32 %v5215_v15, %v5670_v13  ;;  %v1832_v59 = vadd.f32 %v5233_v6, %v5673_v58  ;;  %v2672_v8 = vld [vmem:[%s7056_s8 + $0x3c8] sm:$0xff] }
 0x882   :  { %v5763_v40 = vpop.f32.mrf.mxu2  ;;  %3061 = vmatpush.msra.mxu3 %v2655_v27  ;;  %v1914_v15 = vadd.f32 %v5217_v17, %v5678_v33  ;;  %v1873_v6 = vadd.f32 %v5235_v1, %v5681_v49  ;;  %3022 = vmatpush.msra.mxu2 %v2637_v5  ;;  %v2653_v1 = vld [vmem:[%s7056_s8 + $0x330] sm:$0xff]  ;;  %v2620_v5 = vld [vmem:[%s7056_s8 + $0x228] sm:$0xff] }
 0x883   :  { %v5765_v62 = vpop.f32.mrf.mxu3  ;;  %3100 = vmatpush.msra.mxu0 %v2673_v25  ;;  %2979 = vmatpush.msra.mxu1 %v2623_v19  ;;  %v2671_v19 = vld [vmem:[%s7056_s8 + $0x3c0] sm:$0xff] }
 0x884   :  { %v5767_v55 = vpop.f32.mrf.mxu1  ;;  %3062 = vmatpush.msra.mxu3 %v2654_v12  ;;  %v2458_v17 = vmax.f32 %v1914_v15, 0.0  ;;  %v2457_v25 = vmax.f32 %v1873_v6, 0.0  ;;  %v2636_v12 = vld [vmem:[%s7056_s8 + $0x2a8] sm:$0xff]  ;;  %v2635_v15 = vld [vmem:[%s7056_s8 + $0x2a0] sm:$0xff] }
 0x885   :  { %v5769_v57 = vpop.f32.mrf.mxu0  ;;  %3101 = vmatpush.msra.mxu0 %v2672_v8  ;;  %2980 = vmatpush.msra.mxu1 %v2622_v34  ;;  %v1835_v8 = vadd.f32 %v5249_v46, %v5673_v58  ;;  %v2670_v34 = vld [vmem:[%s7056_s8 + $0x3b8] sm:$0xff]  ;;  %v1876_v46 = vadd.f32 %v5251_v37, %v5681_v49 }
 0x886   :  { %3063 = vmatpush.msra.mxu3 %v2653_v1  ;;  %3023 = vmatpush.msra.mxu2 %v2636_v12  ;;  %v2619_v12 = vld [vmem:[%s7056_s8 + $0x220] sm:$0xff] }
 0x887   :  { %2827 = vmatmul.f32.gmra.mxu1 %v2439_v41  ;;  %2868 = vmatmul.f32.gmra.mxu2 %v2440_v42 }
 0x888   :  { %2909 = vmatmul.f32.gmra.mxu3 %v2441_v54  ;;  %2950 = vmatmul.f32.gmra.mxu0 %v2442_v16  ;;  %v2455_v16 = vmax.f32 %v1791_v48, 0.0  ;;  %v2456_v54 = vmax.f32 %v1832_v59, 0.0  ;;  %v2652_v48 = vld [vmem:[%s7056_s8 + $0x328] sm:$0xff]  ;;  %v1794_v59 = vadd.f32 %v5237_v32, %v5670_v13  ;;  %v1917_v32 = vadd.f32 %v5239_v39, %v5678_v33 }
 0x889   :  { %3102 = vmatpush.msra.mxu0 %v2671_v19  ;;  %2981 = vmatpush.msra.mxu1 %v2621_v63  ;;  %v2473_v19 = vmax.f32 %v1876_v46, 0.0  ;;  %v2651_v63 = vld [vmem:[%s7056_s8 + $0x320] sm:$0xff]  ;;  %v2633_v46 = vld [vmem:[%s7056_s8 + $0x290] sm:$0xff] }
 0x88a   :  { %v5803_v0 = vpop.f32.mrf.mxu2  ;;  %3064 = vmatpush.msra.mxu3 %v2652_v48  ;;  %3024 = vmatpush.msra.mxu2 %v2635_v15  ;;  %v2471_v39 = vmax.f32 %v1794_v59, 0.0  ;;  %v2474_v37 = vmax.f32 %v1917_v32, 0.0  ;;  %v2668_v48 = vld [vmem:[%s7056_s8 + $0x3a8] sm:$0xff]  ;;  %v2634_v59 = vld [vmem:[%s7056_s8 + $0x298] sm:$0xff]  ;;  %v1838_v15 = vadd.f32 %v5265_v2, %v5673_v58  ;;  %v2667_v32 = vld [vmem:[%s7056_s8 + $0x3a0] sm:$0xff] }
 0x88b   :  { %v5805_v41 = vpop.f32.mrf.mxu3  ;;  %3103 = vmatpush.msra.mxu0 %v2670_v34  ;;  %2982 = vmatpush.msra.mxu1 %v2620_v5  ;;  %v2618_v34 = vld [vmem:[%s7056_s8 + $0x218] sm:$0xff]  ;;  %v1797_v5 = vadd.f32 %v5257_v43, %v5670_v13 }
 0x88c   :  { %v5807_v42 = vpop.f32.mrf.mxu1  ;;  %3065 = vmatpush.msra.mxu3 %v2651_v63  ;;  %3025 = vmatpush.msra.mxu2 %v2634_v59  ;;  %v2488_v63 = vmax.f32 %v1838_v15, 0.0  ;;  %v2648_v15 = vld [vmem:[%s7056_s8 + $0x308] sm:$0xff] }
 0x88d   :  { %v5809_v27 = vpop.f32.mrf.mxu0  ;;  %2983 = vmatpush.msra.mxu1 %v2619_v12 }
 0x88e   :  { %3026 = vmatpush.msra.mxu2 %v2633_v46  ;;  %v2664_v46 = vld [vmem:[%s7056_s8 + $0x388] sm:$0xff] }
 0x88f   :  { %2830 = vmatmul.f32.gmra.mxu1 %v2455_v16  ;;  %2871 = vmatmul.f32.gmra.mxu2 %v2456_v54  ;;  %v2669_v54 = vld [vmem:[%s7056_s8 + $0x3b0] sm:$0xff] }
 0x890   :  { %2912 = vmatmul.f32.gmra.mxu3 %v2457_v25  ;;  %2953 = vmatmul.f32.gmra.mxu0 %v2458_v17  ;;  %v2472_v25 = vmax.f32 %v1835_v8, 0.0  ;;  %v2650_v8 = vld [vmem:[%s7056_s8 + $0x318] sm:$0xff] }
 0x891   :  { %3104 = vmatpush.msra.mxu0 %v2669_v54  ;;  %v1920_v54 = vadd.f32 %v5263_v45, %v5678_v33  ;;  %3066 = vmatpush.msra.mxu3 %v2650_v8  ;;  %v2649_v45 = vld [vmem:[%s7056_s8 + $0x310] sm:$0xff] }
 0x892   :  { %v5843_v6 = vpop.f32.mrf.mxu2  ;;  %2984 = vmatpush.msra.mxu1 %v2618_v34  ;;  %v2665_v34 = vld [vmem:[%s7056_s8 + $0x390] sm:$0xff] }
 0x893   :  { %v5845_v16 = vpop.f32.mrf.mxu3  ;;  %3105 = vmatpush.msra.mxu0 %v2668_v48  ;;  %3067 = vmatpush.msra.mxu3 %v2649_v45  ;;  %v2632_v48 = vld [vmem:[%s7056_s8 + $0x288] sm:$0xff]  ;;  %v2490_v59 = vmax.f32 %v1920_v54, 0.0  ;;  %v2615_v54 = vld [vmem:[%s7056_s8 + $0x200] sm:$0xff]  ;;  %v1923_v45 = vadd.f32 %v5279_v11, %v5678_v33 }
 0x894   :  { %v5850_v17 = vpop.f32.mrf.mxu1  ;;  %3027 = vmatpush.msra.mxu2 %v2632_v48 }
 0x895   :  { %v5852_v1 = vpop.f32.mrf.mxu0  ;;  %3106 = vmatpush.msra.mxu0 %v2667_v32  ;;  %v2631_v32 = vld [vmem:[%s7056_s8 + $0x280] sm:$0xff]  ;;  %3068 = vmatpush.msra.mxu3 %v2648_v15  ;;  %v2726_v15 = vld [vmem:[%s7056_s8 + $0x578] sm:$0xff] }
 0x896   :  { %3028 = vmatpush.msra.mxu2 %v2631_v32  ;;  %v2694_v32 = vld [vmem:[%s7056_s8 + $0x478] sm:$0xff] }
 0x897   :  { %2833 = vmatmul.f32.gmra.mxu1 %v2471_v39  ;;  %2874 = vmatmul.f32.gmra.mxu2 %v2472_v25  ;;  %v1879_v39 = vadd.f32 %v5267_v21, %v5681_v49  ;;  %v2666_v25 = vld [vmem:[%s7056_s8 + $0x398] sm:$0xff] }
 0x898   :  { %2915 = vmatmul.f32.gmra.mxu3 %v2473_v19  ;;  %2956 = vmatmul.f32.gmra.mxu0 %v2474_v37  ;;  %v2617_v37 = vld [vmem:[%s7056_s8 + $0x210] sm:$0xff]  ;;  %v2487_v19 = vmax.f32 %v1797_v5, 0.0  ;;  %v2616_v5 = vld [vmem:[%s7056_s8 + $0x208] sm:$0xff] }
 0x899   :  { %2985 = vmatpush.msra.mxu1 %v2617_v37  ;;  %v2489_v8 = vmax.f32 %v1879_v39, 0.0  ;;  %3107 = vmatpush.msra.mxu0 %v2666_v25  ;;  %v1800_v39 = vadd.f32 %v5277_v3, %v5670_v13  ;;  %v1841_v25 = vadd.f32 %v5285_v47, %v5673_v58  ;;  %v2647_v37 = vld [vmem:[%s7056_s8 + $0x300] sm:$0xff] }
 0x89a   :  { %v5886_v43 = vpop.f32.mrf.mxu2  ;;  %v2663_v3 = vld [vmem:[%s7056_s8 + $0x380] sm:$0xff]  ;;  %3069 = vmatpush.msra.mxu3 %v2647_v37  ;;  %v1885_v37 = vadd.f32 %v5340_v61, %v5681_v49  ;;  %v2693_v61 = vld [vmem:[%s7056_s8 + $0x470] sm:$0xff] }
 0x89b   :  { %v5888_v2 = vpop.f32.mrf.mxu3  ;;  %3108 = vmatpush.msra.mxu0 %v2665_v34  ;;  %2986 = vmatpush.msra.mxu1 %v2616_v5  ;;  %v2504_v11 = vmax.f32 %v1841_v25, 0.0  ;;  %v2710_v5 = vld [vmem:[%s7056_s8 + $0x4f8] sm:$0xff]  ;;  %v1926_v25 = vadd.f32 %v5307_v18, %v5678_v33  ;;  %v2725_v18 = vld [vmem:[%s7056_s8 + $0x570] sm:$0xff] }
 0x89c   :  { %v5899_v21 = vpop.f32.mrf.mxu1  ;;  %3177 = vmatpush.msrb.mxu2 %v2710_v5  ;;  %3218 = vmatpush.msrb.mxu3 %v2726_v15  ;;  %v2724_v5 = vld [vmem:[%s7056_s8 + $0x568] sm:$0xff]  ;;  %v1806_v15 = vadd.f32 %v5342_v52, %v5670_v13  ;;  %v1929_v52 = vadd.f32 %v5344_v50, %v5678_v33  ;;  %v6013_v50 = vperm.slane %v5661_v51, 5 }
 0x89d   :  { %v5901_v12 = vpop.f32.mrf.mxu0  ;;  %3109 = vmatpush.msra.mxu0 %v2664_v46  ;;  %2987 = vmatpush.msra.mxu1 %v2615_v54  ;;  %v1803_v46 = vadd.f32 %v5305_v36, %v5670_v13  ;;  %v1844_v54 = vadd.f32 %v5338_v38, %v5673_v58 }
 0x89e   :  { %3219 = vmatpush.msrb.mxu3 %v2725_v18  ;;  %v2538_v33 = vmax.f32 %v1929_v52, 0.0  ;;  %v2723_v18 = vld [vmem:[%s7056_s8 + $0x560] sm:$0xff] }
 0x89f   :  { %2836 = vmatmul.f32.gmra.mxu1 %v2487_v19  ;;  %2877 = vmatmul.f32.gmra.mxu2 %v2488_v63  ;;  %v1882_v19 = vadd.f32 %v5300_v30, %v5681_v49  ;;  %v2506_v30 = vmax.f32 %v1923_v45, 0.0  ;;  %v2519_v38 = vmax.f32 %v1803_v46, 0.0  ;;  %v2742_v46 = vld [vmem:[%s7056_s8 + $0x5f8] sm:$0xff] }
 0x8a0   :  { %2918 = vmatmul.f32.gmra.mxu3 %v2489_v8  ;;  %2959 = vmatmul.f32.gmra.mxu0 %v2490_v59  ;;  %v2503_v59 = vmax.f32 %v1800_v39, 0.0  ;;  %v2709_v39 = vld [vmem:[%s7056_s8 + $0x4f0] sm:$0xff] }
 0x8a1   :  { %3110 = vmatpush.msra.mxu0 %v2663_v3  ;;  %v2505_v34 = vmax.f32 %v1882_v19, 0.0  ;;  %3136 = vmatpush.msrb.mxu1 %v2694_v32  ;;  %v2520_v3 = vmax.f32 %v1844_v54, 0.0  ;;  %v1847_v32 = vadd.f32 %v5378_v56, %v5673_v58  ;;  %v2692_v54 = vld [vmem:[%s7056_s8 + $0x468] sm:$0xff]  ;;  %v1888_v58 = vadd.f32 %v5380_v28, %v5681_v49 }
 0x8a2   :  { %v5935_v63 = vpop.f32.mrf.mxu2  ;;  %3178 = vmatpush.msrb.mxu2 %v2709_v39  ;;  %v2707_v39 = vld [vmem:[%s7056_s8 + $0x4e0] sm:$0xff]  ;;  %3220 = vmatpush.msrb.mxu3 %v2724_v5  ;;  %v2722_v5 = vld [vmem:[%s7056_s8 + $0x558] sm:$0xff] }
 0x8a3   :  { %v5940_v47 = vpop.f32.mrf.mxu3  ;;  %3137 = vmatpush.msrb.mxu1 %v2693_v61  ;;  %3259 = vmatpush.msrb.mxu0 %v2742_v46  ;;  %v2537_v49 = vmax.f32 %v1888_v58, 0.0  ;;  %v2741_v61 = vld [vmem:[%s7056_s8 + $0x5f0] sm:$0xff]  ;;  %v2740_v46 = vld [vmem:[%s7056_s8 + $0x5e8] sm:$0xff] }
 0x8a4   :  { %v5942_v48 = vpop.f32.mrf.mxu1  ;;  %3221 = vmatpush.msrb.mxu3 %v2723_v18 }
 0x8a5   :  { %v5944_v8 = vpop.f32.mrf.mxu0  ;;  %3138 = vmatpush.msrb.mxu1 %v2692_v54  ;;  %3260 = vmatpush.msrb.mxu0 %v2741_v61  ;;  %v2690_v54 = vld [vmem:[%s7056_s8 + $0x458] sm:$0xff]  ;;  %v2739_v61 = vld [vmem:[%s7056_s8 + $0x5e0] sm:$0xff] }
 0x8a6   :  { %3222 = vmatpush.msrb.mxu3 %v2722_v5  ;;  %v2720_v5 = vld [vmem:[%s7056_s8 + $0x548] sm:$0xff] }
 0x8a7   :  { %2839 = vmatmul.f32.gmra.mxu1 %v2503_v59  ;;  %2880 = vmatmul.f32.gmra.mxu2 %v2504_v11  ;;  %v2522_v11 = vmax.f32 %v1926_v25, 0.0 }
 0x8a8   :  { %2921 = vmatmul.f32.gmra.mxu3 %v2505_v34  ;;  %2962 = vmatmul.f32.gmra.mxu0 %v2506_v30  ;;  %v2521_v30 = vmax.f32 %v1885_v37, 0.0  ;;  %v2708_v34 = vld [vmem:[%s7056_s8 + $0x4e8] sm:$0xff]  ;;  %v2535_v37 = vmax.f32 %v1806_v15, 0.0 }
 0x8a9   :  { %3179 = vmatpush.msrb.mxu2 %v2708_v34  ;;  %v2691_v34 = vld [vmem:[%s7056_s8 + $0x460] sm:$0xff]  ;;  %3261 = vmatpush.msrb.mxu0 %v2740_v46  ;;  %v2738_v46 = vld [vmem:[%s7056_s8 + $0x5d8] sm:$0xff] }
 0x8aa   :  { %v5966_v45 = vpop.f32.mrf.mxu2  ;;  %3139 = vmatpush.msrb.mxu1 %v2691_v34  ;;  %v2689_v34 = vld [vmem:[%s7056_s8 + $0x450] sm:$0xff] }
 0x8ab   :  { %v5968_v19 = vpop.f32.mrf.mxu3  ;;  %3180 = vmatpush.msrb.mxu2 %v2707_v39  ;;  %v2705_v39 = vld [vmem:[%s7056_s8 + $0x4d0] sm:$0xff]  ;;  %3262 = vmatpush.msrb.mxu0 %v2739_v61 }
 0x8ac   :  { %v5970_v36 = vpop.f32.mrf.mxu1  ;;  %3140 = vmatpush.msrb.mxu1 %v2690_v54  ;;  %v2688_v54 = vld [vmem:[%s7056_s8 + $0x448] sm:$0xff]  ;;  %v2737_v61 = vld [vmem:[%s7056_s8 + $0x5d0] sm:$0xff] }
 0x8ad   :  { %v5972_v59 = vpop.f32.mrf.mxu0  ;;  %3263 = vmatpush.msrb.mxu0 %v2738_v46  ;;  %v2736_v46 = vld [vmem:[%s7056_s8 + $0x5c8] sm:$0xff] }
 0x8ae   :  { %3141 = vmatpush.msrb.mxu1 %v2689_v34  ;;  %v2687_v34 = vld [vmem:[%s7056_s8 + $0x440] sm:$0xff] }
 0x8af   :  { %2842 = vmatmul.f32.gmra.mxu1 %v2519_v38  ;;  %2883 = vmatmul.f32.gmra.mxu2 %v2520_v3  ;;  %v2536_v38 = vmax.f32 %v1847_v32, 0.0  ;;  %v6010_v3 = vperm.slane %v5661_v51, 4  ;;  %v1990_v32 = vadd.f32 %v5418_v29, %v6013_v50 }
 0x8b0   :  { %2924 = vmatmul.f32.gmra.mxu3 %v2521_v30  ;;  %2965 = vmatmul.f32.gmra.mxu0 %v2522_v11  ;;  %v6018_v11 = vperm.slane %v5661_v51, 7  ;;  %v6021_v30 = vperm.slane %v5661_v51, 6  ;;  %v2706_v51 = vld [vmem:[%s7056_s8 + $0x4d8] sm:$0xff] }
 0x8b1   :  { %v1949_v15 = vadd.f32 %v5382_v4, %v6010_v3  ;;  %3181 = vmatpush.msrb.mxu2 %v2706_v51  ;;  %v2704_v51 = vld [vmem:[%s7056_s8 + $0x4c8] sm:$0xff]  ;;  %3142 = vmatpush.msrb.mxu1 %v2688_v54  ;;  %v2686_v54 = vld [vmem:[%s7056_s8 + $0x438] sm:$0xff] }
 0x8b2   :  { %v6003_v56 = vpop.f32.mrf.mxu2  ;;  %v2072_v4 = vadd.f32 %v5384_v10, %v6018_v11  ;;  %v2031_v29 = vadd.f32 %v5420_v44, %v6021_v30  ;;  %v2721_v44 = vld [vmem:[%s7056_s8 + $0x550] sm:$0xff]  ;;  %3264 = vmatpush.msrb.mxu0 %v2737_v61  ;;  %v2735_v61 = vld [vmem:[%s7056_s8 + $0x5c0] sm:$0xff] }
 0x8b3   :  { %v6005_v13 = vpop.f32.mrf.mxu3  ;;  %3182 = vmatpush.msrb.mxu2 %v2705_v39  ;;  %3223 = vmatpush.msrb.mxu3 %v2721_v44  ;;  %v2703_v39 = vld [vmem:[%s7056_s8 + $0x4c0] sm:$0xff] }
 0x8b4   :  { %v6007_v25 = vpop.f32.mrf.mxu1  ;;  %v2430_v10 = vmax.f32 %v2072_v4, 0.0  ;;  %v2429_v18 = vmax.f32 %v2031_v29, 0.0  ;;  %3143 = vmatpush.msrb.mxu1 %v2687_v34  ;;  %3265 = vmatpush.msrb.mxu0 %v2736_v46  ;;  %v2685_v34 = vld [vmem:[%s7056_s8 + $0x430] sm:$0xff]  ;;  %v7115_v46 = vld [vmem:[#allocation13_spill] sm:$0xff] }
 0x8b5   :  { %v6015_v28 = vpop.f32.mrf.mxu0  ;;  %3183 = vmatpush.msrb.mxu2 %v2704_v51  ;;  %3224 = vmatpush.msrb.mxu3 %v2720_v5  ;;  %v2702_v51 = vld [vmem:[%s7056_s8 + $0x4b8] sm:$0xff] }
 0x8b6   :  { %v2718_v5 = vld [vmem:[%s7056_s8 + $0x538] sm:$0xff]  ;;  %3144 = vmatpush.msrb.mxu1 %v2686_v54  ;;  %v1999_v54 = vadd.f32 %v7115_v46, %v6013_v50  ;;  %3266 = vmatpush.msrb.mxu0 %v2735_v61 }
 0x8b7   :  { %2845 = vmatmul.f32.gmra.mxu1 %v2535_v37  ;;  %2886 = vmatmul.f32.gmra.mxu2 %v2536_v38  ;;  %v2427_v38 = vmax.f32 %v1949_v15, 0.0  ;;  %v1952_v15 = vadd.f32 %v5422_v23, %v6010_v3  ;;  %v2075_v23 = vadd.f32 %v5424_v26, %v6018_v11 }
 0x8b8   :  { %2927 = vmatmul.f32.gmra.mxu3 %v2537_v49  ;;  %2968 = vmatmul.f32.gmra.mxu0 %v2538_v33  ;;  %v2428_v33 = vmax.f32 %v1990_v32, 0.0  ;;  %v1993_v32 = vadd.f32 %v5458_v53, %v6013_v50  ;;  %v2034_v53 = vadd.f32 %v5460_v24, %v6021_v30  ;;  %v2719_v24 = vld [vmem:[%s7056_s8 + $0x540] sm:$0xff] }
 0x8b9   :  { %3184 = vmatpush.msrb.mxu2 %v2703_v39  ;;  %v2446_v26 = vmax.f32 %v2075_v23, 0.0  ;;  %3225 = vmatpush.msrb.mxu3 %v2719_v24  ;;  %v2701_v39 = vld [vmem:[%s7056_s8 + $0x4b0] sm:$0xff] }
 0x8ba   :  { %v6055_v52 = vpop.f32.mrf.mxu2  ;;  %v2445_v44 = vmax.f32 %v2034_v53, 0.0  ;;  %3145 = vmatpush.msrb.mxu1 %v2685_v34 }
 0x8bb   :  { %v6057_v58 = vpop.f32.mrf.mxu3  ;;  %3185 = vmatpush.msrb.mxu2 %v2702_v51  ;;  %3226 = vmatpush.msrb.mxu3 %v2718_v5  ;;  %v2700_v51 = vld [vmem:[%s7056_s8 + $0x4a8] sm:$0xff] }
 0x8bc   :  { %v6059_v37 = vpop.f32.mrf.mxu1  ;;  %v2716_v5 = vld [vmem:[%s7056_s8 + $0x528] sm:$0xff] }
 0x8bd   :  { %v6061_v49 = vpop.f32.mrf.mxu0  ;;  %3186 = vmatpush.msrb.mxu2 %v2701_v39  ;;  %v2734_v39 = vld [vmem:[%s7056_s8 + $0x5b8] sm:$0xff] }
 0x8be   :  { %3267 = vmatpush.msrb.mxu0 %v2734_v39  ;;  %v2714_v39 = vld [vmem:[%s7056_s8 + $0x518] sm:$0xff] }
 0x8bf   :  { %2988 = vmatmul.f32.vlgmr.msra.gmra.mxu1 %v2427_v38  ;;  %3029 = vmatmul.f32.vlgmr.msra.gmra.mxu2 %v2428_v33  ;;  %v2443_v33 = vmax.f32 %v1952_v15, 0.0  ;;  %v1955_v15 = vadd.f32 %v5462_v35, %v6010_v3  ;;  %v2078_v35 = vadd.f32 %v5464_v20, %v6018_v11 }
 0x8c0   :  { %3070 = vmatmul.f32.vlgmr.msra.gmra.mxu3 %v2429_v18  ;;  %3111 = vmatmul.f32.vlgmr.msra.gmra.mxu0 %v2430_v10  ;;  %v2444_v10 = vmax.f32 %v1993_v32, 0.0  ;;  %v1996_v32 = vadd.f32 %v5498_v22, %v6013_v50  ;;  %v2037_v22 = vadd.f32 %v5500_v9, %v6021_v30  ;;  %v2717_v9 = vld [vmem:[%s7056_s8 + $0x530] sm:$0xff] }
 0x8c1   :  { %v2462_v20 = vmax.f32 %v2078_v35, 0.0  ;;  %3227 = vmatpush.msrb.mxu3 %v2717_v9  ;;  %v2684_v35 = vld [vmem:[%s7056_s8 + $0x428] sm:$0xff]  ;;  %3187 = vmatpush.msrb.mxu2 %v2700_v51  ;;  %v2715_v51 = vld [vmem:[%s7056_s8 + $0x520] sm:$0xff] }
 0x8c2   :  { %v6095_v4 = vpop.f32.mrf.mxu2  ;;  %v2461_v24 = vmax.f32 %v2037_v22, 0.0  ;;  %v2699_v22 = vld [vmem:[%s7056_s8 + $0x4a0] sm:$0xff]  ;;  %3146 = vmatpush.msrb.mxu1 %v2684_v35  ;;  %v7121_v35 = vld [vmem:[#allocation15_spill] sm:$0xff] }
 0x8c3   :  { %v6097_v29 = vpop.f32.mrf.mxu3  ;;  %3228 = vmatpush.msrb.mxu3 %v2716_v5  ;;  %3188 = vmatpush.msrb.mxu2 %v2699_v22  ;;  %v2683_v5 = vld [vmem:[%s7056_s8 + $0x420] sm:$0xff]  ;;  %v1961_v22 = vadd.f32 %v7121_v35, %v6010_v3 }
 0x8c4   :  { %v6099_v38 = vpop.f32.mrf.mxu1  ;;  %3147 = vmatpush.msrb.mxu1 %v2683_v5  ;;  %v2730_v5 = vld [vmem:[%s7056_s8 + $0x598] sm:$0xff] }
 0x8c5   :  { %v6101_v18 = vpop.f32.mrf.mxu0  ;;  %3229 = vmatpush.msrb.mxu3 %v2715_v51 }
 0x8c7   :  { %2991 = vmatmul.f32.gmra.mxu1 %v2443_v33  ;;  %3032 = vmatmul.f32.gmra.mxu2 %v2444_v10  ;;  %v2459_v10 = vmax.f32 %v1955_v15, 0.0  ;;  %v7114_v15 = vld [vmem:[#allocation11_spill] sm:$0xff] }
 0x8c8   :  { %3073 = vmatmul.f32.gmra.mxu3 %v2445_v44  ;;  %3114 = vmatmul.f32.gmra.mxu0 %v2446_v26  ;;  %v2460_v26 = vmax.f32 %v1996_v32, 0.0  ;;  %v1958_v32 = vadd.f32 %v7114_v15, %v6010_v3  ;;  %v2733_v15 = vld [vmem:[%s7056_s8 + $0x5b0] sm:$0xff] }
 0x8c9   :  { %3268 = vmatpush.msrb.mxu0 %v2733_v15  ;;  %v2731_v15 = vld [vmem:[%s7056_s8 + $0x5a0] sm:$0xff]  ;;  %3230 = vmatpush.msrb.mxu3 %v2714_v39 }
 0x8ca   :  { %v6135_v23 = vpop.f32.mrf.mxu2 }
 0x8cb   :  { %v6137_v53 = vpop.f32.mrf.mxu3 }
 0x8cc   :  { %v6139_v33 = vpop.f32.mrf.mxu1 }
 0x8cd   :  { %7112 = vst [vmem:[#allocation29_spill] sm:$0xff] %v6139_v33  ;;  %v6141_v44 = vpop.f32.mrf.mxu0 }
 0x8ce   :  { %7113 = vst [vmem:[#allocation30_spill] sm:$0xff] %v6141_v44  ;;  %v2476_v44 = vmax.f32 %v1999_v54, 0.0  ;;  %v2698_v54 = vld [vmem:[%s7056_s8 + $0x498] sm:$0xff] }
 0x8cf   :  { %2994 = vmatmul.f32.gmra.mxu1 %v2459_v10  ;;  %3035 = vmatmul.f32.gmra.mxu2 %v2460_v26  ;;  %v7116_v10 = vld [vmem:[#allocation12_spill] sm:$0xff] }
 0x8d0   :  { %3076 = vmatmul.f32.gmra.mxu3 %v2461_v24  ;;  %3117 = vmatmul.f32.gmra.mxu0 %v2462_v20  ;;  %v2081_v26 = vadd.f32 %v7116_v10, %v6018_v11  ;;  %v7117_v20 = vld [vmem:[#allocation14_spill] sm:$0xff]  ;;  %v2475_v10 = vmax.f32 %v1958_v32, 0.0  ;;  %v2732_v32 = vld [vmem:[%s7056_s8 + $0x5a8] sm:$0xff] }
 0x8d1   :  { %v2040_v24 = vadd.f32 %v7117_v20, %v6021_v30  ;;  %3189 = vmatpush.msrb.mxu2 %v2698_v54  ;;  %3269 = vmatpush.msrb.mxu0 %v2732_v32  ;;  %v2491_v32 = vmax.f32 %v1961_v22, 0.0  ;;  %v2680_v22 = vld [vmem:[%s7056_s8 + $0x408] sm:$0xff] }
 0x8d2   :  { %v6175_v9 = vpop.f32.mrf.mxu2  ;;  %v2478_v20 = vmax.f32 %v2081_v26, 0.0  ;;  %v7122_v26 = vld [vmem:[#allocation17_spill] sm:$0xff] }
 0x8d3   :  { %v6177_v61 = vpop.f32.mrf.mxu3  ;;  %v2477_v34 = vmax.f32 %v2040_v24, 0.0  ;;  %v2002_v24 = vadd.f32 %v7122_v26, %v6013_v50  ;;  %v2681_v26 = vld [vmem:[%s7056_s8 + $0x410] sm:$0xff]  ;;  %3270 = vmatpush.msrb.mxu0 %v2731_v15  ;;  %v2728_v15 = vld [vmem:[%s7056_s8 + $0x588] sm:$0xff] }
 0x8d4   :  { %7118 = vst [vmem:[#allocation11_spill] sm:$0xff] %v6177_v61  ;;  %v6182_v46 = vpop.f32.mrf.mxu1  ;;  %v2729_v61 = vld [vmem:[%s7056_s8 + $0x590] sm:$0xff] }
 0x8d5   :  { %7119 = vst [vmem:[#allocation13_spill] sm:$0xff] %v6182_v46  ;;  %v6184_v33 = vpop.f32.mrf.mxu0  ;;  %v2492_v54 = vmax.f32 %v2002_v24, 0.0  ;;  %3271 = vmatpush.msrb.mxu0 %v2730_v5  ;;  %v2712_v24 = vld [vmem:[%s7056_s8 + $0x508] sm:$0xff] }
 0x8d6   :  { %7120 = vst [vmem:[#allocation12_spill] sm:$0xff] %v6184_v33  ;;  %v7124_v33 = vld [vmem:[#allocation18_spill] sm:$0xff] }
 0x8d7   :  { %2997 = vmatmul.f32.gmra.mxu1 %v2475_v10  ;;  %3038 = vmatmul.f32.gmra.mxu2 %v2476_v44  ;;  %v2682_v44 = vld [vmem:[%s7056_s8 + $0x418] sm:$0xff]  ;;  %v2697_v10 = vld [vmem:[%s7056_s8 + $0x490] sm:$0xff]  ;;  %v2043_v46 = vadd.f32 %v7124_v33, %v6021_v30 }
 0x8d8   :  { %3079 = vmatmul.f32.gmra.mxu3 %v2477_v34  ;;  %3120 = vmatmul.f32.gmra.mxu0 %v2478_v20  ;;  %v7123_v20 = vld [vmem:[#allocation16_spill] sm:$0xff] }
 0x8d9   :  { %v2084_v34 = vadd.f32 %v7123_v20, %v6018_v11  ;;  %3148 = vmatpush.msrb.mxu1 %v2682_v44  ;;  %v2713_v33 = vld [vmem:[%s7056_s8 + $0x510] sm:$0xff]  ;;  %3190 = vmatpush.msrb.mxu2 %v2697_v10  ;;  %v2696_v44 = vld [vmem:[%s7056_s8 + $0x488] sm:$0xff]  ;;  %v2679_v10 = vld [vmem:[%s7056_s8 + $0x400] sm:$0xff] }
 0x8da   :  { %v6218_v35 = vpop.f32.mrf.mxu2  ;;  %3231 = vmatpush.msrb.mxu3 %v2713_v33  ;;  %3272 = vmatpush.msrb.mxu0 %v2729_v61 }
 0x8db   :  { %7125 = vst [vmem:[#allocation14_spill] sm:$0xff] %v6218_v35  ;;  %v6220_v51 = vpop.f32.mrf.mxu3  ;;  %3149 = vmatpush.msrb.mxu1 %v2681_v26  ;;  %v2493_v35 = vmax.f32 %v2043_v46, 0.0  ;;  %3191 = vmatpush.msrb.mxu2 %v2696_v44  ;;  %v2695_v46 = vld [vmem:[%s7056_s8 + $0x480] sm:$0xff]  ;;  %v7130_v26 = vld [vmem:[#allocation21_spill] sm:$0xff] }
 0x8dc   :  { %7126 = vst [vmem:[#allocation15_spill] sm:$0xff] %v6220_v51  ;;  %v6231_v20 = vpop.f32.mrf.mxu1  ;;  %v2494_v51 = vmax.f32 %v2084_v34, 0.0  ;;  %v7129_v34 = vld [vmem:[#allocation19_spill] sm:$0xff]  ;;  %v2005_v33 = vadd.f32 %v7130_v26, %v6013_v50  ;;  %3232 = vmatpush.msrb.mxu3 %v2712_v24  ;;  %3273 = vmatpush.msrb.mxu0 %v2728_v15  ;;  %v2774_v24 = vld [vmem:[%s7056_s8 + $0x6f8] sm:$0xff] }
 0x8dd   :  { %7127 = vst [vmem:[#allocation17_spill] sm:$0xff] %v6231_v20  ;;  %v6233_v39 = vpop.f32.mrf.mxu0  ;;  %v1964_v5 = vadd.f32 %v7129_v34, %v6010_v3  ;;  %3150 = vmatpush.msrb.mxu1 %v2680_v22  ;;  %3192 = vmatpush.msrb.mxu2 %v2695_v46  ;;  %v2727_v34 = vld [vmem:[%s7056_s8 + $0x580] sm:$0xff]  ;;  %v2790_v46 = vld [vmem:[%s7056_s8 + $0x778] sm:$0xff] }
 0x8de   :  { %7128 = vst [vmem:[#allocation16_spill] sm:$0xff] %v6233_v39  ;;  %3274 = vmatpush.msrb.mxu0 %v2727_v34  ;;  %v2758_v15 = vld [vmem:[%s7056_s8 + $0x678] sm:$0xff] }
 0x8df   :  { %3000 = vmatmul.f32.gmra.mxu1 %v2491_v32  ;;  %3041 = vmatmul.f32.gmra.mxu2 %v2492_v54  ;;  %v7132_v54 = vld [vmem:[#allocation22_spill] sm:$0xff]  ;;  %v2507_v26 = vmax.f32 %v1964_v5, 0.0  ;;  %v7135_v5 = vld [vmem:[#allocation23_spill] sm:$0xff] }
 0x8e0   :  { %3082 = vmatmul.f32.gmra.mxu3 %v2493_v35  ;;  %3123 = vmatmul.f32.gmra.mxu0 %v2494_v51  ;;  %v2711_v35 = vld [vmem:[%s7056_s8 + $0x500] sm:$0xff]  ;;  %v7131_v51 = vld [vmem:[#allocation20_spill] sm:$0xff]  ;;  %v2046_v44 = vadd.f32 %v7132_v54, %v6021_v30 }
 0x8e1   :  { %v2087_v32 = vadd.f32 %v7131_v51, %v6018_v11  ;;  %3151 = vmatpush.msrb.mxu1 %v2679_v10  ;;  %3233 = vmatpush.msrb.mxu3 %v2711_v35  ;;  %v2508_v51 = vmax.f32 %v2005_v33, 0.0  ;;  %v2773_v10 = vld [vmem:[%s7056_s8 + $0x6f0] sm:$0xff]  ;;  %v1967_v33 = vadd.f32 %v7135_v5, %v6010_v3  ;;  %v7136_v35 = vld [vmem:[#allocation25_spill] sm:$0xff] }
 0x8e2   :  { %v6267_v39 = vpop.f32.mrf.mxu2  ;;  %3341 = vmatpush.msra.mxu2 %v2774_v24 }
 0x8e3   :  { %v6272_v61 = vpop.f32.mrf.mxu3  ;;  %v2510_v54 = vmax.f32 %v2087_v32, 0.0  ;;  %3382 = vmatpush.msra.mxu3 %v2790_v46  ;;  %v2008_v32 = vadd.f32 %v7136_v35, %v6013_v50  ;;  %3300 = vmatpush.msra.mxu1 %v2758_v15  ;;  %v2789_v15 = vld [vmem:[%s7056_s8 + $0x770] sm:$0xff] }
 0x8e4   :  { %7133 = vst [vmem:[#allocation18_spill] sm:$0xff] %v6272_v61  ;;  %v6274_v22 = vpop.f32.mrf.mxu1  ;;  %v2509_v61 = vmax.f32 %v2046_v44, 0.0  ;;  %3342 = vmatpush.msra.mxu2 %v2773_v10  ;;  %v7137_v44 = vld [vmem:[#allocation24_spill] sm:$0xff] }
 0x8e5   :  { %v6276_v20 = vpop.f32.mrf.mxu0  ;;  %v2090_v34 = vadd.f32 %v7137_v44, %v6018_v11  ;;  %v2757_v10 = vld [vmem:[%s7056_s8 + $0x670] sm:$0xff]  ;;  %3383 = vmatpush.msra.mxu3 %v2789_v15  ;;  %v7142_v15 = vld [vmem:[#allocation27_spill] sm:$0xff] }
 0x8e6   :  { %7134 = vst [vmem:[#allocation19_spill] sm:$0xff] %v6276_v20  ;;  %v2524_v20 = vmax.f32 %v2008_v32, 0.0  ;;  %3301 = vmatpush.msra.mxu1 %v2757_v10  ;;  %v2806_v32 = vld [vmem:[%s7056_s8 + $0x7f8] sm:$0xff]  ;;  %v1970_v10 = vadd.f32 %v7142_v15, %v6010_v3 }
 0x8e7   :  { %3003 = vmatmul.f32.gmra.mxu1 %v2507_v26  ;;  %3044 = vmatmul.f32.gmra.mxu2 %v2508_v51  ;;  %v2526_v35 = vmax.f32 %v2090_v34, 0.0  ;;  %v2756_v34 = vld [vmem:[%s7056_s8 + $0x668] sm:$0xff] }
 0x8e8   :  { %3085 = vmatmul.f32.gmra.mxu3 %v2509_v61  ;;  %3126 = vmatmul.f32.gmra.mxu0 %v2510_v54  ;;  %v7138_v61 = vld [vmem:[#allocation26_spill] sm:$0xff]  ;;  %v2523_v54 = vmax.f32 %v1967_v33, 0.0  ;;  %v2788_v33 = vld [vmem:[%s7056_s8 + $0x768] sm:$0xff] }
 0x8e9   :  { %v2049_v26 = vadd.f32 %v7138_v61, %v6021_v30  ;;  %v2772_v61 = vld [vmem:[%s7056_s8 + $0x6e8] sm:$0xff]  ;;  %3384 = vmatpush.msra.mxu3 %v2788_v33  ;;  %3423 = vmatpush.msra.mxu0 %v2806_v32  ;;  %v2787_v33 = vld [vmem:[%s7056_s8 + $0x760] sm:$0xff]  ;;  %v2805_v32 = vld [vmem:[%s7056_s8 + $0x7f0] sm:$0xff] }
 0x8ea   :  { %v6298_v51 = vpop.f32.mrf.mxu2  ;;  %3343 = vmatpush.msra.mxu2 %v2772_v61  ;;  %3302 = vmatpush.msra.mxu1 %v2756_v34 }
 0x8eb   :  { %v6300_v24 = vpop.f32.mrf.mxu3  ;;  %v2525_v44 = vmax.f32 %v2049_v26, 0.0  ;;  %v2771_v26 = vld [vmem:[%s7056_s8 + $0x6e0] sm:$0xff]  ;;  %3385 = vmatpush.msra.mxu3 %v2787_v33  ;;  %3424 = vmatpush.msra.mxu0 %v2805_v32  ;;  %v2754_v33 = vld [vmem:[%s7056_s8 + $0x658] sm:$0xff]  ;;  %v2769_v32 = vld [vmem:[%s7056_s8 + $0x6d0] sm:$0xff] }
 0x8ec   :  { %7139 = vst [vmem:[#allocation21_spill] sm:$0xff] %v6300_v24  ;;  %v6302_v46 = vpop.f32.mrf.mxu1  ;;  %3344 = vmatpush.msra.mxu2 %v2771_v26 }
 0x8ed   :  { %7140 = vst [vmem:[#allocation20_spill] sm:$0xff] %v6302_v46  ;;  %v6304_v5 = vpop.f32.mrf.mxu0 }
 0x8ee   :  { %7141 = vst [vmem:[#allocation22_spill] sm:$0xff] %v6304_v5  ;;  %v6338_v5 = vld [vmem:[%s7057_s9 + $0x8] sm:$0xff] }
 0x8ef   :  { %3006 = vmatmul.f32.gmra.mxu1 %v2523_v54  ;;  %3047 = vmatmul.f32.gmra.mxu2 %v2524_v20  ;;  %v2011_v20 = vadd.f32 %v5723_v14, %v6013_v50  ;;  %v7143_v54 = vld [vmem:[#allocation28_spill] sm:$0xff]  ;;  %v2539_v50 = vmax.f32 %v1970_v10, 0.0  ;;  %v6361_v15 = vperm.slane %v6338_v5, 3  ;;  %v6364_v10 = vperm.slane %v6338_v5, 2 }
 0x8f0   :  { %3088 = vmatmul.f32.gmra.mxu3 %v2525_v44  ;;  %3129 = vmatmul.f32.gmra.mxu0 %v2526_v35  ;;  %v2093_v44 = vadd.f32 %v7143_v54, %v6018_v11  ;;  %v2052_v35 = vadd.f32 %v5725_v31, %v6021_v30  ;;  %v6347_v11 = vperm.slane %v6338_v5, 0  ;;  %v6350_v31 = vperm.slane %v6338_v5, 1  ;;  %v2770_v54 = vld [vmem:[%s7056_s8 + $0x6d8] sm:$0xff] }
 0x8f1   :  { %v2540_v61 = vmax.f32 %v2011_v20, 0.0  ;;  %v2755_v20 = vld [vmem:[%s7056_s8 + $0x660] sm:$0xff]  ;;  %3345 = vmatpush.msra.mxu2 %v2770_v54 }
 0x8f2   :  { %v6340_v46 = vpop.f32.mrf.mxu2  ;;  %v2542_v34 = vmax.f32 %v2093_v44, 0.0  ;;  %v2541_v26 = vmax.f32 %v2052_v35, 0.0  ;;  %v2786_v44 = vld [vmem:[%s7056_s8 + $0x758] sm:$0xff]  ;;  %v2804_v35 = vld [vmem:[%s7056_s8 + $0x7e8] sm:$0xff]  ;;  %3303 = vmatpush.msra.mxu1 %v2755_v20  ;;  %v2803_v54 = vld [vmem:[%s7056_s8 + $0x7e0] sm:$0xff] }
 0x8f3   :  { %7144 = vst [vmem:[#allocation23_spill] sm:$0xff] %v6340_v46  ;;  %v6342_v3 = vpop.f32.mrf.mxu3  ;;  %3386 = vmatpush.msra.mxu3 %v2786_v44  ;;  %3425 = vmatpush.msra.mxu0 %v2804_v35 }
 0x8f4   :  { %7145 = vst [vmem:[#allocation25_spill] sm:$0xff] %v6342_v3  ;;  %v6344_v14 = vpop.f32.mrf.mxu1  ;;  %3304 = vmatpush.msra.mxu1 %v2754_v33  ;;  %3346 = vmatpush.msra.mxu2 %v2769_v32  ;;  %v2753_v33 = vld [vmem:[%s7056_s8 + $0x650] sm:$0xff]  ;;  %v2768_v32 = vld [vmem:[%s7056_s8 + $0x6c8] sm:$0xff] }
 0x8f5   :  { %7146 = vst [vmem:[#allocation24_spill] sm:$0xff] %v6344_v14  ;;  %v6352_v30 = vpop.f32.mrf.mxu0  ;;  %3426 = vmatpush.msra.mxu0 %v2803_v54  ;;  %v2198_v54 = vadd.f32 %v5805_v41, %v6364_v10 }
 0x8f6   :  { %7147 = vst [vmem:[#allocation26_spill] sm:$0xff] %v6352_v30  ;;  %3305 = vmatpush.msra.mxu1 %v2753_v33  ;;  %3347 = vmatpush.msra.mxu2 %v2768_v32  ;;  %v2783_v33 = vld [vmem:[%s7056_s8 + $0x740] sm:$0xff] }
 0x8f7   :  { %3009 = vmatmul.f32.gmra.mxu1 %v2539_v50  ;;  %3050 = vmatmul.f32.gmra.mxu2 %v2540_v61  ;;  %v2113_v50 = vadd.f32 %v5727_v7, %v6347_v11  ;;  %v2154_v61 = vadd.f32 %v5763_v40, %v6350_v31  ;;  %v4303_v40 = vld [vmem:[%s7082_s18] sm:$0xff]  ;;  %v2449_v32 = vmax.f32 %v2198_v54, 0.0 }
 0x8f8   :  { %3091 = vmatmul.f32.gmra.mxu3 %v2541_v26  ;;  %3132 = vmatmul.f32.gmra.mxu0 %v2542_v34  ;;  %v2236_v26 = vadd.f32 %v5729_v60, %v6361_v15  ;;  %v2195_v34 = vadd.f32 %v5765_v62, %v6364_v10  ;;  %v6399_v20 = vperm.slane %v4303_v40, 6  ;;  %v2785_v62 = vld [vmem:[%s7056_s8 + $0x750] sm:$0xff] }
 0x8f9   :  { %v2431_v3 = vmax.f32 %v2113_v50, 0.0  ;;  %v2432_v46 = vmax.f32 %v2154_v61, 0.0  ;;  %3387 = vmatpush.msra.mxu3 %v2785_v62  ;;  %v2784_v50 = vld [vmem:[%s7056_s8 + $0x748] sm:$0xff]  ;;  %v2802_v61 = vld [vmem:[%s7056_s8 + $0x7d8] sm:$0xff]  ;;  %v2239_v62 = vadd.f32 %v5769_v57, %v6361_v15  ;;  %v2801_v57 = vld [vmem:[%s7056_s8 + $0x7d0] sm:$0xff] }
 0x8fa   :  { %v6392_v30 = vpop.f32.mrf.mxu2  ;;  %v2434_v44 = vmax.f32 %v2236_v26, 0.0  ;;  %v2433_v35 = vmax.f32 %v2195_v34, 0.0  ;;  %v2752_v26 = vld [vmem:[%s7056_s8 + $0x648] sm:$0xff]  ;;  %v2767_v34 = vld [vmem:[%s7056_s8 + $0x6c0] sm:$0xff]  ;;  %3427 = vmatpush.msra.mxu0 %v2802_v61  ;;  %v2782_v61 = vld [vmem:[%s7056_s8 + $0x738] sm:$0xff] }
 0x8fb   :  { %7148 = vst [vmem:[#allocation27_spill] sm:$0xff] %v6392_v30  ;;  %v6394_v14 = vpop.f32.mrf.mxu3  ;;  %3388 = vmatpush.msra.mxu3 %v2784_v50  ;;  %3306 = vmatpush.msra.mxu1 %v2752_v26  ;;  %v2450_v41 = vmax.f32 %v2239_v62, 0.0  ;;  %v2751_v50 = vld [vmem:[%s7056_s8 + $0x640] sm:$0xff]  ;;  %v2800_v26 = vld [vmem:[%s7056_s8 + $0x7c8] sm:$0xff] }
 0x8fc   :  { %7149 = vst [vmem:[#allocation28_spill] sm:$0xff] %v6394_v14  ;;  %v2825_v7 = vpop.f32.mrf.mxu1  ;;  %3348 = vmatpush.msra.mxu2 %v2767_v34  ;;  %3428 = vmatpush.msra.mxu0 %v2801_v57  ;;  %v2781_v57 = vld [vmem:[%s7056_s8 + $0x730] sm:$0xff] }
 0x8fd   :  { %v2948_v60 = vpop.f32.mrf.mxu0  ;;  %v2826_v40 = vadd.f32 %v2825_v7, %v6399_v20  ;;  %3389 = vmatpush.msra.mxu3 %v2783_v33  ;;  %3307 = vmatpush.msra.mxu1 %v2751_v50  ;;  %v2764_v50 = vld [vmem:[%s7056_s8 + $0x6a8] sm:$0xff] }
 0x8fe   :  { %3429 = vmatpush.msra.mxu0 %v2800_v26 }
 0x8ff   :  { %3152 = vmatmul.f32.vlgmr.msrb.gmra.mxu1 %v2431_v3  ;;  %3193 = vmatmul.f32.vlgmr.msrb.gmra.mxu2 %v2432_v46  ;;  %v2116_v46 = vadd.f32 %v5767_v55, %v6347_v11  ;;  %v2157_v3 = vadd.f32 %v5803_v0, %v6350_v31 }
 0x900   :  { %3234 = vmatmul.f32.vlgmr.msrb.gmra.mxu3 %v2433_v35  ;;  %3275 = vmatmul.f32.vlgmr.msrb.gmra.mxu0 %v2434_v44 }
 0x901   :  { %v2447_v30 = vmax.f32 %v2116_v46, 0.0  ;;  %v2448_v0 = vmax.f32 %v2157_v3, 0.0  ;;  %v2750_v46 = vld [vmem:[%s7056_s8 + $0x638] sm:$0xff]  ;;  %v2119_v3 = vadd.f32 %v5807_v42, %v6347_v11  ;;  %3390 = vmatpush.msra.mxu3 %v2782_v61 }
 0x902   :  { %v2866_v44 = vpop.f32.mrf.mxu2  ;;  %3308 = vmatpush.msra.mxu1 %v2750_v46  ;;  %v2798_v61 = vld [vmem:[%s7056_s8 + $0x7b8] sm:$0xff]  ;;  %v2748_v46 = vld [vmem:[%s7056_s8 + $0x628] sm:$0xff] }
 0x903   :  { %v2867_v35 = vadd.f32 %v2866_v44, %v2826_v40  ;;  %v2907_v14 = vpop.f32.mrf.mxu3  ;;  %v2160_v40 = vadd.f32 %v5843_v6, %v6350_v31  ;;  %3391 = vmatpush.msra.mxu3 %v2781_v57 }
 0x904   :  { %v2828_v55 = vpop.f32.mrf.mxu1 }
 0x905   :  { %v2908_v24 = vadd.f32 %v2907_v14, %v2867_v35  ;;  %v2951_v7 = vpop.f32.mrf.mxu0  ;;  %v2766_v14 = vld [vmem:[%s7056_s8 + $0x6b8] sm:$0xff]  ;;  %v2829_v62 = vadd.f32 %v2828_v55, %v6399_v20  ;;  %v2464_v6 = vmax.f32 %v2160_v40, 0.0  ;;  %v2163_v40 = vadd.f32 %v5886_v43, %v6350_v31 }
 0x906   :  { %3349 = vmatpush.msra.mxu2 %v2766_v14  ;;  %v2780_v14 = vld [vmem:[%s7056_s8 + $0x728] sm:$0xff] }
 0x907   :  { %3155 = vmatmul.f32.gmra.mxu1 %v2447_v30  ;;  %3196 = vmatmul.f32.gmra.mxu2 %v2448_v0  ;;  %v6452_v34 = vadd.f32 %v2948_v60, %v2908_v24  ;;  %v2765_v30 = vld [vmem:[%s7056_s8 + $0x6b0] sm:$0xff]  ;;  %v2242_v24 = vadd.f32 %v5809_v27, %v6361_v15  ;;  %v2201_v60 = vadd.f32 %v5845_v16, %v6364_v10  ;;  %v2463_v0 = vmax.f32 %v2119_v3, 0.0  ;;  %v2799_v27 = vld [vmem:[%s7056_s8 + $0x7c0] sm:$0xff] }
 0x908   :  { %3237 = vmatmul.f32.gmra.mxu3 %v2449_v32  ;;  %3278 = vmatmul.f32.gmra.mxu0 %v2450_v41  ;;  %v2749_v32 = vld [vmem:[%s7056_s8 + $0x630] sm:$0xff]  ;;  %v2122_v3 = vadd.f32 %v5850_v17, %v6347_v11 }
 0x909   :  { %3350 = vmatpush.msra.mxu2 %v2765_v30  ;;  %v2466_v16 = vmax.f32 %v2242_v24, 0.0  ;;  %v2465_v41 = vmax.f32 %v2201_v60, 0.0  ;;  %3430 = vmatpush.msra.mxu0 %v2799_v27  ;;  %v2763_v30 = vld [vmem:[%s7056_s8 + $0x6a0] sm:$0xff]  ;;  %v2204_v24 = vadd.f32 %v5888_v2, %v6364_v10  ;;  %v2797_v17 = vld [vmem:[%s7056_s8 + $0x7b0] sm:$0xff]  ;;  %v2762_v27 = vld [vmem:[%s7056_s8 + $0x698] sm:$0xff] }
 0x90a   :  { %v2869_v54 = vpop.f32.mrf.mxu2  ;;  %3309 = vmatpush.msra.mxu1 %v2749_v32  ;;  %3392 = vmatpush.msra.mxu3 %v2780_v14  ;;  %v2779_v2 = vld [vmem:[%s7056_s8 + $0x720] sm:$0xff]  ;;  %v2746_v14 = vld [vmem:[%s7056_s8 + $0x618] sm:$0xff] }
 0x90b   :  { %v2870_v44 = vadd.f32 %v2869_v54, %v2829_v62  ;;  %v2910_v35 = vpop.f32.mrf.mxu3  ;;  %3351 = vmatpush.msra.mxu2 %v2764_v50  ;;  %3431 = vmatpush.msra.mxu0 %v2798_v61  ;;  %v2481_v57 = vmax.f32 %v2204_v24, 0.0  ;;  %v2795_v50 = vld [vmem:[%s7056_s8 + $0x7a0] sm:$0xff]  ;;  %v2761_v61 = vld [vmem:[%s7056_s8 + $0x690] sm:$0xff] }
 0x90c   :  { %v2831_v42 = vpop.f32.mrf.mxu1  ;;  %3310 = vmatpush.msra.mxu1 %v2748_v46  ;;  %3393 = vmatpush.msra.mxu3 %v2779_v2  ;;  %v2125_v46 = vadd.f32 %v5899_v21, %v6347_v11  ;;  %v2794_v21 = vld [vmem:[%s7056_s8 + $0x798] sm:$0xff]  ;;  %v2793_v2 = vld [vmem:[%s7056_s8 + $0x790] sm:$0xff] }
 0x90d   :  { %v2911_v33 = vadd.f32 %v2910_v35, %v2870_v44  ;;  %v2954_v55 = vpop.f32.mrf.mxu0  ;;  %v2832_v62 = vadd.f32 %v2831_v42, %v6399_v20  ;;  %3352 = vmatpush.msra.mxu2 %v2763_v30  ;;  %3432 = vmatpush.msra.mxu0 %v2797_v17  ;;  %v2479_v35 = vmax.f32 %v2122_v3, 0.0  ;;  %v2480_v42 = vmax.f32 %v2163_v40, 0.0 }
 0x90e   :  { %v2248_v3 = vadd.f32 %v5901_v12, %v6361_v15  ;;  %v2207_v40 = vadd.f32 %v5940_v47, %v6364_v10  ;;  %v2777_v12 = vld [vmem:[%s7056_s8 + $0x710] sm:$0xff] }
 0x90f   :  { %3158 = vmatmul.f32.gmra.mxu1 %v2463_v0  ;;  %3199 = vmatmul.f32.gmra.mxu2 %v2464_v6  ;;  %v6487_v26 = vadd.f32 %v2951_v7, %v2911_v33  ;;  %v2245_v7 = vadd.f32 %v5852_v1, %v6361_v15  ;;  %v2747_v6 = vld [vmem:[%s7056_s8 + $0x620] sm:$0xff] }
 0x910   :  { %3240 = vmatmul.f32.gmra.mxu3 %v2465_v41  ;;  %3281 = vmatmul.f32.gmra.mxu0 %v2466_v16  ;;  %v2796_v16 = vld [vmem:[%s7056_s8 + $0x7a8] sm:$0xff]  ;;  %v2778_v41 = vld [vmem:[%s7056_s8 + $0x718] sm:$0xff] }
 0x911   :  { %v2482_v33 = vmax.f32 %v2245_v7, 0.0  ;;  %3311 = vmatpush.msra.mxu1 %v2747_v6  ;;  %3353 = vmatpush.msra.mxu2 %v2762_v27  ;;  %v2776_v6 = vld [vmem:[%s7056_s8 + $0x708] sm:$0xff] }
 0x912   :  { %v2872_v60 = vpop.f32.mrf.mxu2  ;;  %3433 = vmatpush.msra.mxu0 %v2796_v16  ;;  %3394 = vmatpush.msra.mxu3 %v2778_v41  ;;  %v2792_v16 = vld [vmem:[%s7056_s8 + $0x788] sm:$0xff]  ;;  %v2775_v41 = vld [vmem:[%s7056_s8 + $0x700] sm:$0xff] }
 0x913   :  { %v2873_v54 = vadd.f32 %v2872_v60, %v2832_v62  ;;  %v2913_v44 = vpop.f32.mrf.mxu3  ;;  %3312 = vmatpush.msra.mxu1 %v2746_v14  ;;  %3354 = vmatpush.msra.mxu2 %v2761_v61  ;;  %v2495_v60 = vmax.f32 %v2125_v46, 0.0  ;;  %v2169_v14 = vadd.f32 %v5966_v45, %v6350_v31  ;;  %v2210_v46 = vadd.f32 %v5968_v19, %v6364_v10 }
 0x914   :  { %v2834_v43 = vpop.f32.mrf.mxu1  ;;  %3434 = vmatpush.msra.mxu0 %v2795_v50  ;;  %3395 = vmatpush.msra.mxu3 %v2777_v12  ;;  %v2128_v50 = vadd.f32 %v5942_v48, %v6347_v11  ;;  %v2791_v48 = vld [vmem:[%s7056_s8 + $0x780] sm:$0xff]  ;;  %v2172_v12 = vadd.f32 %v6003_v56, %v6350_v31 }
 0x915   :  { %v2914_v0 = vadd.f32 %v2913_v44, %v2873_v54  ;;  %v2957_v1 = vpop.f32.mrf.mxu0  ;;  %v2835_v30 = vadd.f32 %v2834_v43, %v6399_v20  ;;  %v2744_v43 = vld [vmem:[%s7056_s8 + $0x608] sm:$0xff] }
 0x916   :  { %3435 = vmatpush.msra.mxu0 %v2794_v21  ;;  %3396 = vmatpush.msra.mxu3 %v2776_v6 }
 0x917   :  { %3161 = vmatmul.f32.gmra.mxu1 %v2479_v35  ;;  %3202 = vmatmul.f32.gmra.mxu2 %v2480_v42  ;;  %v6522_v32 = vadd.f32 %v2954_v55, %v2914_v0  ;;  %v2166_v55 = vadd.f32 %v5935_v63, %v6350_v31  ;;  %v2745_v63 = vld [vmem:[%s7056_s8 + $0x610] sm:$0xff]  ;;  %v2760_v35 = vld [vmem:[%s7056_s8 + $0x688] sm:$0xff]  ;;  %v2498_v42 = vmax.f32 %v2248_v3, 0.0  ;;  %v2497_v0 = vmax.f32 %v2207_v40, 0.0 }
 0x918   :  { %3243 = vmatmul.f32.gmra.mxu3 %v2481_v57  ;;  %3284 = vmatmul.f32.gmra.mxu0 %v2482_v33  ;;  %v2743_v33 = vld [vmem:[%s7056_s8 + $0x600] sm:$0xff]  ;;  %v2511_v40 = vmax.f32 %v2128_v50, 0.0 }
 0x919   :  { %3313 = vmatpush.msra.mxu1 %v2745_v63  ;;  %v2496_v54 = vmax.f32 %v2166_v55, 0.0  ;;  %3355 = vmatpush.msra.mxu2 %v2760_v35  ;;  %v2759_v57 = vld [vmem:[%s7056_s8 + $0x680] sm:$0xff]  ;;  %v2131_v63 = vadd.f32 %v5970_v36, %v6347_v11 }
 0x91a   :  { %v2875_v62 = vpop.f32.mrf.mxu2  ;;  %3436 = vmatpush.msra.mxu0 %v2793_v2  ;;  %3397 = vmatpush.msra.mxu3 %v2775_v41  ;;  %v2216_v41 = vadd.f32 %v6057_v58, %v6364_v10  ;;  %v6621_v58 = vperm.slane %v6338_v5, 6 }
 0x91b   :  { %v2876_v7 = vadd.f32 %v2875_v62, %v2835_v30  ;;  %v2916_v24 = vpop.f32.mrf.mxu3  ;;  %3314 = vmatpush.msra.mxu1 %v2744_v43  ;;  %3356 = vmatpush.msra.mxu2 %v2759_v57  ;;  %v2512_v62 = vmax.f32 %v2169_v14, 0.0 }
 0x91c   :  { %v2837_v47 = vpop.f32.mrf.mxu1  ;;  %3437 = vmatpush.msra.mxu0 %v2792_v16  ;;  %v2257_v16 = vadd.f32 %v6015_v28, %v6361_v15  ;;  %v6618_v28 = vperm.slane %v6338_v5, 7 }
 0x91d   :  { %v2917_v44 = vadd.f32 %v2916_v24, %v2876_v7  ;;  %v2960_v17 = vpop.f32.mrf.mxu0  ;;  %v2838_v61 = vadd.f32 %v2837_v47, %v6399_v20  ;;  %3315 = vmatpush.msra.mxu1 %v2743_v33  ;;  %v2513_v24 = vmax.f32 %v2210_v46, 0.0 }
 0x91e   :  { %3438 = vmatpush.msra.mxu0 %v2791_v48  ;;  %v2546_v48 = vmax.f32 %v2257_v16, 0.0  ;;  %v7152_v16 = vld [vmem:[#allocation11_spill] sm:$0xff] }
 0x91f   :  { %3164 = vmatmul.f32.gmra.mxu1 %v2495_v60  ;;  %3205 = vmatmul.f32.gmra.mxu2 %v2496_v54  ;;  %v6569_v27 = vadd.f32 %v2957_v1, %v2917_v44  ;;  %v2251_v1 = vadd.f32 %v5944_v8, %v6361_v15  ;;  %v2254_v60 = vadd.f32 %v5972_v59, %v6361_v15 }
 0x920   :  { %3246 = vmatmul.f32.gmra.mxu3 %v2497_v0  ;;  %3287 = vmatmul.f32.gmra.mxu0 %v2498_v42  ;;  %v2213_v54 = vadd.f32 %v6005_v13, %v6364_v10  ;;  %v2527_v42 = vmax.f32 %v2131_v63, 0.0  ;;  %v2528_v0 = vmax.f32 %v2172_v12, 0.0  ;;  %v2134_v59 = vadd.f32 %v6007_v25, %v6347_v11 }
 0x921   :  { %v2514_v8 = vmax.f32 %v2251_v1, 0.0  ;;  %v2530_v36 = vmax.f32 %v2254_v60, 0.0  ;;  %v2175_v13 = vadd.f32 %v6055_v52, %v6350_v31  ;;  %v6612_v1 = vperm.slane %v6338_v5, 4 }
 0x922   :  { %v2878_v55 = vpop.f32.mrf.mxu2  ;;  %v2529_v33 = vmax.f32 %v2213_v54, 0.0  ;;  %v6615_v11 = vperm.slane %v6338_v5, 5  ;;  %v2359_v5 = vadd.f32 %v6097_v29, %v6621_v58  ;;  %v2403_v54 = vadd.f32 %v6101_v18, %v6618_v28  ;;  %v7150_v18 = vld [vmem:[#allocation29_spill] sm:$0xff] }
 0x923   :  { %v2879_v30 = vadd.f32 %v2878_v55, %v2838_v61  ;;  %v2919_v3 = vpop.f32.mrf.mxu3  ;;  %v2543_v55 = vmax.f32 %v2134_v59, 0.0  ;;  %v2544_v25 = vmax.f32 %v2175_v13, 0.0  ;;  %v2277_v10 = vadd.f32 %v6059_v37, %v6612_v1  ;;  %v7151_v13 = vld [vmem:[#allocation30_spill] sm:$0xff] }
 0x924   :  { %v2840_v45 = vpop.f32.mrf.mxu1  ;;  %v2437_v60 = vmax.f32 %v2359_v5, 0.0  ;;  %v2321_v29 = vadd.f32 %v6135_v23, %v6615_v11  ;;  %v7155_v5 = vld [vmem:[#allocation12_spill] sm:$0xff] }
 0x925   :  { %v2920_v21 = vadd.f32 %v2919_v3, %v2879_v30  ;;  %v2963_v7 = vpop.f32.mrf.mxu0  ;;  %v2841_v47 = vadd.f32 %v2840_v45, %v6399_v20  ;;  %v2545_v30 = vmax.f32 %v2216_v41, 0.0  ;;  %v2318_v3 = vadd.f32 %v6095_v4, %v6615_v11 }
 0x926   :  { %v2365_v41 = vadd.f32 %v7152_v16, %v6621_v58  ;;  %v2292_v16 = vadd.f32 %v6274_v22, %v6612_v1 }
 0x927   :  { %3167 = vmatmul.f32.gmra.mxu1 %v2511_v40  ;;  %3208 = vmatmul.f32.gmra.mxu2 %v2512_v62  ;;  %v6589_v19 = vadd.f32 %v2960_v17, %v2920_v21  ;;  %v2400_v40 = vadd.f32 %v6061_v49, %v6618_v28  ;;  %v2436_v63 = vmax.f32 %v2318_v3, 0.0  ;;  %v2280_v49 = vadd.f32 %v6099_v38, %v6612_v1 }
 0x928   :  { %3249 = vmatmul.f32.gmra.mxu3 %v2513_v24  ;;  %3290 = vmatmul.f32.gmra.mxu0 %v2514_v8  ;;  %v2435_v24 = vmax.f32 %v2277_v10, 0.0  ;;  %v2454_v38 = vmax.f32 %v2403_v54, 0.0  ;;  %v7153_v10 = vld [vmem:[#allocation13_spill] sm:$0xff] }
 0x929   :  { %v2438_v37 = vmax.f32 %v2400_v40, 0.0  ;;  %v2286_v3 = vadd.f32 %v7153_v10, %v6612_v1 }
 0x92a   :  { %v2881_v44 = vpop.f32.mrf.mxu2 }
 0x92b   :  { %v2882_v43 = vadd.f32 %v2881_v44, %v2841_v47  ;;  %v2922_v17 = vpop.f32.mrf.mxu3  ;;  %v2362_v44 = vadd.f32 %v6137_v53, %v6621_v58  ;;  %v2324_v53 = vadd.f32 %v6175_v9, %v6615_v11  ;;  %v2469_v9 = vmax.f32 %v2365_v41, 0.0 }
 0x92c   :  { %v2843_v35 = vpop.f32.mrf.mxu1  ;;  %v2333_v41 = vadd.f32 %v6298_v51, %v6615_v11 }
 0x92d   :  { %v2923_v2 = vadd.f32 %v2922_v17, %v2882_v43  ;;  %v2966_v6 = vpop.f32.mrf.mxu0  ;;  %v2844_v57 = vadd.f32 %v2843_v35, %v6399_v20 }
 0x92f   :  { %3170 = vmatmul.f32.gmra.mxu1 %v2527_v42  ;;  %3211 = vmatmul.f32.gmra.mxu2 %v2528_v0  ;;  %v6600_v56 = vadd.f32 %v2963_v7, %v2923_v2  ;;  %v2451_v0 = vmax.f32 %v2280_v49, 0.0  ;;  %v2452_v2 = vmax.f32 %v2321_v29, 0.0 }
 0x930   :  { %3252 = vmatmul.f32.gmra.mxu3 %v2529_v33  ;;  %3293 = vmatmul.f32.gmra.mxu0 %v2530_v36  ;;  %v2453_v33 = vmax.f32 %v2362_v44, 0.0  ;;  %v7157_v44 = vld [vmem:[#allocation17_spill] sm:$0xff] }
 0x932   :  { %v2884_v50 = vpop.f32.mrf.mxu2 }
 0x933   :  { %v2885_v14 = vadd.f32 %v2884_v50, %v2844_v57  ;;  %v2925_v61 = vpop.f32.mrf.mxu3  ;;  %v2406_v57 = vadd.f32 %v7151_v13, %v6618_v28 }
 0x934   :  { %v2846_v46 = vpop.f32.mrf.mxu1 }
 0x935   :  { %v2926_v52 = vadd.f32 %v2925_v61, %v2885_v14  ;;  %v2969_v31 = vpop.f32.mrf.mxu0  ;;  %v2847_v45 = vadd.f32 %v2846_v46, %v6399_v20 }
 0x937   :  { %3173 = vmatmul.f32.gmra.mxu1 %v2543_v55  ;;  %3214 = vmatmul.f32.gmra.mxu2 %v2544_v25  ;;  %v6623_v15 = vadd.f32 %v2966_v6, %v2926_v52  ;;  %v2468_v25 = vmax.f32 %v2324_v53, 0.0 }
 0x938   :  { %3255 = vmatmul.f32.gmra.mxu3 %v2545_v30  ;;  %3296 = vmatmul.f32.gmra.mxu0 %v2546_v48  ;;  %v2470_v30 = vmax.f32 %v2406_v57, 0.0 }
 0x93a   :  { %v2887_v62 = vpop.f32.mrf.mxu2 }
 0x93b   :  { %v2888_v21 = vadd.f32 %v2887_v62, %v2847_v45  ;;  %v2928_v7 = vpop.f32.mrf.mxu3  ;;  %v7154_v45 = vld [vmem:[#allocation14_spill] sm:$0xff]  ;;  %v2409_v62 = vadd.f32 %v7155_v5, %v6618_v28  ;;  %v7163_v5 = vld [vmem:[#allocation23_spill] sm:$0xff] }
 0x93c   :  { %v2989_v8 = vpop.f32.mrf.mxu1  ;;  %v2327_v40 = vadd.f32 %v7154_v45, %v6615_v11  ;;  %v7162_v45 = vld [vmem:[#allocation20_spill] sm:$0xff] }
 0x93d   :  { %v2929_v12 = vadd.f32 %v2928_v7, %v2888_v21  ;;  %v3112_v47 = vpop.f32.mrf.mxu0  ;;  %v2990_v20 = vadd.f32 %v2989_v8, %v6452_v34  ;;  %v2283_v34 = vadd.f32 %v7150_v18, %v6612_v1  ;;  %v2486_v29 = vmax.f32 %v2409_v62, 0.0 }
 0x93e   :  { %v2336_v62 = vadd.f32 %v7163_v5, %v6615_v11 }
 0x93f   :  { %3316 = vmatmul.f32.vlgmr.msra.gmra.mxu1 %v2435_v24  ;;  %3357 = vmatmul.f32.vlgmr.msra.gmra.mxu2 %v2436_v63  ;;  %v6634_v4 = vadd.f32 %v2969_v31, %v2929_v12  ;;  %v2467_v55 = vmax.f32 %v2283_v34, 0.0  ;;  %v2483_v12 = vmax.f32 %v2286_v3, 0.0 }
 0x940   :  { %3398 = vmatmul.f32.vlgmr.msra.gmra.mxu3 %v2437_v60  ;;  %3439 = vmatmul.f32.vlgmr.msra.gmra.mxu0 %v2438_v37 }
 0x942   :  { %v3030_v43 = vpop.f32.mrf.mxu2 }
 0x943   :  { %v3031_v17 = vadd.f32 %v3030_v43, %v2990_v20  ;;  %v3071_v35 = vpop.f32.mrf.mxu3  ;;  %v2289_v43 = vadd.f32 %v7157_v44, %v6612_v1 }
 0x944   :  { %v2992_v42 = vpop.f32.mrf.mxu1 }
 0x945   :  { %v3072_v6 = vadd.f32 %v3071_v35, %v3031_v17  ;;  %v3115_v36 = vpop.f32.mrf.mxu0  ;;  %v2993_v59 = vadd.f32 %v2992_v42, %v6487_v26  ;;  %v2330_v17 = vadd.f32 %v6267_v39, %v6615_v11  ;;  %v7158_v35 = vld [vmem:[#allocation16_spill] sm:$0xff] }
 0x946   :  { %v2412_v42 = vadd.f32 %v7158_v35, %v6618_v28 }
 0x947   :  { %3319 = vmatmul.f32.gmra.mxu1 %v2451_v0  ;;  %3360 = vmatmul.f32.gmra.mxu2 %v2452_v2  ;;  %v6645_v23 = vadd.f32 %v3112_v47, %v3072_v6  ;;  %v2484_v47 = vmax.f32 %v2327_v40, 0.0  ;;  %v2500_v18 = vmax.f32 %v2330_v17, 0.0  ;;  %v2295_v40 = vadd.f32 %v7162_v45, %v6612_v1  ;;  %v7166_v17 = vld [vmem:[#allocation24_spill] sm:$0xff] }
 0x948   :  { %3401 = vmatmul.f32.gmra.mxu3 %v2453_v33  ;;  %3442 = vmatmul.f32.gmra.mxu0 %v2454_v38  ;;  %v2499_v33 = vmax.f32 %v2289_v43, 0.0  ;;  %v2502_v13 = vmax.f32 %v2412_v42, 0.0  ;;  %v2298_v35 = vadd.f32 %v7166_v17, %v6612_v1  ;;  %v7167_v42 = vld [vmem:[#allocation27_spill] sm:$0xff] }
 0x94a   :  { %v3033_v50 = vpop.f32.mrf.mxu2 }
 0x94b   :  { %v3034_v14 = vadd.f32 %v3033_v50, %v2993_v59  ;;  %v3074_v61 = vpop.f32.mrf.mxu3  ;;  %v7160_v50 = vld [vmem:[#allocation19_spill] sm:$0xff] }
 0x94c   :  { %v2995_v46 = vpop.f32.mrf.mxu1 }
 0x94d   :  { %v3075_v52 = vadd.f32 %v3074_v61, %v3034_v14  ;;  %v2996_v31 = vadd.f32 %v2995_v46, %v6522_v32  ;;  %v3118_v48 = vpop.f32.mrf.mxu0  ;;  %v7156_v32 = vld [vmem:[#allocation15_spill] sm:$0xff]  ;;  %v2415_v14 = vadd.f32 %v7160_v50, %v6618_v28 }
 0x94e   :  { %v2368_v21 = vadd.f32 %v7156_v32, %v6621_v58  ;;  %v7164_v32 = vld [vmem:[#allocation22_spill] sm:$0xff] }
 0x94f   :  { %3322 = vmatmul.f32.gmra.mxu1 %v2467_v55  ;;  %3363 = vmatmul.f32.gmra.mxu2 %v2468_v25  ;;  %v6657_v26 = vadd.f32 %v3115_v36, %v3075_v52  ;;  %v2518_v22 = vmax.f32 %v2415_v14, 0.0 }
 0x950   :  { %3404 = vmatmul.f32.gmra.mxu3 %v2469_v9  ;;  %3445 = vmatmul.f32.gmra.mxu0 %v2470_v30  ;;  %v2485_v20 = vmax.f32 %v2368_v21, 0.0  ;;  %v2418_v21 = vadd.f32 %v7164_v32, %v6618_v28 }
 0x952   :  { %v3036_v7 = vpop.f32.mrf.mxu2 }
 0x953   :  { %v3037_v8 = vadd.f32 %v3036_v7, %v2996_v31  ;;  %v3077_v24 = vpop.f32.mrf.mxu3  ;;  %v2515_v31 = vmax.f32 %v2292_v16, 0.0 }
 0x954   :  { %v2998_v63 = vpop.f32.mrf.mxu1 }
 0x955   :  { %v3078_v37 = vadd.f32 %v3077_v24, %v3037_v8  ;;  %v2999_v60 = vadd.f32 %v2998_v63, %v6569_v27  ;;  %v3121_v49 = vpop.f32.mrf.mxu0  ;;  %v7159_v27 = vld [vmem:[#allocation18_spill] sm:$0xff] }
 0x956   :  { %v2371_v0 = vadd.f32 %v7159_v27, %v6621_v58  ;;  %v2339_v27 = vadd.f32 %v7167_v42, %v6615_v11 }
 0x957   :  { %3325 = vmatmul.f32.gmra.mxu1 %v2483_v12  ;;  %3366 = vmatmul.f32.gmra.mxu2 %v2484_v47  ;;  %v6668_v54 = vadd.f32 %v3118_v48, %v3078_v37  ;;  %v2516_v48 = vmax.f32 %v2333_v41, 0.0  ;;  %v2531_v47 = vmax.f32 %v2295_v40, 0.0  ;;  %v2532_v37 = vmax.f32 %v2336_v62, 0.0 }
 0x958   :  { %3407 = vmatmul.f32.gmra.mxu3 %v2485_v20  ;;  %3448 = vmatmul.f32.gmra.mxu0 %v2486_v29  ;;  %v2501_v57 = vmax.f32 %v2371_v0, 0.0  ;;  %v2534_v20 = vmax.f32 %v2418_v21, 0.0  ;;  %v7168_v0 = vld [vmem:[#allocation26_spill] sm:$0xff] }
 0x95a   :  { %v3039_v2 = vpop.f32.mrf.mxu2 }
 0x95b   :  { %v3040_v6 = vadd.f32 %v3039_v2, %v2999_v60  ;;  %v3080_v36 = vpop.f32.mrf.mxu3  ;;  %v2421_v2 = vadd.f32 %v7168_v0, %v6618_v28 }
 0x95c   :  { %v3001_v38 = vpop.f32.mrf.mxu1 }
 0x95d   :  { %v3081_v34 = vadd.f32 %v3080_v36, %v3040_v6  ;;  %v3002_v53 = vadd.f32 %v3001_v38, %v6589_v19  ;;  %v3124_v59 = vpop.f32.mrf.mxu0  ;;  %v7161_v19 = vld [vmem:[#allocation21_spill] sm:$0xff]  ;;  %v2550_v1 = vmax.f32 %v2421_v2, 0.0 }
 0x95e   :  { %v2374_v61 = vadd.f32 %v7161_v19, %v6621_v58 }
 0x95f   :  { %3328 = vmatmul.f32.gmra.mxu1 %v2499_v33  ;;  %3369 = vmatmul.f32.gmra.mxu2 %v2500_v18  ;;  %v6679_v39 = vadd.f32 %v3121_v49, %v3081_v34  ;;  %v2547_v34 = vmax.f32 %v2298_v35, 0.0 }
 0x960   :  { %3410 = vmatmul.f32.gmra.mxu3 %v2501_v57  ;;  %3451 = vmatmul.f32.gmra.mxu0 %v2502_v13  ;;  %v2517_v3 = vmax.f32 %v2374_v61, 0.0 }
 0x962   :  { %v3042_v46 = vpop.f32.mrf.mxu2 }
 0x963   :  { %v3043_v55 = vadd.f32 %v3042_v46, %v3002_v53  ;;  %v3083_v25 = vpop.f32.mrf.mxu3  ;;  %v2548_v53 = vmax.f32 %v2339_v27, 0.0 }
 0x964   :  { %v3004_v52 = vpop.f32.mrf.mxu1 }
 0x965   :  { %v3084_v30 = vadd.f32 %v3083_v25, %v3043_v55  ;;  %v3005_v9 = vadd.f32 %v3004_v52, %v6600_v56  ;;  %v3127_v10 = vpop.f32.mrf.mxu0  ;;  %v7165_v56 = vld [vmem:[#allocation25_spill] sm:$0xff] }
 0x966   :  { %v2377_v7 = vadd.f32 %v7165_v56, %v6621_v58 }
 0x967   :  { %3331 = vmatmul.f32.gmra.mxu1 %v2515_v31  ;;  %3372 = vmatmul.f32.gmra.mxu2 %v2516_v48  ;;  %v6690_v51 = vadd.f32 %v3124_v59, %v3084_v30 }
 0x968   :  { %3413 = vmatmul.f32.gmra.mxu3 %v2517_v3  ;;  %3454 = vmatmul.f32.gmra.mxu0 %v2518_v22  ;;  %v2533_v44 = vmax.f32 %v2377_v7, 0.0 }
 0x96a   :  { %v3045_v8 = vpop.f32.mrf.mxu2 }
 0x96b   :  { %v3046_v24 = vadd.f32 %v3045_v8, %v3005_v9  ;;  %v3086_v63 = vpop.f32.mrf.mxu3 }
 0x96c   :  { %v3007_v12 = vpop.f32.mrf.mxu1 }
 0x96d   :  { %v3087_v60 = vadd.f32 %v3086_v63, %v3046_v24  ;;  %v3008_v49 = vadd.f32 %v3007_v12, %v6623_v15  ;;  %v3130_v29 = vpop.f32.mrf.mxu0  ;;  %v7169_v15 = vld [vmem:[#allocation28_spill] sm:$0xff] }
 0x96e   :  { %v2380_v6 = vadd.f32 %v7169_v15, %v6621_v58 }
 0x96f   :  { %3334 = vmatmul.f32.gmra.mxu1 %v2531_v47  ;;  %3375 = vmatmul.f32.gmra.mxu2 %v2532_v37  ;;  %v6701_v43 = vadd.f32 %v3127_v10, %v3087_v60 }
 0x970   :  { %3416 = vmatmul.f32.gmra.mxu3 %v2533_v44  ;;  %3457 = vmatmul.f32.gmra.mxu0 %v2534_v20  ;;  %v2549_v16 = vmax.f32 %v2380_v6, 0.0 }
 0x972   :  { %v3048_v36 = vpop.f32.mrf.mxu2 }
 0x973   :  { %v3049_v38 = vadd.f32 %v3048_v36, %v3008_v49  ;;  %v3089_v33 = vpop.f32.mrf.mxu3 }
 0x974   :  { %v3010_v18 = vpop.f32.mrf.mxu1 }
 0x975   :  { %v3090_v59 = vadd.f32 %v3089_v33, %v3049_v38  ;;  %v3011_v13 = vadd.f32 %v3010_v18, %v6634_v4  ;;  %v3133_v57 = vpop.f32.mrf.mxu0 }
 0x977   :  { %3337 = vmatmul.f32.gmra.mxu1 %v2547_v34  ;;  %3378 = vmatmul.f32.gmra.mxu2 %v2548_v53  ;;  %v6712_v11 = vadd.f32 %v3130_v29, %v3090_v59 }
 0x978   :  { %3419 = vmatmul.f32.gmra.mxu3 %v2549_v16  ;;  %3460 = vmatmul.f32.gmra.mxu0 %v2550_v1 }
 0x97a   :  { %v3051_v28 = vpop.f32.mrf.mxu2 }
 0x97b   :  { %v3052_v58 = vadd.f32 %v3051_v28, %v3011_v13  ;;  %v3092_v41 = vpop.f32.mrf.mxu3  ;;  %v7170_v28 = vld [vmem:[#allocation3_spill] sm:$0xff] }
 0x97c   :  { %v3153_v50 = vpop.f32.mrf.mxu1 }
 0x97d   :  { %v3093_v14 = vadd.f32 %v3092_v41, %v3052_v58  ;;  %v3276_v19 = vpop.f32.mrf.mxu0  ;;  %v3154_v49 = vadd.f32 %v3153_v50, %v6645_v23 }
 0x97f   :  { %v6714_v61 = vadd.f32 %v3133_v57, %v3093_v14 }
 0x982   :  { %v3194_v46 = vpop.f32.mrf.mxu2 }
 0x983   :  { %v3235_v55 = vpop.f32.mrf.mxu3  ;;  %v3195_v20 = vadd.f32 %v3194_v46, %v3154_v49 }
 0x984   :  { %v3156_v4 = vpop.f32.mrf.mxu1 }
 0x985   :  { %v3279_v25 = vpop.f32.mrf.mxu0  ;;  %v3236_v17 = vadd.f32 %v3235_v55, %v3195_v20  ;;  %v3157_v27 = vadd.f32 %v3156_v4, %v6657_v26 }
 0x987   :  { %v3277_v15 = vadd.f32 %v3276_v19, %v3236_v17 }
 0x98a   :  { %v3197_v52 = vpop.f32.mrf.mxu2 }
 0x98b   :  { %v3238_v31 = vpop.f32.mrf.mxu3  ;;  %v3198_v2 = vadd.f32 %v3197_v52, %v3157_v27 }
 0x98c   :  { %v3159_v48 = vpop.f32.mrf.mxu1 }
 0x98d   :  { %v3282_v30 = vpop.f32.mrf.mxu0  ;;  %v3239_v38 = vadd.f32 %v3238_v31, %v3198_v2  ;;  %v3160_v34 = vadd.f32 %v3159_v48, %v6668_v54 }
 0x98f   :  { %v3280_v1 = vadd.f32 %v3279_v25, %v3239_v38 }
 0x992   :  { %v3200_v9 = vpop.f32.mrf.mxu2 }
 0x993   :  { %v3241_v10 = vpop.f32.mrf.mxu3  ;;  %v3201_v13 = vadd.f32 %v3200_v9, %v3160_v34  ;;  %v7171_v9 = vld [vmem:[#allocation4_spill] sm:$0xff] }
 0x994   :  { %v3162_v22 = vpop.f32.mrf.mxu1 }
 0x995   :  { %v6716_v3 = vpop.f32.mrf.mxu0  ;;  %v3242_v41 = vadd.f32 %v3241_v10, %v3201_v13  ;;  %v3163_v54 = vadd.f32 %v3162_v22, %v6679_v39 }
 0x997   :  { %v3283_v25 = vadd.f32 %v3282_v30, %v3242_v41 }
 0x99a   :  { %v3203_v45 = vpop.f32.mrf.mxu2 }
 0x99b   :  { %v3244_v40 = vpop.f32.mrf.mxu3  ;;  %v3204_v52 = vadd.f32 %v3203_v45, %v3163_v54  ;;  %v7174_v54 = vld [vmem:[#allocation7_spill] sm:$0xff] }
 0x99c   :  { %v3165_v5 = vpop.f32.mrf.mxu1 }
 0x99d   :  { %v6718_v62 = vpop.f32.mrf.mxu0  ;;  %v3245_v10 = vadd.f32 %v3244_v40, %v3204_v52  ;;  %v3166_v39 = vadd.f32 %v3165_v5, %v6690_v51 }
 0x99f   :  { %v3286_v30 = vadd.f32 %v6716_v3, %v3245_v10 }
 0x9a2   :  { %v3206_v32 = vpop.f32.mrf.mxu2 }
 0x9a3   :  { %v6720_v21 = vpop.f32.mrf.mxu3  ;;  %v3207_v45 = vadd.f32 %v3206_v32, %v3166_v39 }
 0x9a4   :  { %v6722_v56 = vpop.f32.mrf.mxu1 }
 0x9a5   :  { %v6724_v7 = vpop.f32.mrf.mxu0  ;;  %v3169_v51 = vadd.f32 %v6722_v56, %v6701_v43 }
 0x9aa   :  { %v6726_v8 = vpop.f32.mrf.mxu2 }
 0x9ab   :  { %v6728_v24 = vpop.f32.mrf.mxu3  ;;  %v3210_v3 = vadd.f32 %v6726_v8, %v3169_v51  ;;  %v3667_v51 = vld [vmem:[%s7058_s2 + $0x8] sm:$0xff] }
 0x9ac   :  { %v6730_v63 = vpop.f32.mrf.mxu1 }
 0x9ad   :  { %v6732_v12 = vpop.f32.mrf.mxu0  ;;  %v3172_v56 = vadd.f32 %v6730_v63, %v6712_v11 }
 0x9b2   :  { %v6734_v47 = vpop.f32.mrf.mxu2 }
 0x9b3   :  { %v6736_v37 = vpop.f32.mrf.mxu3 }
 0x9b4   :  { %v6738_v60 = vpop.f32.mrf.mxu1 }
 0x9b5   :  { %v6741_v29 = vpop.f32.mrf.mxu0  ;;  %v3175_v63 = vadd.f32 %v6738_v60, %v6714_v61 }
 0x9ba   :  { %v6743_v44 = vpop.f32.mrf.mxu2 }
 0x9bb   :  { %v6745_v35 = vpop.f32.mrf.mxu3 }
 0x9bc   :  { %v3317_v42 = vpop.f32.mrf.mxu1 }
 0x9bd   :  { %v3440_v0 = vpop.f32.mrf.mxu0  ;;  %v3318_v6 = vadd.f32 %v3317_v42, %v3277_v15 }
 0x9c2   :  { %v3358_v36 = vpop.f32.mrf.mxu2 }
 0x9c3   :  { %v3359_v33 = vadd.f32 %v3358_v36, %v3318_v6  ;;  %v3399_v18 = vpop.f32.mrf.mxu3  ;;  %v7172_v36 = vld [vmem:[#allocation5_spill] sm:$0xff] }
 0x9c4   :  { %v3320_v23 = vpop.f32.mrf.mxu1 }
 0x9c5   :  { %v3400_v53 = vadd.f32 %v3399_v18, %v3359_v33  ;;  %v3443_v59 = vpop.f32.mrf.mxu0  ;;  %v3321_v16 = vadd.f32 %v3320_v23, %v3280_v1  ;;  %v3248_v33 = vadd.f32 %v6720_v21, %v3207_v45  ;;  %v7173_v1 = vld [vmem:[#allocation6_spill] sm:$0xff] }
 0x9c7   :  { %v3441_v57 = vadd.f32 %v3440_v0, %v3400_v53 }
 0x9c9   :  { %v6750_v58 = vadd.f32 %v3441_v57, %v7170_v28  ;;  %v3251_v28 = vadd.f32 %v6728_v24, %v3210_v3  ;;  %v3668_v3 = vld [vmem:[%s7058_s2 + $0x10] sm:$0xff] }
 0x9ca   :  { %v3361_v26 = vpop.f32.mrf.mxu2 }
 0x9cb   :  { %v3362_v50 = vadd.f32 %v3361_v26, %v3321_v16  ;;  %v3402_v14 = vpop.f32.mrf.mxu3  ;;  %v3472_v19 = vsel %vm184_vm0, %v6750_v58, 0.0 }
 0x9cc   :  { %v3323_v46 = vpop.f32.mrf.mxu1  ;;  %3473 = vadd.xlane.f32.xlu1 %v3472_v19  ;;  %v3292_v19 = vadd.f32 %v6724_v7, %v3251_v28  ;;  %v3216_v7 = vadd.f32 %v6743_v44, %v3175_v63  ;;  %v3781_v28 = vld [vmem:[%s7059_s11 + $0x8] sm:$0xff] }
 0x9cd   :  { %v3403_v55 = vadd.f32 %v3402_v14, %v3362_v50  ;;  %v3446_v4 = vpop.f32.mrf.mxu0  ;;  %v3324_v48 = vadd.f32 %v3323_v46, %v3283_v25  ;;  %3800 = vmatpush.msrb.mxu1 %v3781_v28 }
 0x9cf   :  { %v3444_v31 = vadd.f32 %v3443_v59, %v3403_v55  ;;  %v3289_v59 = vadd.f32 %v6718_v62, %v3248_v33  ;;  %v3213_v62 = vadd.f32 %v6734_v47, %v3172_v56 }
 0x9d1   :  { %v6756_v49 = vadd.f32 %v3444_v31, %v7171_v9  ;;  %v3254_v52 = vadd.f32 %v6736_v37, %v3213_v62 }
 0x9d2   :  { %v3364_v20 = vpop.f32.mrf.mxu2 }
 0x9d3   :  { %v3365_v17 = vadd.f32 %v3364_v20, %v3324_v48  ;;  %v3405_v42 = vpop.f32.mrf.mxu3  ;;  %v3475_v27 = vsel %vm184_vm0, %v6756_v49, 0.0  ;;  %v3295_v20 = vadd.f32 %v6732_v12, %v3254_v52 }
 0x9d4   :  { %v3326_v0 = vpop.f32.mrf.mxu1  ;;  %3476 = vadd.xlane.f32.xlu0 %v3475_v27  ;;  %v3257_v27 = vadd.f32 %v6745_v35, %v3216_v7 }
 0x9d5   :  { %v3406_v22 = vadd.f32 %v3405_v42, %v3365_v17  ;;  %v3449_v2 = vpop.f32.mrf.mxu0  ;;  %v3327_v6 = vadd.f32 %v3326_v0, %v3286_v30  ;;  %v7175_v17 = vld [vmem:[#allocation8_spill] sm:$0xff] }
 0x9d6   :  { %v3298_v45 = vadd.f32 %v6741_v29, %v3257_v27 }
 0x9d7   :  { %v3447_v15 = vadd.f32 %v3446_v4, %v3406_v22 }
 0x9d9   :  { %v6763_v38 = vadd.f32 %v3447_v15, %v7172_v36  ;;  %v7176_v15 = vld [vmem:[#allocation9_spill] sm:$0xff] }
 0x9da   :  { %v3367_v40 = vpop.f32.mrf.mxu2 }
 0x9db   :  { %v3368_v18 = vadd.f32 %v3367_v40, %v3327_v6  ;;  %v3408_v23 = vpop.f32.mrf.mxu3  ;;  %v3478_v34 = vsel %vm184_vm0, %v6763_v38, 0.0 }
 0x9dc   :  { %v3329_v53 = vpop.f32.mrf.mxu1  ;;  %3479 = vadd.xlane.f32.xlu2 %v3478_v34  ;;  %v7177_v34 = vld [vmem:[#allocation10_spill] sm:$0xff] }
 0x9dd   :  { %v3409_v5 = vadd.f32 %v3408_v23, %v3368_v18  ;;  %v3452_v13 = vpop.f32.mrf.mxu0  ;;  %v3330_v57 = vadd.f32 %v3329_v53, %v3289_v59  ;;  %v3670_v59 = vld [vmem:[%s7058_s2 + $0x20] sm:$0xff] }
 0x9df   :  { %v3450_v32 = vadd.f32 %v3449_v2, %v3409_v5  ;;  %v3669_v5 = vld [vmem:[%s7058_s2 + $0x18] sm:$0xff] }
 0x9e1   :  { %v6773_v21 = vadd.f32 %v3450_v32, %v7173_v1  ;;  %v3666_v32 = vld [vmem:[%s7058_s2] sm:$0xff] }
 0x9e2   :  { %v3370_v16 = vpop.f32.mrf.mxu2 }
 0x9e3   :  { %v3371_v26 = vadd.f32 %v3370_v16, %v3330_v57  ;;  %v3411_v41 = vpop.f32.mrf.mxu3  ;;  %v3481_v50 = vsel %vm184_vm0, %v6773_v21, 0.0  ;;  %v7178_v57 = vld [vmem:[#allocation2_spill] sm:$0xff] }
 0x9e4   :  { %v3332_v43 = vpop.f32.mrf.mxu1  ;;  %3482 = vadd.xlane.f32.xlu1 %v3481_v50 }
 0x9e5   :  { %v3412_v8 = vadd.f32 %v3411_v41, %v3371_v26  ;;  %v3333_v46 = vadd.f32 %v3332_v43, %v3292_v19  ;;  %v3455_v24 = vpop.f32.mrf.mxu0 }
 0x9e7   :  { %v3453_v14 = vadd.f32 %v3452_v13, %v3412_v8 }
 0x9e9   :  { %v6783_v55 = vadd.f32 %v3453_v14, %v7174_v54 }
 0x9ea   :  { %v3373_v4 = vpop.f32.mrf.mxu2 }
 0x9eb   :  { %v3374_v31 = vadd.f32 %v3373_v4, %v3333_v46  ;;  %v3414_v25 = vpop.f32.mrf.mxu3  ;;  %v3484_v48 = vsel %vm184_vm0, %v6783_v55, 0.0 }
 0x9ec   :  { %v3335_v11 = vpop.f32.mrf.mxu1  ;;  %3485 = vadd.xlane.f32.xlu0 %v3484_v48 }
 0x9ed   :  { %v3415_v47 = vadd.f32 %v3414_v25, %v3374_v31  ;;  %v3336_v10 = vadd.f32 %v3335_v11, %v3295_v20  ;;  %v3458_v2 = vpop.f32.mrf.mxu0  ;;  %v3780_v11 = vld [vmem:[%s7059_s11] sm:$0xff] }
 0x9ee   :  { %3801 = vmatpush.msrb.mxu1 %v3780_v11 }
 0x9ef   :  { %v3456_v9 = vadd.f32 %v3455_v24, %v3415_v47 }
 0x9f1   :  { %v6793_v42 = vadd.f32 %v3456_v9, %v7175_v17 }
 0x9f2   :  { %v3376_v37 = vpop.f32.mrf.mxu2 }
 0x9f3   :  { %v3377_v0 = vadd.f32 %v3376_v37, %v3336_v10  ;;  %v3417_v39 = vpop.f32.mrf.mxu3  ;;  %v3487_v22 = vsel %vm184_vm0, %v6793_v42, 0.0 }
 0x9f4   :  { %3488 = vadd.xlane.f32.xlu2 %v3487_v22  ;;  %v3338_v60 = vpop.f32.mrf.mxu1  ;;  %v3779_v22 = vld [vmem:[%s7060_s3] sm:$0xff] }
 0x9f5   :  { %v3418_v61 = vadd.f32 %v3417_v39, %v3377_v0  ;;  %v3339_v12 = vadd.f32 %v3338_v60, %v3298_v45  ;;  %v3461_v18 = vpop.f32.mrf.mxu0  ;;  %4130 = vmatmul.msk.f32.vlgmr.msrb.gmra.mxu1 %vm184_vm0, %v3779_v22  ;;  %v3671_v45 = vld [vmem:[%s7058_s2 + $0x28] sm:$0xff] }
 0x9f7   :  { %v3459_v44 = vadd.f32 %v3458_v2, %v3418_v61 }
 0x9f9   :  { %v6800_v30 = vadd.f32 %v3459_v44, %v7176_v15  ;;  %v3672_v44 = vld [vmem:[%s7058_s2 + $0x30] sm:$0xff] }
 0x9fa   :  { %v3379_v6 = vpop.f32.mrf.mxu2 }
 0x9fb   :  { %v3380_v36 = vadd.f32 %v3379_v6, %v3339_v12  ;;  %v3490_v35 = vsel %vm184_vm0, %v6800_v30, 0.0  ;;  %v3420_v40 = vpop.f32.mrf.mxu3  ;;  %v3673_v12 = vld [vmem:[%s7058_s2 + $0x38] sm:$0xff] }
 0x9fc   :  { %3491 = vadd.xlane.f32.xlu1 %v3490_v35 }
 0x9fd   :  { %v3421_v33 = vadd.f32 %v3420_v40, %v3380_v36 }
 0x9ff   :  { %v3462_v23 = vadd.f32 %v3461_v18, %v3421_v33 }
 0xa01   :  { %v6805_v53 = vadd.f32 %v3462_v23, %v7177_v34 }
 0xa03   :  { %v3493_v29 = vsel %vm184_vm0, %v6805_v53, 0.0 }
 0xa04   :  { %3494 = vadd.xlane.f32.xlu0 %v3493_v29 }
 0xa0c   :  { %3681 = vperm.xlu2 %4194, %v3667_v51  }
 0xa14   :  { %3691 = vperm.xlu2 %4194, %v3669_v5  }
 0xa15   :  { %3686 = vperm.xlu1 %4161, %v3668_v3  }
 0xa18   :  { %3676 = vperm.xlu0 %4193, %v3666_v32  }
 0xa1d   :  { %3696 = vperm.xlu1 %4161, %v3670_v59  }
 0xa3f   :  { %v3474_v13 = vpop.xlane.xlu1 %3473 }
 0xa40   :  { %v3496_v1 = vmul.f32 %v3474_v13, %v7178_v57 }
 0xa42   :  { %v6826_v16 = vsub.f32 %v6750_v58, %v3496_v1 }
 0xa44   :  { %v3512_v26 = vmul.f32 %v6826_v16, %v6826_v16 }
 0xa46   :  { %v3520_v41 = vsel %vm184_vm0, %v3512_v26, 0.0 }
 0xa47   :  { %v3477_v50 = vpop.xlane.xlu0 %3476  ;;  %3521 = vadd.xlane.f32.xlu2 %v3520_v41 }
 0xa48   :  { %v3497_v43 = vmul.f32 %v3477_v50, %v7178_v57 }
 0xa4a   :  { %v6836_v56 = vsub.f32 %v6756_v49, %v3497_v43 }
 0xa4c   :  { %v3513_v58 = vmul.f32 %v6836_v56, %v6836_v56 }
 0xa4e   :  { %v3523_v8 = vsel %vm184_vm0, %v3513_v58, 0.0 }
 0xa4f   :  { %v3480_v62 = vpop.xlane.xlu2 %3479  ;;  %3524 = vadd.xlane.f32.xlu1 %v3523_v8 }
 0xa50   :  { %v3498_v14 = vmul.f32 %v3480_v62, %v7178_v57 }
 0xa52   :  { %v6843_v19 = vsub.f32 %v6763_v38, %v3498_v14 }
 0xa54   :  { %v3514_v46 = vmul.f32 %v6843_v19, %v6843_v19 }
 0xa56   :  { %v3526_v54 = vsel %vm184_vm0, %v3514_v46, 0.0 }
 0xa57   :  { %3527 = vadd.xlane.f32.xlu0 %v3526_v54  ;;  %v3483_v49 = vpop.xlane.xlu1 %3482 }
 0xa58   :  { %v3499_v24 = vmul.f32 %v3483_v49, %v7178_v57 }
 0xa5a   :  { %v6850_v4 = vsub.f32 %v6773_v21, %v3499_v24 }
 0xa5c   :  { %v3515_v52 = vmul.f32 %v6850_v4, %v6850_v4 }
 0xa5e   :  { %v3529_v31 = vsel %vm184_vm0, %v3515_v52, 0.0  ;;  %v3809_v52 = vld [vmem:[%s7061_s13 + $0x8] sm:$0xff] }
 0xa5f   :  { %v3486_v25 = vpop.xlane.xlu0 %3485  ;;  %3530 = vadd.xlane.f32.xlu2 %v3529_v31  ;;  %v3807_v31 = vld [vmem:[%s7062_s12 + $0x8] sm:$0xff]  ;;  %3848 = vmatpush.msrb.mxu2 %v3809_v52 }
 0xa60   :  { %v3500_v38 = vmul.f32 %v3486_v25, %v7178_v57  ;;  %3871 = vmatpush.msrb.mxu3 %v3807_v31 }
 0xa62   :  { %v6857_v48 = vsub.f32 %v6783_v55, %v3500_v38 }
 0xa64   :  { %v3516_v21 = vmul.f32 %v6857_v48, %v6857_v48 }
 0xa66   :  { %v3532_v63 = vsel %vm184_vm0, %v3516_v21, 0.0 }
 0xa67   :  { %v3489_v47 = vpop.xlane.xlu2 %3488  ;;  %3533 = vadd.xlane.f32.xlu1 %v3532_v63 }
 0xa68   :  { %v3501_v7 = vmul.f32 %v3489_v47, %v7178_v57 }
 0xa6a   :  { %v6867_v9 = vsub.f32 %v6793_v42, %v3501_v7 }
 0xa6c   :  { %v3517_v55 = vmul.f32 %v6867_v9, %v6867_v9 }
 0xa6e   :  { %v3535_v20 = vsel %vm184_vm0, %v3517_v55, 0.0 }
 0xa6f   :  { %3536 = vadd.xlane.f32.xlu0 %v3535_v20  ;;  %v3492_v10 = vpop.xlane.xlu1 %3491 }
 0xa70   :  { %v3502_v17 = vmul.f32 %v3492_v10, %v7178_v57 }
 0xa72   :  { %v6874_v37 = vsub.f32 %v6800_v30, %v3502_v17  ;;  %v6901_v30 = vpop.permute.xlu2 %3681 }
 0xa74   :  { %v3518_v27 = vmul.f32 %v6874_v37, %v6874_v37 }
 0xa76   :  { %v3538_v0 = vsel %vm184_vm0, %v3518_v27, 0.0 }
 0xa77   :  { %v3495_v39 = vpop.xlane.xlu0 %3494  ;;  %3539 = vadd.xlane.f32.xlu2 %v3538_v0 }
 0xa78   :  { %v3503_v42 = vmul.f32 %v3495_v39, %v7178_v57 }
 0xa7a   :  { %v6885_v2 = vsub.f32 %v6805_v53, %v3503_v42  ;;  %v6905_v36 = vpop.permute.xlu2 %3691 }
 0xa7c   :  { %v3519_v61 = vmul.f32 %v6885_v2, %v6885_v2 }
 0xa7e   :  { %v3541_v60 = vsel %vm184_vm0, %v3519_v61, 0.0 }
 0xa7f   :  { %3542 = vadd.xlane.f32.xlu1 %v3541_v60 }
 0xa83   :  { %3706 = vperm.xlu0 %4193, %v3672_v44  }
 0xa87   :  { %v6899_v15 = vpop.permute.xlu1 %3686 }
 0xa8a   :  { %v6907_v35 = vpop.permute.xlu0 %3676 }
 0xa8f   :  { %3701 = vperm.xlu2 %4194, %v3671_v45   ;;  %v6903_v6 = vpop.permute.xlu1 %3696 }
 0xa98   :  { %3711 = vperm.xlu1 %4161, %v3673_v12  }
 0xaba   :  { %v3522_v33 = vpop.xlane.xlu2 %3521 }
 0xabb   :  { %v3544_v23 = vmul.f32 %v3522_v33, %v7178_v57 }
 0xabd   :  { %v3552_v53 = vadd.f32 1e-05, %v3544_v23 }
 0xabf   :  { %vm3566_vm14 = vweird.f32 %v3552_v53 }
 0xac2   :  { %v3525_v40 = vpop.xlane.xlu1 %3524 }
 0xac3   :  { %v3545_v18 = vmul.f32 %v3525_v40, %v7178_v57 }
 0xac5   :  { %v3553_v34 = vadd.f32 1e-05, %v3545_v18 }
 0xac7   :  { %4286 = vrsqrt.f32 %v3553_v34  ;;  %vm3576_vm2 = vweird.f32 %v3553_v34 }
 0xac8   :  { %4288 = vrsqrt.f32 %v3552_v53 }
 0xaca   :  { %v3528_v29 = vpop.xlane.xlu0 %3527 }
 0xacb   :  { %v3546_v51 = vmul.f32 %v3528_v29, %v7178_v57 }
 0xacd   :  { %v3554_v5 = vadd.f32 1e-05, %v3546_v51  ;;  %v6912_v32 = vpop.eup %4286 }
 0xace   :  { %v6915_v13 = vpop.eup %4288  ;;  %v3571_v26 = vmul.f32 %v6912_v32, %v3553_v34  ;;  %vm3577_vm15 = vweird.f32 %v6912_v32 }
 0xacf   :  { %4290 = vrsqrt.f32 %v3554_v5  ;;  %v3561_v50 = vmul.f32 %v6915_v13, %v3552_v53  ;;  %vm3567_vm13 = vweird.f32 %v6915_v13  ;;  %vm3578_vm6 = vmor %vm3576_vm2, %vm3577_vm15  ;;  %vm3586_vm7 = vweird.f32 %v3554_v5 }
 0xad0   :  { %v3572_v43 = vmul.f32 %v6912_v32, %v3571_v26  ;;  %vm6942_vm4 = vmor %vm3566_vm14, %vm3567_vm13 }
 0xad1   :  { %v3562_v14 = vmul.f32 %v6915_v13, %v3561_v50 }
 0xad2   :  { %v3531_v3 = vpop.xlane.xlu2 %3530  ;;  %v3573_v49 = vmul.f32 0.5, %v3572_v43 }
 0xad3   :  { %v3547_v59 = vmul.f32 %v3531_v3, %v7178_v57  ;;  %v3563_v38 = vmul.f32 0.5, %v3562_v14  ;;  %v6977_v14 = vld [vmem:[%s7082_s18 + $0x8] ss:$0 sm:$0xff] }
 0xad4   :  { %v3574_v21 = vsub.f32 1.5, %v3573_v49 }
 0xad5   :  { %v6917_v1 = vpop.eup %4290  ;;  %v3555_v28 = vadd.f32 1e-05, %v3547_v59  ;;  %v3564_v20 = vsub.f32 1.5, %v3563_v38 }
 0xad6   :  { %v3581_v41 = vmul.f32 %v6917_v1, %v3554_v5  ;;  %v3575_v0 = vmul.f32 %v6912_v32, %v3574_v21  ;;  %vm3587_vm3 = vweird.f32 %v6917_v1 }
 0xad7   :  { %4292 = vrsqrt.f32 %v3555_v28  ;;  %v3565_v22 = vmul.f32 %v6915_v13, %v3564_v20  ;;  %vm3588_vm8 = vmor %vm3586_vm7, %vm3587_vm3  ;;  %vm3596_vm9 = vweird.f32 %v3555_v28 }
 0xad8   :  { %v3582_v8 = vmul.f32 %v6917_v1, %v3581_v41  ;;  %v3579_v45 = vsel %vm3578_vm6, %v6912_v32, %v3575_v0 }
 0xad9   :  { %v3569_v34 = vsel %vm6942_vm4, %v6915_v13, %v3565_v22  ;;  %v3641_v5 = vmul.f32 %v3579_v45, %v6836_v56  ;;  %v4304_v13 = vld [vmem:[%s7082_s18] sm:$0xff] }
 0xada   :  { %v3534_v58 = vpop.xlane.xlu1 %3533  ;;  %v3583_v25 = vmul.f32 0.5, %v3582_v8  ;;  %v3640_v26 = vmul.f32 %v3569_v34, %v6826_v16 }
 0xadb   :  { %v3548_v62 = vmul.f32 %v3534_v58, %v7178_v57 }
 0xadc   :  { %v3584_v7 = vsub.f32 1.5, %v3583_v25 }
 0xadd   :  { %v4293_v46 = vpop.eup %4292  ;;  %v3556_v54 = vadd.f32 1e-05, %v3548_v62 }
 0xade   :  { %v3591_v24 = vmul.f32 %v4293_v46, %v3555_v28  ;;  %v3585_v42 = vmul.f32 %v6917_v1, %v3584_v7  ;;  %vm3597_vm5 = vweird.f32 %v4293_v46  ;;  %v6966_v28 = vperm.slane %v4304_v13, 7 }
 0xadf   :  { %4294 = vrsqrt.f32 %v3556_v54  ;;  %vm6948_vm10 = vmor %vm3596_vm9, %vm3597_vm5  ;;  %vm3606_vm12 = vweird.f32 %v3556_v54  ;;  %vm3818_vm9 = vcmask 1041409  }
 0xae0   :  { %v3592_v11 = vmul.f32 %v4293_v46, %v3591_v24  ;;  %v3589_v33 = vsel %vm3588_vm8, %v6917_v1, %v3585_v42  ;;  %v3649_v16 = vmul.f32 %v6966_v28, %v3640_v26  ;;  %v3806_v24 = vld [vmem:[%s7062_s12] sm:$0xff] }
 0xae1   :  { %v3642_v32 = vmul.f32 %v3589_v33, %v6843_v19  ;;  %v3650_v19 = vmul.f32 %v6966_v28, %v3641_v5  ;;  %3872 = vmatpush.msrb.mxu3 %v3806_v24 }
 0xae2   :  { %v3593_v63 = vmul.f32 0.5, %v3592_v11  ;;  %v3537_v47 = vpop.xlane.xlu0 %3536  ;;  %v3658_v21 = vadd.f32 %v6977_v14, %v3649_v16 }
 0xae3   :  { %v3549_v55 = vmul.f32 %v3537_v47, %v7178_v57  ;;  %v3651_v58 = vmul.f32 %v6966_v28, %v3642_v32  ;;  %v3659_v31 = vadd.f32 %v6977_v14, %v3650_v19 }
 0xae4   :  { %v3594_v10 = vsub.f32 1.5, %v3593_v63  ;;  %v3714_v0 = vmul.f32 %v6907_v35, %v3658_v21 }
 0xae5   :  { %v4295_v17 = vpop.eup %4294  ;;  %v6934_v27 = vadd.f32 1e-05, %v3549_v55  ;;  %v3715_v20 = vmul.f32 %v6901_v30, %v3659_v31  ;;  %v3803_v30 = vpop.f32.mrf.mxu1 }
 0xae6   :  { %v3601_v39 = vmul.f32 %v4295_v17, %v3556_v54  ;;  %v3595_v60 = vmul.f32 %v4293_v46, %v3594_v10  ;;  %vm3607_vm11 = vweird.f32 %v4295_v17 }
 0xae7   :  { %4296 = vrsqrt.f32 %v6934_v27  ;;  %vm3608_vm13 = vmor %vm3606_vm12, %vm3607_vm11  ;;  %vm3616_vm15 = vweird.f32 %v6934_v27  ;;  %vm3822_vm11 = vcmask 1043459   ;;  %vm3824_vm12 = vcmask 1044484  }
 0xae8   :  { %v3602_v44 = vmul.f32 %v4295_v17, %v3601_v39  ;;  %v3599_v53 = vsel %vm6948_vm10, %v4293_v46, %v3595_v60  ;;  %v7009_v60 = vld [vmem:[%s7063_s16] sm:$0xf]  ;;  %vm3820_vm10 = vcmask 1042434  }
 0xae9   :  { %v3643_v41 = vmul.f32 %v3599_v53, %v6850_v4  ;;  %v3782_v35 = vperm.slane %v7009_v60, 0 }
 0xaea   :  { %v3603_v12 = vmul.f32 0.5, %v3602_v44  ;;  %v3540_v40 = vpop.xlane.xlu2 %3539 }
 0xaeb   :  { %v3550_v23 = vmul.f32 %v3540_v40, %v7178_v57  ;;  %v3652_v4 = vmul.f32 %v6966_v28, %v3643_v41  ;;  %v3722_v40 = vsel %vm184_vm0, %v3714_v0, 0.0 }
 0xaec   :  { %v3604_v29 = vsub.f32 1.5, %v3603_v12 }
 0xaed   :  { %v4297_v51 = vpop.eup %4296  ;;  %v6959_v3 = vadd.f32 1e-05, %v3550_v23  ;;  %v3661_v63 = vadd.f32 %v6977_v14, %v3652_v4  ;;  %v3804_v23 = vadd.f32 %v3803_v30, %v3782_v35 }
 0xaee   :  { %v3605_v59 = vmul.f32 %v4295_v17, %v3604_v29  ;;  %v3611_v1 = vmul.f32 %v4297_v51, %v6934_v27  ;;  %vm3617_vm14 = vweird.f32 %v4297_v51 }
 0xaef   :  { %4298 = vrsqrt.f32 %v6959_v3  ;;  %vm3618_vm2 = vmor %vm3616_vm15, %vm3617_vm14  ;;  %v3717_v39 = vmul.f32 %v6905_v36, %v3661_v63  ;;  %vm3626_vm4 = vweird.f32 %v6959_v3  ;;  %4132 = vmatmul.msk.f32.vlgmr.msrb.gmra.mxu3 %vm184_vm0, %v3804_v23  ;;  %vm3828_vm14 = vcmask 1046534  }
 0xaf0   :  { %v3609_v56 = vsel %vm3608_vm13, %v4295_v17, %v3605_v59  ;;  %v3612_v50 = vmul.f32 %v4297_v51, %v3611_v1  ;;  %v3723_v59 = vrot.slane %v3722_v40, 4  ;;  %vm3826_vm13 = vcmask 1045509  }
 0xaf1   :  { %v3644_v43 = vmul.f32 %v3609_v56, %v6857_v48  ;;  %v3808_v48 = vld [vmem:[%s7061_s13] sm:$0xff]  ;;  %v3743_v33 = vsel %vm184_vm0, %v3717_v39, 0.0  ;;  %vm3830_vm15 = vcmask 1047559  }
 0xaf2   :  { %v3613_v8 = vmul.f32 0.5, %v3612_v50  ;;  %v3543_v62 = vpop.xlane.xlu1 %3542  ;;  %3849 = vmatpush.msrb.mxu2 %v3808_v48  ;;  %v3744_v1 = vrot.slane %v3743_v33, 4 }
 0xaf3   :  { %v3551_v46 = vmul.f32 %v3543_v62, %v7178_v57  ;;  %v3653_v54 = vmul.f32 %v6966_v28, %v3644_v43  ;;  %v3660_v57 = vadd.f32 %v6977_v14, %v3651_v58 }
 0xaf4   :  { %v3614_v49 = vsub.f32 1.5, %v3613_v8  ;;  %v3724_v8 = vadd.f32 %v3723_v59, %v3722_v40  ;;  %v3745_v62 = vadd.f32 %v3744_v1, %v3743_v33 }
 0xaf5   :  { %v4299_v52 = vpop.eup %4298  ;;  %v6990_v25 = vadd.f32 1e-05, %v3551_v46  ;;  %v3662_v47 = vadd.f32 %v6977_v14, %v3653_v54  ;;  %v3716_v17 = vmul.f32 %v6899_v15, %v3660_v57  ;;  %v3729_v15 = vsel %vm184_vm0, %v3715_v20, 0.0 }
 0xaf6   :  { %v3615_v38 = vmul.f32 %v4297_v51, %v3614_v49  ;;  %v3621_v11 = vmul.f32 %v4299_v52, %v6959_v3  ;;  %vm3627_vm3 = vweird.f32 %v4299_v52  ;;  %v3730_v34 = vrot.slane %v3729_v15, 4 }
 0xaf7   :  { %4300 = vrsqrt.f32 %v6990_v25  ;;  %v3718_v22 = vmul.f32 %v6903_v6, %v3662_v47  ;;  %v3736_v36 = vsel %vm184_vm0, %v3716_v17, 0.0  ;;  %v3702_v6 = vpop.permute.xlu2 %3701  ;;  %vm3628_vm5 = vmor %vm3626_vm4, %vm3627_vm3  ;;  %vm3636_vm7 = vweird.f32 %v6990_v25 }
 0xaf8   :  { %v3622_v7 = vmul.f32 %v4299_v52, %v3621_v11  ;;  %v3619_v55 = vsel %vm3618_vm2, %v4297_v51, %v3615_v38  ;;  %v3737_v5 = vrot.slane %v3736_v36, 4  ;;  %v3731_v56 = vadd.f32 %v3730_v34, %v3729_v15 }
 0xaf9   :  { %v3645_v10 = vmul.f32 %v3619_v55, %v6867_v9  ;;  %v3750_v53 = vsel %vm184_vm0, %v3718_v22, 0.0  ;;  %v3725_v57 = vrot.slane %v3724_v8, 2  ;;  %v3746_v38 = vrot.slane %v3745_v62, 2 }
 0xafa   :  { %v3623_v27 = vmul.f32 0.5, %v3622_v7  ;;  %v3751_v26 = vrot.slane %v3750_v53, 4  ;;  %v3738_v43 = vadd.f32 %v3737_v5, %v3736_v36  ;;  %v3732_v54 = vrot.slane %v3731_v56, 2 }
 0xafb   :  { %v3654_v42 = vmul.f32 %v6966_v28, %v3645_v10  ;;  %v3726_v10 = vadd.f32 %v3725_v57, %v3724_v8  ;;  %v3747_v17 = vadd.f32 %v3746_v38, %v3745_v62  ;;  %vm3932_vm2 = vcmask 31744  }
 0xafc   :  { %v3624_v61 = vsub.f32 1.5, %v3623_v27  ;;  %v3752_v4 = vadd.f32 %v3751_v26, %v3750_v53  ;;  %v3739_v24 = vrot.slane %v3738_v43, 2  ;;  %v3733_v47 = vadd.f32 %v3732_v54, %v3731_v56  ;;  %v3881_v56 = vld [vmem:[%s7064_s14 + $0x8] sm:$0xff] }
 0xafd   :  { %v4301_v9 = vpop.eup %4300  ;;  %v3663_v44 = vadd.f32 %v6977_v14, %v3654_v42  ;;  %v3727_v15 = vrot.slane %v3726_v10, 1  ;;  %3900 = vmatpush.msra.mxu1 %v3881_v56 }
 0xafe   :  { %v3625_v45 = vmul.f32 %v4299_v52, %v3624_v61  ;;  %v3631_v12 = vmul.f32 %v4301_v9, %v6990_v25  ;;  %vm3637_vm6 = vweird.f32 %v4301_v9  ;;  %v3753_v21 = vrot.slane %v3752_v4, 2 }
 0xaff   :  { %v3719_v18 = vmul.f32 %v3702_v6, %v3663_v44  ;;  %vm3638_vm8 = vmor %vm3636_vm7, %vm3637_vm6  ;;  %v3740_v55 = vadd.f32 %v3739_v24, %v3738_v43  ;;  %v3734_v22 = vrot.slane %v3733_v47, 1  ;;  %v3728_v40 = vadd.f32 %v3727_v15, %v3726_v10 }
 0xb00   :  { %v3632_v29 = vmul.f32 %v4301_v9, %v3631_v12  ;;  %v3629_v51 = vsel %vm3628_vm5, %v4299_v52, %v3625_v45  ;;  %v3754_v39 = vadd.f32 %v3753_v21, %v3752_v4  ;;  %v3877_v43 = vperm.slane %v7009_v60, 1 }
 0xb01   :  { %v3757_v32 = vsel %vm184_vm0, %v3719_v18, 0.0  ;;  %v3646_v3 = vmul.f32 %v3629_v51, %v6874_v37  ;;  %v3707_v37 = vpop.permute.xlu0 %3706  ;;  %v3741_v61 = vrot.slane %v3740_v55, 1  ;;  %v3735_v36 = vadd.f32 %v3734_v22, %v3733_v47 }
 0xb02   :  { %v3633_v13 = vmul.f32 0.5, %v3632_v29  ;;  %v3758_v50 = vrot.slane %v3757_v32, 4  ;;  %v3755_v35 = vrot.slane %v3754_v39, 1  ;;  %v3882_v4 = vperm.slane %v7009_v60, 2 }
 0xb03   :  { %v3655_v41 = vmul.f32 %v6966_v28, %v3646_v3  ;;  %v3819_v53 = vsel %vm3818_vm9, %v3735_v36, %v3728_v40 }
 0xb04   :  { %v3634_v19 = vsub.f32 1.5, %v3633_v13  ;;  %v3759_v49 = vadd.f32 %v3758_v50, %v3757_v32  ;;  %v3756_v23 = vadd.f32 %v3755_v35, %v3754_v39  ;;  %v3880_v50 = vld [vmem:[%s7064_s14] sm:$0xff] }
 0xb05   :  { %v3664_v58 = vadd.f32 %v6977_v14, %v3655_v41  ;;  %3901 = vmatpush.msra.mxu1 %v3880_v50 }
 0xb06   :  { %v3635_v16 = vmul.f32 %v4301_v9, %v3634_v19  ;;  %v3760_v25 = vrot.slane %v3759_v49, 2 }
 0xb07   :  { %v3720_v46 = vmul.f32 %v3707_v37, %v3664_v58  ;;  %v3907_v37 = vld [vmem:[%s7065_s15] sm:$0xff] }
 0xb08   :  { %v3639_v48 = vsel %vm3638_vm8, %v4301_v9, %v3635_v16  ;;  %3927 = vmatpush.msra.mxu2 %v3907_v37 }
 0xb09   :  { %v3764_v52 = vsel %vm184_vm0, %v3720_v46, 0.0  ;;  %v3647_v31 = vmul.f32 %v3639_v48, %v6885_v2  ;;  %v3761_v2 = vadd.f32 %v3760_v25, %v3759_v49  ;;  %v3908_v48 = vperm.slane %v7009_v60, 3 }
 0xb0a   :  { %v3765_v11 = vrot.slane %v3764_v52, 4  ;;  %v3712_v0 = vpop.permute.xlu1 %3711 }
 0xb0b   :  { %v3656_v63 = vmul.f32 %v6966_v28, %v3647_v31  ;;  %v3748_v28 = vrot.slane %v3747_v17, 1  ;;  %v3762_v45 = vrot.slane %v3761_v2, 1 }
 0xb0c   :  { %v3766_v7 = vadd.f32 %v3765_v11, %v3764_v52 }
 0xb0d   :  { %v3665_v20 = vadd.f32 %v6977_v14, %v3656_v63  ;;  %v3742_v14 = vadd.f32 %v3741_v61, %v3740_v55  ;;  %v3749_v33 = vadd.f32 %v3748_v28, %v3747_v17  ;;  %v3763_v34 = vadd.f32 %v3762_v45, %v3761_v2 }
 0xb0e   :  { %v3767_v27 = vrot.slane %v3766_v7, 2 }
 0xb0f   :  { %v3721_v42 = vmul.f32 %v3712_v0, %v3665_v20  ;;  %v3821_v51 = vsel %vm3820_vm10, %v3742_v14, %v3819_v53 }
 0xb10   :  { %v3768_v30 = vadd.f32 %v3767_v27, %v3766_v7  ;;  %v3823_v32 = vsel %vm3822_vm11, %v3749_v33, %v3821_v51 }
 0xb11   :  { %v3771_v9 = vsel %vm184_vm0, %v3721_v42, 0.0  ;;  %v3825_v59 = vsel %vm3824_vm12, %v3756_v23, %v3823_v32 }
 0xb12   :  { %v3772_v44 = vrot.slane %v3771_v9, 4  ;;  %v3769_v12 = vrot.slane %v3768_v30, 1  ;;  %v3827_v1 = vsel %vm3826_vm13, %v3763_v34, %v3825_v59 }
 0xb14   :  { %v3773_v6 = vadd.f32 %v3772_v44, %v3771_v9  ;;  %v3770_v5 = vadd.f32 %v3769_v12, %v3768_v30 }
 0xb16   :  { %v3774_v18 = vrot.slane %v3773_v6, 2  ;;  %v3829_v26 = vsel %vm3828_vm14, %v3770_v5, %v3827_v1 }
 0xb18   :  { %v3775_v29 = vadd.f32 %v3774_v18, %v3773_v6 }
 0xb1a   :  { %v3776_v3 = vrot.slane %v3775_v29, 1 }
 0xb1c   :  { %v3777_v13 = vadd.f32 %v3776_v3, %v3775_v29 }
 0xb1e   :  { %v3831_v41 = vsel %vm3830_vm15, %v3777_v13, %v3829_v26 }
 0xb1f   :  { %4131 = vmatmul.msk.f32.vlgmr.msrb.gmra.mxu2 %vm184_vm0, %v3831_v41 }
 0xb72   :  { %v3874_v19 = vpop.f32.mrf.mxu3 }
 0xba2   :  { %v3851_v58 = vpop.f32.mrf.mxu2 }
 0xba3   :  { %v3875_v8 = vadd.f32 %v3874_v19, %v3851_v58 }
 0xba5   :  { %v3878_v62 = vadd.f32 %v3877_v43, %v3875_v8 }
 0xba7   :  { %v3879_v16 = vmax.f32 %v3878_v62, 0.0 }
 0xba9   :  { %4133 = vmatmul.msk.f32.vlgmr.msra.gmra.mxu1 %vm184_vm0, %v3879_v16 }
 0xc26   :  { %v3903_v46 = vpop.f32.mrf.mxu1 }
 0xc27   :  { %v3904_v54 = vadd.f32 %v3903_v46, %v3882_v4 }
 0xc29   :  { %v3906_v49 = vmax.f32 %v3904_v54, 0.0 }
 0xc2b   :  { %4134 = vmatmul.msk.f32.vlgmr.msra.gmra.mxu2 %vm312_vm1, %v3906_v49 }
 0xcae   :  { %v3929_v24 = vpop.f32.mrf.mxu2 }
 0xcaf   :  { %v3930_v52 = vadd.f32 %v3929_v24, %v3908_v48 }
 0xcb1   :  { %3933 = vst.msk [vmem:[%s7066_s17] sm:$0xff] %vm3932_vm2, %v3930_v52 }

</bundles_post_ra>
